<compile_context>
chip_gen: v7x
topology: tpu7x:2x2x1
jax: 0.10.0
libtpu: 0.0.40
codegen_flags: <defaults>
</compile_context>

<pallas_src>
import functools
import math

import jax
import jax.numpy as jnp
from jax import lax
from jax.experimental import pallas as pl
from jax.experimental.pallas import tpu as pltpu


def _encoder_kernel(
    x_ref,       # (tT, bB, D)  driving input, time-major block (streams over time)
    xbdt_ref,    # (bB, D, T)   driving input permuted (0,2,1) (resident; prologue only)
    w1h_ref,     # (H, T)       attn_layer1 weight^T, hidden half
    w1c_ref,     # (H, T)       attn_layer1 weight^T, cell half
    b1_ref,      # (1, T)
    w2t_ref,     # (T, T)       attn_layer2 weight^T
    b2_ref,      # (1, T)
    w3_ref,      # (1, T)       attn_layer3 weight
    b3_ref,      # (1, 1)
    wih_ref,     # (D, 4H)      LSTM W_ih^T
    whh_ref,     # (H, 4H)      LSTM W_hh^T
    blstm_ref,   # (1, 4H)      b_ih + b_hh
    out_ref,     # (tT, bB, H)  encoded output block (streams over time)
    h_ref,       # scratch (bB, H)     persistent hidden state
    c_ref,       # scratch (bB, H)     persistent cell state
    s2_ref,      # scratch (bB, D, T)  fused, hoisted attn_layer2 scores
    *,
    use_softmax: bool,
):
    tT, bB, D = x_ref.shape
    H = h_ref.shape[1]
    T = w2t_ref.shape[0]

    # First time-block of every batch block: zero the LSTM state and compute the
    # time-invariant attn_layer2 scores once, straight into VMEM scratch (never
    # written to / re-read from HBM).  The MXU is idle here, so the batched
    # (bB, D, T) @ (T, T) matmul is effectively free.
    @pl.when(pl.program_id(1) == 0)
    def _():
        h_ref[...] = jnp.zeros_like(h_ref)
        c_ref[...] = jnp.zeros_like(c_ref)
        w2b = jnp.broadcast_to(w2t_ref[...][None], (bB, T, T))
        s2_ref[...] = (
            jnp.einsum("bdt,bts->bds", xbdt_ref[...], w2b,
                       preferred_element_type=jnp.float32)
            + b2_ref[...][None])

    s2 = s2_ref[...]                    # (bB, D, T)
    w1h = w1h_ref[...]                  # (H, T)
    w1c = w1c_ref[...]                  # (H, T)
    b1 = b1_ref[...]                    # (1, T)
    w3 = w3_ref[...][None]              # (1, 1, T)
    b3 = b3_ref[...]                    # (1, 1)
    wih = wih_ref[...]                  # (D, 4H)
    whh = whh_ref[...]                  # (H, 4H)
    blstm = blstm_ref[...]              # (1, 4H)

    def step(lt, carry):
        h = h_ref[...]                  # (bB, H)
        c = c_ref[...]                  # (bB, H)

        if use_softmax:   # static python branch, mirrors `if batch_size > 1`
            # attn_layer1(cat(h, c)) == h @ W1[:, :H]^T + c @ W1[:, H:]^T
            s1 = (jnp.dot(h, w1h, preferred_element_type=jnp.float32)
                  + jnp.dot(c, w1c, preferred_element_type=jnp.float32)
                  + b1)                                           # (bB, T)
            comb = jnp.tanh(s1[:, None, :] + s2)                  # (bB, D, T)
            logits = jnp.sum(comb * w3, axis=-1) + b3             # (bB, D)
            m = jnp.max(logits, axis=1, keepdims=True)
            e = jnp.exp(logits - m)
            attn = e * pl.reciprocal(jnp.sum(e, axis=1, keepdims=True),
                                     approx=True)
        else:
            # batch_size == 1 in the reference -> attention weights are all ones.
            attn = jnp.ones((bB, D), jnp.float32)

        x_t = x_ref[lt]                                           # (bB, D)
        weighted = attn * x_t
        # TODO(synk): dropout_layer implemented as identity (inference mode).

        # LSTM cell, gate order i, f, g, o.  No [x | h] staging buffer: two MXU
        # pushes instead (the matrix unit has plenty of slack).
        gates = (jnp.dot(weighted, wih, preferred_element_type=jnp.float32)
                 + jnp.dot(h, whh, preferred_element_type=jnp.float32)
                 + blstm)                                         # (bB, 4H)
        i_g = jax.nn.sigmoid(gates[:, 0 * H:1 * H])
        f_g = jax.nn.sigmoid(gates[:, 1 * H:2 * H])
        g_g = jnp.tanh(gates[:, 2 * H:3 * H])
        o_g = jax.nn.sigmoid(gates[:, 3 * H:4 * H])
        c_new = f_g * c + i_g * g_g
        h_new = o_g * jnp.tanh(c_new)

        h_ref[...] = h_new
        c_ref[...] = c_new
        out_ref[lt] = h_new                       # encoded_output[:, t, :]
        return carry

    # tT <= 16 by construction -> always fully unrolled (LLO visibility).
    lax.fori_loop(0, tT, step, 0, unroll=True)


def _vmem_limit_bytes():
    """Per-generation scoped-VMEM limit: physical capacity minus headroom."""
    try:
        cap = int(pltpu.get_tpu_info().vmem_capacity_bytes)
    except Exception:
        cap = 64 * 1024 * 1024
    return max(32 * 1024 * 1024, cap - 16 * 1024 * 1024)


def attention_encoder_forward(x, params, hidden_dim):
    """x: (B, T, D) float32, PyTorch batch-major convention. Returns (B, T, H)."""
    B, T, D = x.shape
    H = hidden_dim
    x = x.astype(jnp.float32)

    # Pad batch to a sublane-full multiple of 8 (padded rows are independent
    # per-row junk and are sliced off at the end).
    Bp = ((B + 7) // 8) * 8
    if Bp != B:
        x = jnp.pad(x, ((0, Bp - B), (0, 0), (0, 0)))

    # Time-block size: <= 16 so the in-kernel loop always unrolls; pad T to a
    # multiple of it (padded steps run on zero inputs and are sliced off).
    tT = T if T <= 16 else 16
    Tpad = ((T + tT - 1) // tT) * tT
    nT = Tpad // tT

    # Batch-block for the leading "parallel" grid axis (v7x megacore; harmless
    # / serialized on single-core v5e & v6e).
    bB = Bp // 2 if (Bp >= 16 and (Bp // 2) % 8 == 0) else Bp
    nB = Bp // bB

    x_tbd = jnp.transpose(x, (1, 0, 2))                      # (T, Bp, D)
    if Tpad != T:
        x_tbd = jnp.pad(x_tbd, ((0, Tpad - T), (0, 0), (0, 0)))
    x_bdt = jnp.transpose(x, (0, 2, 1))                      # (Bp, D, T)

    f32 = jnp.float32
    w1h = params["w1"][:, :H].T.astype(f32)                  # (H, T)
    w1c = params["w1"][:, H:].T.astype(f32)                  # (H, T)
    b1 = params["b1"].reshape(1, T).astype(f32)
    w2t = params["w2"].T.astype(f32)                         # (T, T)
    b2 = params["b2"].reshape(1, T).astype(f32)
    w3 = params["w3"].reshape(1, T).astype(f32)
    b3 = params["b3"].reshape(1, 1).astype(f32)
    wih = params["wih"].T.astype(f32)                        # (D, 4H)
    whh = params["whh"].T.astype(f32)                        # (H, 4H)
    blstm = (params["bih"] + params["bhh"]).reshape(1, 4 * H).astype(f32)

    kernel = functools.partial(_encoder_kernel, use_softmax=(B > 1))
    out_tbh = pl.pallas_call(
        kernel,
        out_shape=jax.ShapeDtypeStruct((Tpad, Bp, H), f32),
        grid=(nB, nT),
        in_specs=[
            pl.BlockSpec((tT, bB, D), lambda b, i: (i, b, 0)),   # streams over time
            pl.BlockSpec((bB, D, T), lambda b, i: (b, 0, 0)),    # resident per batch block
            pl.BlockSpec((H, T), lambda b, i: (0, 0)),
            pl.BlockSpec((H, T), lambda b, i: (0, 0)),
            pl.BlockSpec((1, T), lambda b, i: (0, 0)),
            pl.BlockSpec((T, T), lambda b, i: (0, 0)),
            pl.BlockSpec((1, T), lambda b, i: (0, 0)),
            pl.BlockSpec((1, T), lambda b, i: (0, 0)),
            pl.BlockSpec((1, 1), lambda b, i: (0, 0)),
            pl.BlockSpec((D, 4 * H), lambda b, i: (0, 0)),
            pl.BlockSpec((H, 4 * H), lambda b, i: (0, 0)),
            pl.BlockSpec((1, 4 * H), lambda b, i: (0, 0)),
        ],
        out_specs=pl.BlockSpec((tT, bB, H), lambda b, i: (i, b, 0)),
        scratch_shapes=[pltpu.VMEM((bB, H), f32),
                        pltpu.VMEM((bB, H), f32),
                        pltpu.VMEM((bB, D, T), f32)],
        compiler_params=pltpu.CompilerParams(
            dimension_semantics=("parallel", "arbitrary"),
            vmem_limit_bytes=_vmem_limit_bytes()),
    )(x_tbd, x_bdt, w1h, w1c, b1, w2t, b2, w3, b3, wih, whh, blstm)

    return jnp.transpose(out_tbh[:T], (1, 0, 2))[:B]             # (B, T, H)


def init_params(key, input_dim, hidden_dim, seq_len):
    ks = jax.random.split(key, 10)

    def u(k, shape, scale):
        return jax.random.uniform(k, shape, jnp.float32, -scale, scale)

    s_lstm = 1.0 / math.sqrt(hidden_dim)
    s_a1 = 1.0 / math.sqrt(2 * hidden_dim)
    s_a23 = 1.0 / math.sqrt(seq_len)
    return dict(
        wih=u(ks[0], (4 * hidden_dim, input_dim), s_lstm),
        whh=u(ks[1], (4 * hidden_dim, hidden_dim), s_lstm),
        bih=u(ks[2], (4 * hidden_dim,), s_lstm),
        bhh=u(ks[3], (4 * hidden_dim,), s_lstm),
        w1=u(ks[4], (seq_len, 2 * hidden_dim), s_a1),
        b1=u(ks[5], (seq_len,), s_a1),
        w2=u(ks[6], (seq_len, seq_len), s_a23),
        b2=u(ks[7], (seq_len,), s_a23),
        w3=u(ks[8], (1, seq_len), s_a23),
        b3=u(ks[9], (1,), s_a23),
    )


def reference_forward(x, params, hidden_dim):
    """Pure-JAX f32 mirror of the PyTorch forward (dropout = identity)."""
    B, T, D = x.shape
    H = hidden_dim
    hi = lax.Precision.HIGHEST
    h = jnp.zeros((B, H), jnp.float32)
    c = jnp.zeros((B, H), jnp.float32)
    xp = jnp.transpose(x, (0, 2, 1))
    s2 = jnp.einsum("bdt,st->bds", xp, params["w2"], precision=hi) + params["b2"]
    outs = []
    for t in range(T):
        hc = jnp.concatenate([h, c], axis=-1)
        s1 = jnp.dot(hc, params["w1"].T, precision=hi) + params["b1"]
        comb = jnp.tanh(s1[:, None, :] + s2)
        logits = jnp.einsum("bdt,ot->bdo", comb, params["w3"],
                            precision=hi)[:, :, 0] + params["b3"][0]
        attn = jax.nn.softmax(logits, axis=1) if B > 1 else jnp.ones_like(logits)
        wi = attn * x[:, t, :]
        gates = (jnp.dot(wi, params["wih"].T, precision=hi) + params["bih"]
                 + jnp.dot(h, params["whh"].T, precision=hi) + params["bhh"])
        i_g = jax.nn.sigmoid(gates[:, 0 * H:1 * H])
        f_g = jax.nn.sigmoid(gates[:, 1 * H:2 * H])
        g_g = jnp.tanh(gates[:, 2 * H:3 * H])
        o_g = jax.nn.sigmoid(gates[:, 3 * H:4 * H])
        c = f_g * c + i_g * g_g
        h = o_g * jnp.tanh(c)
        outs.append(h)
    return jnp.stack(outs, axis=1)


if __name__ == "__main__":
    batch, input_dim, hidden_dim, seq_len = 2, 4, 32, 8

    key = jax.random.PRNGKey(0)
    kx, kp = jax.random.split(key)
    x = jax.random.normal(kx, (batch, seq_len, input_dim), jnp.float32)
    params = init_params(kp, input_dim, hidden_dim, seq_len)

    fwd = jax.jit(attention_encoder_forward, static_argnums=(2,))
    out = fwd(x, params, hidden_dim)
    out = jax.block_until_ready(out)
    assert out.shape == (batch, seq_len, hidden_dim)

    ref = reference_forward(x, params, hidden_dim)
    if not jnp.allclose(out, ref, atol=2e-2, rtol=2e-2):
        raise AssertionError(
            "kernel/reference mismatch, max abs err "
            f"{float(jnp.max(jnp.abs(out - ref))):.3e}")

    print("KERNEL_OK")
</pallas_src>

<mosaic_0001>
module attributes {stable_mosaic.version = 11 : i64} {
  func.func @_encoder_kernel(%arg0: i32, %arg1: i32, %arg2: memref<8x8x4xf32, #tpu.memory_space<vmem>>, %arg3: memref<8x4x8xf32, #tpu.memory_space<vmem>>, %arg4: memref<32x8xf32, #tpu.memory_space<vmem>>, %arg5: memref<32x8xf32, #tpu.memory_space<vmem>>, %arg6: memref<1x8xf32, #tpu.memory_space<vmem>>, %arg7: memref<8x8xf32, #tpu.memory_space<vmem>>, %arg8: memref<1x8xf32, #tpu.memory_space<vmem>>, %arg9: memref<1x8xf32, #tpu.memory_space<vmem>>, %arg10: memref<1x1xf32, #tpu.memory_space<vmem>>, %arg11: memref<4x128xf32, #tpu.memory_space<vmem>>, %arg12: memref<32x128xf32, #tpu.memory_space<vmem>>, %arg13: memref<1x128xf32, #tpu.memory_space<vmem>>, %arg14: memref<8x8x32xf32, #tpu.memory_space<vmem>>, %arg15: memref<8x32xf32, #tpu.memory_space<vmem>>, %arg16: memref<8x32xf32, #tpu.memory_space<vmem>>, %arg17: memref<8x4x8xf32, #tpu.memory_space<vmem>>) attributes {dimension_semantics = [#tpu.dimension_semantics<parallel>, #tpu.dimension_semantics<arbitrary>], iteration_bounds = array<i64: 1, 1>, scalar_prefetch = 0 : i64, scratch_operands = 3 : i64, tpu.core_type = #tpu.core_type<tc>, window_params = [{transform_indices = @transform_0, window_bounds = array<i64: 8, 8, 4>}, {transform_indices = @transform_1, window_bounds = array<i64: 8, 4, 8>}, {pipeline_mode = #tpu.pipeline_mode<synchronous>, transform_indices = @transform_2, window_bounds = array<i64: 32, 8>}, {pipeline_mode = #tpu.pipeline_mode<synchronous>, transform_indices = @transform_3, window_bounds = array<i64: 32, 8>}, {pipeline_mode = #tpu.pipeline_mode<synchronous>, transform_indices = @transform_4, window_bounds = array<i64: 1, 8>}, {pipeline_mode = #tpu.pipeline_mode<synchronous>, transform_indices = @transform_5, window_bounds = array<i64: 8, 8>}, {pipeline_mode = #tpu.pipeline_mode<synchronous>, transform_indices = @transform_6, window_bounds = array<i64: 1, 8>}, {pipeline_mode = #tpu.pipeline_mode<synchronous>, transform_indices = @transform_7, window_bounds = array<i64: 1, 8>}, {pipeline_mode = #tpu.pipeline_mode<synchronous>, transform_indices = @transform_8, window_bounds = array<i64: 1, 1>}, {pipeline_mode = #tpu.pipeline_mode<synchronous>, transform_indices = @transform_9, window_bounds = array<i64: 4, 128>}, {pipeline_mode = #tpu.pipeline_mode<synchronous>, transform_indices = @transform_10, window_bounds = array<i64: 32, 128>}, {pipeline_mode = #tpu.pipeline_mode<synchronous>, transform_indices = @transform_11, window_bounds = array<i64: 1, 128>}, {transform_indices = @transform_12, window_bounds = array<i64: 8, 8, 32>}]} {
    %c0_i32 = arith.constant 0 : i32
    %0 = arith.cmpi eq, %arg1, %c0_i32 : i32
    %1 = arith.extui %0 : i1 to i32
    %c0_i32_0 = arith.constant 0 : i32
    %2 = arith.cmpi ne, %1, %c0_i32_0 : i32
    scf.if %2 {
      %cst_195 = arith.constant 0.000000e+00 : f32
      %541 = vector.broadcast %cst_195 : f32 to vector<8x32xf32>
      %c0_196 = arith.constant 0 : index
      %c0_197 = arith.constant 0 : index
      %542 = vector.load %arg15[%c0_196, %c0_197] : memref<8x32xf32, #tpu.memory_space<vmem>>, vector<8x32xf32>
      tpu.vector_store %arg15[%c0_196, %c0_197], %541 {strides = array<i32>} : memref<8x32xf32, #tpu.memory_space<vmem>>, vector<8x32xf32>,
      %cst_198 = arith.constant 0.000000e+00 : f32
      %543 = vector.broadcast %cst_198 : f32 to vector<8x32xf32>
      %c0_199 = arith.constant 0 : index
      %c0_200 = arith.constant 0 : index
      %544 = vector.load %arg16[%c0_199, %c0_200] : memref<8x32xf32, #tpu.memory_space<vmem>>, vector<8x32xf32>
      tpu.vector_store %arg16[%c0_199, %c0_200], %543 {strides = array<i32>} : memref<8x32xf32, #tpu.memory_space<vmem>>, vector<8x32xf32>,
      %c0_201 = arith.constant 0 : index
      %c0_202 = arith.constant 0 : index
      %545 = vector.load %arg7[%c0_201, %c0_202] : memref<8x8xf32, #tpu.memory_space<vmem>>, vector<8x8xf32>
      %546 = vector.shape_cast %545 : vector<8x8xf32> to vector<1x8x8xf32>
      %547 = vector.shape_cast %546 : vector<1x8x8xf32> to vector<1x8x8xf32>
      %548 = vector.broadcast %547 : vector<1x8x8xf32> to vector<8x8x8xf32>
      %c0_203 = arith.constant 0 : index
      %c0_204 = arith.constant 0 : index
      %c0_205 = arith.constant 0 : index
      %549 = vector.load %arg3[%c0_203, %c0_204, %c0_205] : memref<8x4x8xf32, #tpu.memory_space<vmem>>, vector<8x4x8xf32>
      "tpu.trace_start"() <{level = 10 : i32, message = "bdt,bts->bds"}> : () -> ()
      %cst_206 = arith.constant dense<0.000000e+00> : vector<8x4x8xf32>
      %550 = tpu.matmul %549, %548, %cst_206 {dimension_numbers = #tpu.dot_dimension_numbers<[2], [1], [1], [2], [0, 0, 0, 1, 1, 2], [0], [0]>} : vector<8x4x8xf32>, vector<8x8x8xf32>, vector<8x4x8xf32> -> vector<8x4x8xf32>
      "tpu.trace_stop"() : () -> ()
      %c0_207 = arith.constant 0 : index
      %c0_208 = arith.constant 0 : index
      %551 = vector.load %arg8[%c0_207, %c0_208] : memref<1x8xf32, #tpu.memory_space<vmem>>, vector<1x8xf32>
      %552 = vector.shape_cast %551 : vector<1x8xf32> to vector<1x1x8xf32>
      %553 = vector.broadcast %552 : vector<1x1x8xf32> to vector<8x4x8xf32>
      %554 = arith.addf %550, %553 : vector<8x4x8xf32>
      %c0_209 = arith.constant 0 : index
      %c0_210 = arith.constant 0 : index
      %c0_211 = arith.constant 0 : index
      %555 = vector.load %arg17[%c0_209, %c0_210, %c0_211] : memref<8x4x8xf32, #tpu.memory_space<vmem>>, vector<8x4x8xf32>
      tpu.vector_store %arg17[%c0_209, %c0_210, %c0_211], %554 {strides = array<i32>} : memref<8x4x8xf32, #tpu.memory_space<vmem>>, vector<8x4x8xf32>,
    } else {
    }
    %c0 = arith.constant 0 : index
    %c0_1 = arith.constant 0 : index
    %c0_2 = arith.constant 0 : index
    %3 = vector.load %arg17[%c0, %c0_1, %c0_2] : memref<8x4x8xf32, #tpu.memory_space<vmem>>, vector<8x4x8xf32>
    %c0_3 = arith.constant 0 : index
    %c0_4 = arith.constant 0 : index
    %4 = vector.load %arg4[%c0_3, %c0_4] : memref<32x8xf32, #tpu.memory_space<vmem>>, vector<32x8xf32>
    %c0_5 = arith.constant 0 : index
    %c0_6 = arith.constant 0 : index
    %5 = vector.load %arg5[%c0_5, %c0_6] : memref<32x8xf32, #tpu.memory_space<vmem>>, vector<32x8xf32>
    %c0_7 = arith.constant 0 : index
    %c0_8 = arith.constant 0 : index
    %6 = vector.load %arg6[%c0_7, %c0_8] : memref<1x8xf32, #tpu.memory_space<vmem>>, vector<1x8xf32>
    %c0_9 = arith.constant 0 : index
    %c0_10 = arith.constant 0 : index
    %7 = vector.load %arg9[%c0_9, %c0_10] : memref<1x8xf32, #tpu.memory_space<vmem>>, vector<1x8xf32>
    %8 = vector.shape_cast %7 : vector<1x8xf32> to vector<1x1x8xf32>
    %c0_11 = arith.constant 0 : index
    %c0_12 = arith.constant 0 : index
    %9 = vector.load %arg10[%c0_11, %c0_12] : memref<1x1xf32, #tpu.memory_space<vmem>>, vector<1x1xf32>
    %c0_13 = arith.constant 0 : index
    %c0_14 = arith.constant 0 : index
    %10 = vector.load %arg11[%c0_13, %c0_14] : memref<4x128xf32, #tpu.memory_space<vmem>>, vector<4x128xf32>
    %c0_15 = arith.constant 0 : index
    %c0_16 = arith.constant 0 : index
    %11 = vector.load %arg12[%c0_15, %c0_16] : memref<32x128xf32, #tpu.memory_space<vmem>>, vector<32x128xf32>
    %c0_17 = arith.constant 0 : index
    %c0_18 = arith.constant 0 : index
    %12 = vector.load %arg13[%c0_17, %c0_18] : memref<1x128xf32, #tpu.memory_space<vmem>>, vector<1x128xf32>
    %c0_i32_19 = arith.constant 0 : i32
    %c0_20 = arith.constant 0 : index
    %c0_21 = arith.constant 0 : index
    %13 = vector.load %arg15[%c0_20, %c0_21] : memref<8x32xf32, #tpu.memory_space<vmem>>, vector<8x32xf32>
    %c0_22 = arith.constant 0 : index
    %c0_23 = arith.constant 0 : index
    %14 = vector.load %arg16[%c0_22, %c0_23] : memref<8x32xf32, #tpu.memory_space<vmem>>, vector<8x32xf32>
    %cst = arith.constant dense<0.000000e+00> : vector<8x8xf32>
    %15 = tpu.matmul %13, %4, %cst {dimension_numbers = #tpu.dot_dimension_numbers<[1], [0], [0], [1], [0, 0, 1, 1], [], []>} : vector<8x32xf32>, vector<32x8xf32>, vector<8x8xf32> -> vector<8x8xf32>
    %cst_24 = arith.constant dense<0.000000e+00> : vector<8x8xf32>
    %16 = tpu.matmul %14, %5, %cst_24 {dimension_numbers = #tpu.dot_dimension_numbers<[1], [0], [0], [1], [0, 0, 1, 1], [], []>} : vector<8x32xf32>, vector<32x8xf32>, vector<8x8xf32> -> vector<8x8xf32>
    %17 = arith.addf %15, %16 : vector<8x8xf32>
    %18 = vector.broadcast %6 : vector<1x8xf32> to vector<8x8xf32>
    %19 = arith.addf %17, %18 : vector<8x8xf32>
    %20 = vector.shape_cast %19 : vector<8x8xf32> to vector<8x1x8xf32>
    %21 = vector.broadcast %20 : vector<8x1x8xf32> to vector<8x4x8xf32>
    %22 = arith.addf %21, %3 : vector<8x4x8xf32>
    %23 = math.tanh %22 : vector<8x4x8xf32>
    %24 = vector.broadcast %8 : vector<1x1x8xf32> to vector<8x4x8xf32>
    %25 = arith.mulf %23, %24 : vector<8x4x8xf32>
    %cst_25 = arith.constant dense<0.000000e+00> : vector<8x4xf32>
    %26 = vector.multi_reduction <add>, %25, %cst_25 [2] : vector<8x4x8xf32> to vector<8x4xf32>
    %27 = vector.broadcast %9 : vector<1x1xf32> to vector<8x4xf32>
    %28 = arith.addf %26, %27 : vector<8x4xf32>
    %cst_26 = arith.constant dense<0xFF800000> : vector<8xf32>
    %29 = vector.multi_reduction <maximumf>, %28, %cst_26 [1] : vector<8x4xf32> to vector<8xf32>
    %30 = vector.shape_cast %29 : vector<8xf32> to vector<8x1xf32>
    %31 = vector.broadcast %30 : vector<8x1xf32> to vector<8x4xf32>
    %32 = arith.subf %28, %31 : vector<8x4xf32>
    %33 = math.exp %32 : vector<8x4xf32>
    %cst_27 = arith.constant dense<0.000000e+00> : vector<8xf32>
    %34 = vector.multi_reduction <add>, %33, %cst_27 [1] : vector<8x4xf32> to vector<8xf32>
    %35 = vector.shape_cast %34 : vector<8xf32> to vector<8x1xf32>
    %36 = tpu.reciprocal %35 {approx = true} : vector<8x1xf32> -> vector<8x1xf32>
    %37 = vector.broadcast %36 : vector<8x1xf32> to vector<8x4xf32>
    %38 = arith.mulf %33, %37 : vector<8x4xf32>
    %39 = arith.index_cast %c0_i32_19 : i32 to index
    %c0_28 = arith.constant 0 : index
    %c0_29 = arith.constant 0 : index
    %40 = vector.load %arg2[%39, %c0_28, %c0_29] : memref<8x8x4xf32, #tpu.memory_space<vmem>>, vector<1x8x4xf32>
    %41 = vector.shape_cast %40 : vector<1x8x4xf32> to vector<8x4xf32>
    %42 = arith.mulf %38, %41 : vector<8x4xf32>
    %cst_30 = arith.constant dense<0.000000e+00> : vector<8x128xf32>
    %43 = tpu.matmul %42, %10, %cst_30 {dimension_numbers = #tpu.dot_dimension_numbers<[1], [0], [0], [1], [0, 0, 1, 1], [], []>} : vector<8x4xf32>, vector<4x128xf32>, vector<8x128xf32> -> vector<8x128xf32>
    %cst_31 = arith.constant dense<0.000000e+00> : vector<8x128xf32>
    %44 = tpu.matmul %13, %11, %cst_31 {dimension_numbers = #tpu.dot_dimension_numbers<[1], [0], [0], [1], [0, 0, 1, 1], [], []>} : vector<8x32xf32>, vector<32x128xf32>, vector<8x128xf32> -> vector<8x128xf32>
    %45 = arith.addf %43, %44 : vector<8x128xf32>
    %46 = vector.broadcast %12 : vector<1x128xf32> to vector<8x128xf32>
    %47 = arith.addf %45, %46 : vector<8x128xf32>
    %48 = vector.extract_strided_slice %47 {offsets = [0, 0], sizes = [8, 32], strides = [1, 1]} : vector<8x128xf32> to vector<8x32xf32>
    %49 = arith.negf %48 : vector<8x32xf32>
    %50 = math.exp %49 : vector<8x32xf32>
    %cst_32 = arith.constant 1.000000e+00 : f32
    %51 = vector.broadcast %cst_32 : f32 to vector<8x32xf32>
    %52 = arith.addf %51, %50 : vector<8x32xf32>
    %53 = arith.divf %51, %52 : vector<8x32xf32>
    %54 = vector.extract_strided_slice %47 {offsets = [0, 32], sizes = [8, 32], strides = [1, 1]} : vector<8x128xf32> to vector<8x32xf32>
    %55 = arith.negf %54 : vector<8x32xf32>
    %56 = math.exp %55 : vector<8x32xf32>
    %cst_33 = arith.constant 1.000000e+00 : f32
    %57 = vector.broadcast %cst_33 : f32 to vector<8x32xf32>
    %58 = arith.addf %57, %56 : vector<8x32xf32>
    %59 = arith.divf %57, %58 : vector<8x32xf32>
    %60 = vector.extract_strided_slice %47 {offsets = [0, 64], sizes = [8, 32], strides = [1, 1]} : vector<8x128xf32> to vector<8x32xf32>
    %61 = math.tanh %60 : vector<8x32xf32>
    %62 = vector.extract_strided_slice %47 {offsets = [0, 96], sizes = [8, 32], strides = [1, 1]} : vector<8x128xf32> to vector<8x32xf32>
    %63 = arith.negf %62 : vector<8x32xf32>
    %64 = math.exp %63 : vector<8x32xf32>
    %cst_34 = arith.constant 1.000000e+00 : f32
    %65 = vector.broadcast %cst_34 : f32 to vector<8x32xf32>
    %66 = arith.addf %65, %64 : vector<8x32xf32>
    %67 = arith.divf %65, %66 : vector<8x32xf32>
    %68 = arith.mulf %59, %14 : vector<8x32xf32>
    %69 = arith.mulf %53, %61 : vector<8x32xf32>
    %70 = arith.addf %68, %69 : vector<8x32xf32>
    %71 = math.tanh %70 : vector<8x32xf32>
    %72 = arith.mulf %67, %71 : vector<8x32xf32>
    %c0_35 = arith.constant 0 : index
    %c0_36 = arith.constant 0 : index
    %73 = vector.load %arg15[%c0_35, %c0_36] : memref<8x32xf32, #tpu.memory_space<vmem>>, vector<8x32xf32>
    tpu.vector_store %arg15[%c0_35, %c0_36], %72 {strides = array<i32>} : memref<8x32xf32, #tpu.memory_space<vmem>>, vector<8x32xf32>,
    %c0_37 = arith.constant 0 : index
    %c0_38 = arith.constant 0 : index
    %74 = vector.load %arg16[%c0_37, %c0_38] : memref<8x32xf32, #tpu.memory_space<vmem>>, vector<8x32xf32>
    tpu.vector_store %arg16[%c0_37, %c0_38], %70 {strides = array<i32>} : memref<8x32xf32, #tpu.memory_space<vmem>>, vector<8x32xf32>,
    %75 = arith.index_cast %c0_i32_19 : i32 to index
    %c0_39 = arith.constant 0 : index
    %c0_40 = arith.constant 0 : index
    %76 = vector.load %arg14[%75, %c0_39, %c0_40] : memref<8x8x32xf32, #tpu.memory_space<vmem>>, vector<1x8x32xf32>
    %77 = vector.shape_cast %76 : vector<1x8x32xf32> to vector<8x32xf32>
    %78 = vector.shape_cast %72 : vector<8x32xf32> to vector<1x8x32xf32>
    tpu.vector_store %arg14[%75, %c0_39, %c0_40], %78 {strides = array<i32>} : memref<8x8x32xf32, #tpu.memory_space<vmem>>, vector<1x8x32xf32>,
    %c1_i32 = arith.constant 1 : i32
    %c0_41 = arith.constant 0 : index
    %c0_42 = arith.constant 0 : index
    %79 = vector.load %arg15[%c0_41, %c0_42] : memref<8x32xf32, #tpu.memory_space<vmem>>, vector<8x32xf32>
    %c0_43 = arith.constant 0 : index
    %c0_44 = arith.constant 0 : index
    %80 = vector.load %arg16[%c0_43, %c0_44] : memref<8x32xf32, #tpu.memory_space<vmem>>, vector<8x32xf32>
    %cst_45 = arith.constant dense<0.000000e+00> : vector<8x8xf32>
    %81 = tpu.matmul %79, %4, %cst_45 {dimension_numbers = #tpu.dot_dimension_numbers<[1], [0], [0], [1], [0, 0, 1, 1], [], []>} : vector<8x32xf32>, vector<32x8xf32>, vector<8x8xf32> -> vector<8x8xf32>
    %cst_46 = arith.constant dense<0.000000e+00> : vector<8x8xf32>
    %82 = tpu.matmul %80, %5, %cst_46 {dimension_numbers = #tpu.dot_dimension_numbers<[1], [0], [0], [1], [0, 0, 1, 1], [], []>} : vector<8x32xf32>, vector<32x8xf32>, vector<8x8xf32> -> vector<8x8xf32>
    %83 = arith.addf %81, %82 : vector<8x8xf32>
    %84 = vector.broadcast %6 : vector<1x8xf32> to vector<8x8xf32>
    %85 = arith.addf %83, %84 : vector<8x8xf32>
    %86 = vector.shape_cast %85 : vector<8x8xf32> to vector<8x1x8xf32>
    %87 = vector.broadcast %86 : vector<8x1x8xf32> to vector<8x4x8xf32>
    %88 = arith.addf %87, %3 : vector<8x4x8xf32>
    %89 = math.tanh %88 : vector<8x4x8xf32>
    %90 = vector.broadcast %8 : vector<1x1x8xf32> to vector<8x4x8xf32>
    %91 = arith.mulf %89, %90 : vector<8x4x8xf32>
    %cst_47 = arith.constant dense<0.000000e+00> : vector<8x4xf32>
    %92 = vector.multi_reduction <add>, %91, %cst_47 [2] : vector<8x4x8xf32> to vector<8x4xf32>
    %93 = vector.broadcast %9 : vector<1x1xf32> to vector<8x4xf32>
    %94 = arith.addf %92, %93 : vector<8x4xf32>
    %cst_48 = arith.constant dense<0xFF800000> : vector<8xf32>
    %95 = vector.multi_reduction <maximumf>, %94, %cst_48 [1] : vector<8x4xf32> to vector<8xf32>
    %96 = vector.shape_cast %95 : vector<8xf32> to vector<8x1xf32>
    %97 = vector.broadcast %96 : vector<8x1xf32> to vector<8x4xf32>
    %98 = arith.subf %94, %97 : vector<8x4xf32>
    %99 = math.exp %98 : vector<8x4xf32>
    %cst_49 = arith.constant dense<0.000000e+00> : vector<8xf32>
    %100 = vector.multi_reduction <add>, %99, %cst_49 [1] : vector<8x4xf32> to vector<8xf32>
    %101 = vector.shape_cast %100 : vector<8xf32> to vector<8x1xf32>
    %102 = tpu.reciprocal %101 {approx = true} : vector<8x1xf32> -> vector<8x1xf32>
    %103 = vector.broadcast %102 : vector<8x1xf32> to vector<8x4xf32>
    %104 = arith.mulf %99, %103 : vector<8x4xf32>
    %105 = arith.index_cast %c1_i32 : i32 to index
    %c0_50 = arith.constant 0 : index
    %c0_51 = arith.constant 0 : index
    %106 = vector.load %arg2[%105, %c0_50, %c0_51] : memref<8x8x4xf32, #tpu.memory_space<vmem>>, vector<1x8x4xf32>
    %107 = vector.shape_cast %106 : vector<1x8x4xf32> to vector<8x4xf32>
    %108 = arith.mulf %104, %107 : vector<8x4xf32>
    %cst_52 = arith.constant dense<0.000000e+00> : vector<8x128xf32>
    %109 = tpu.matmul %108, %10, %cst_52 {dimension_numbers = #tpu.dot_dimension_numbers<[1], [0], [0], [1], [0, 0, 1, 1], [], []>} : vector<8x4xf32>, vector<4x128xf32>, vector<8x128xf32> -> vector<8x128xf32>
    %cst_53 = arith.constant dense<0.000000e+00> : vector<8x128xf32>
    %110 = tpu.matmul %79, %11, %cst_53 {dimension_numbers = #tpu.dot_dimension_numbers<[1], [0], [0], [1], [0, 0, 1, 1], [], []>} : vector<8x32xf32>, vector<32x128xf32>, vector<8x128xf32> -> vector<8x128xf32>
    %111 = arith.addf %109, %110 : vector<8x128xf32>
    %112 = vector.broadcast %12 : vector<1x128xf32> to vector<8x128xf32>
    %113 = arith.addf %111, %112 : vector<8x128xf32>
    %114 = vector.extract_strided_slice %113 {offsets = [0, 0], sizes = [8, 32], strides = [1, 1]} : vector<8x128xf32> to vector<8x32xf32>
    %115 = arith.negf %114 : vector<8x32xf32>
    %116 = math.exp %115 : vector<8x32xf32>
    %cst_54 = arith.constant 1.000000e+00 : f32
    %117 = vector.broadcast %cst_54 : f32 to vector<8x32xf32>
    %118 = arith.addf %117, %116 : vector<8x32xf32>
    %119 = arith.divf %117, %118 : vector<8x32xf32>
    %120 = vector.extract_strided_slice %113 {offsets = [0, 32], sizes = [8, 32], strides = [1, 1]} : vector<8x128xf32> to vector<8x32xf32>
    %121 = arith.negf %120 : vector<8x32xf32>
    %122 = math.exp %121 : vector<8x32xf32>
    %cst_55 = arith.constant 1.000000e+00 : f32
    %123 = vector.broadcast %cst_55 : f32 to vector<8x32xf32>
    %124 = arith.addf %123, %122 : vector<8x32xf32>
    %125 = arith.divf %123, %124 : vector<8x32xf32>
    %126 = vector.extract_strided_slice %113 {offsets = [0, 64], sizes = [8, 32], strides = [1, 1]} : vector<8x128xf32> to vector<8x32xf32>
    %127 = math.tanh %126 : vector<8x32xf32>
    %128 = vector.extract_strided_slice %113 {offsets = [0, 96], sizes = [8, 32], strides = [1, 1]} : vector<8x128xf32> to vector<8x32xf32>
    %129 = arith.negf %128 : vector<8x32xf32>
    %130 = math.exp %129 : vector<8x32xf32>
    %cst_56 = arith.constant 1.000000e+00 : f32
    %131 = vector.broadcast %cst_56 : f32 to vector<8x32xf32>
    %132 = arith.addf %131, %130 : vector<8x32xf32>
    %133 = arith.divf %131, %132 : vector<8x32xf32>
    %134 = arith.mulf %125, %80 : vector<8x32xf32>
    %135 = arith.mulf %119, %127 : vector<8x32xf32>
    %136 = arith.addf %134, %135 : vector<8x32xf32>
    %137 = math.tanh %136 : vector<8x32xf32>
    %138 = arith.mulf %133, %137 : vector<8x32xf32>
    %c0_57 = arith.constant 0 : index
    %c0_58 = arith.constant 0 : index
    %139 = vector.load %arg15[%c0_57, %c0_58] : memref<8x32xf32, #tpu.memory_space<vmem>>, vector<8x32xf32>
    tpu.vector_store %arg15[%c0_57, %c0_58], %138 {strides = array<i32>} : memref<8x32xf32, #tpu.memory_space<vmem>>, vector<8x32xf32>,
    %c0_59 = arith.constant 0 : index
    %c0_60 = arith.constant 0 : index
    %140 = vector.load %arg16[%c0_59, %c0_60] : memref<8x32xf32, #tpu.memory_space<vmem>>, vector<8x32xf32>
    tpu.vector_store %arg16[%c0_59, %c0_60], %136 {strides = array<i32>} : memref<8x32xf32, #tpu.memory_space<vmem>>, vector<8x32xf32>,
    %141 = arith.index_cast %c1_i32 : i32 to index
    %c0_61 = arith.constant 0 : index
    %c0_62 = arith.constant 0 : index
    %142 = vector.load %arg14[%141, %c0_61, %c0_62] : memref<8x8x32xf32, #tpu.memory_space<vmem>>, vector<1x8x32xf32>
    %143 = vector.shape_cast %142 : vector<1x8x32xf32> to vector<8x32xf32>
    %144 = vector.shape_cast %138 : vector<8x32xf32> to vector<1x8x32xf32>
    tpu.vector_store %arg14[%141, %c0_61, %c0_62], %144 {strides = array<i32>} : memref<8x8x32xf32, #tpu.memory_space<vmem>>, vector<1x8x32xf32>,
    %c2_i32 = arith.constant 2 : i32
    %c0_63 = arith.constant 0 : index
    %c0_64 = arith.constant 0 : index
    %145 = vector.load %arg15[%c0_63, %c0_64] : memref<8x32xf32, #tpu.memory_space<vmem>>, vector<8x32xf32>
    %c0_65 = arith.constant 0 : index
    %c0_66 = arith.constant 0 : index
    %146 = vector.load %arg16[%c0_65, %c0_66] : memref<8x32xf32, #tpu.memory_space<vmem>>, vector<8x32xf32>
    %cst_67 = arith.constant dense<0.000000e+00> : vector<8x8xf32>
    %147 = tpu.matmul %145, %4, %cst_67 {dimension_numbers = #tpu.dot_dimension_numbers<[1], [0], [0], [1], [0, 0, 1, 1], [], []>} : vector<8x32xf32>, vector<32x8xf32>, vector<8x8xf32> -> vector<8x8xf32>
    %cst_68 = arith.constant dense<0.000000e+00> : vector<8x8xf32>
    %148 = tpu.matmul %146, %5, %cst_68 {dimension_numbers = #tpu.dot_dimension_numbers<[1], [0], [0], [1], [0, 0, 1, 1], [], []>} : vector<8x32xf32>, vector<32x8xf32>, vector<8x8xf32> -> vector<8x8xf32>
    %149 = arith.addf %147, %148 : vector<8x8xf32>
    %150 = vector.broadcast %6 : vector<1x8xf32> to vector<8x8xf32>
    %151 = arith.addf %149, %150 : vector<8x8xf32>
    %152 = vector.shape_cast %151 : vector<8x8xf32> to vector<8x1x8xf32>
    %153 = vector.broadcast %152 : vector<8x1x8xf32> to vector<8x4x8xf32>
    %154 = arith.addf %153, %3 : vector<8x4x8xf32>
    %155 = math.tanh %154 : vector<8x4x8xf32>
    %156 = vector.broadcast %8 : vector<1x1x8xf32> to vector<8x4x8xf32>
    %157 = arith.mulf %155, %156 : vector<8x4x8xf32>
    %cst_69 = arith.constant dense<0.000000e+00> : vector<8x4xf32>
    %158 = vector.multi_reduction <add>, %157, %cst_69 [2] : vector<8x4x8xf32> to vector<8x4xf32>
    %159 = vector.broadcast %9 : vector<1x1xf32> to vector<8x4xf32>
    %160 = arith.addf %158, %159 : vector<8x4xf32>
    %cst_70 = arith.constant dense<0xFF800000> : vector<8xf32>
    %161 = vector.multi_reduction <maximumf>, %160, %cst_70 [1] : vector<8x4xf32> to vector<8xf32>
    %162 = vector.shape_cast %161 : vector<8xf32> to vector<8x1xf32>
    %163 = vector.broadcast %162 : vector<8x1xf32> to vector<8x4xf32>
    %164 = arith.subf %160, %163 : vector<8x4xf32>
    %165 = math.exp %164 : vector<8x4xf32>
    %cst_71 = arith.constant dense<0.000000e+00> : vector<8xf32>
    %166 = vector.multi_reduction <add>, %165, %cst_71 [1] : vector<8x4xf32> to vector<8xf32>
    %167 = vector.shape_cast %166 : vector<8xf32> to vector<8x1xf32>
    %168 = tpu.reciprocal %167 {approx = true} : vector<8x1xf32> -> vector<8x1xf32>
    %169 = vector.broadcast %168 : vector<8x1xf32> to vector<8x4xf32>
    %170 = arith.mulf %165, %169 : vector<8x4xf32>
    %171 = arith.index_cast %c2_i32 : i32 to index
    %c0_72 = arith.constant 0 : index
    %c0_73 = arith.constant 0 : index
    %172 = vector.load %arg2[%171, %c0_72, %c0_73] : memref<8x8x4xf32, #tpu.memory_space<vmem>>, vector<1x8x4xf32>
    %173 = vector.shape_cast %172 : vector<1x8x4xf32> to vector<8x4xf32>
    %174 = arith.mulf %170, %173 : vector<8x4xf32>
    %cst_74 = arith.constant dense<0.000000e+00> : vector<8x128xf32>
    %175 = tpu.matmul %174, %10, %cst_74 {dimension_numbers = #tpu.dot_dimension_numbers<[1], [0], [0], [1], [0, 0, 1, 1], [], []>} : vector<8x4xf32>, vector<4x128xf32>, vector<8x128xf32> -> vector<8x128xf32>
    %cst_75 = arith.constant dense<0.000000e+00> : vector<8x128xf32>
    %176 = tpu.matmul %145, %11, %cst_75 {dimension_numbers = #tpu.dot_dimension_numbers<[1], [0], [0], [1], [0, 0, 1, 1], [], []>} : vector<8x32xf32>, vector<32x128xf32>, vector<8x128xf32> -> vector<8x128xf32>
    %177 = arith.addf %175, %176 : vector<8x128xf32>
    %178 = vector.broadcast %12 : vector<1x128xf32> to vector<8x128xf32>
    %179 = arith.addf %177, %178 : vector<8x128xf32>
    %180 = vector.extract_strided_slice %179 {offsets = [0, 0], sizes = [8, 32], strides = [1, 1]} : vector<8x128xf32> to vector<8x32xf32>
    %181 = arith.negf %180 : vector<8x32xf32>
    %182 = math.exp %181 : vector<8x32xf32>
    %cst_76 = arith.constant 1.000000e+00 : f32
    %183 = vector.broadcast %cst_76 : f32 to vector<8x32xf32>
    %184 = arith.addf %183, %182 : vector<8x32xf32>
    %185 = arith.divf %183, %184 : vector<8x32xf32>
    %186 = vector.extract_strided_slice %179 {offsets = [0, 32], sizes = [8, 32], strides = [1, 1]} : vector<8x128xf32> to vector<8x32xf32>
    %187 = arith.negf %186 : vector<8x32xf32>
    %188 = math.exp %187 : vector<8x32xf32>
    %cst_77 = arith.constant 1.000000e+00 : f32
    %189 = vector.broadcast %cst_77 : f32 to vector<8x32xf32>
    %190 = arith.addf %189, %188 : vector<8x32xf32>
    %191 = arith.divf %189, %190 : vector<8x32xf32>
    %192 = vector.extract_strided_slice %179 {offsets = [0, 64], sizes = [8, 32], strides = [1, 1]} : vector<8x128xf32> to vector<8x32xf32>
    %193 = math.tanh %192 : vector<8x32xf32>
    %194 = vector.extract_strided_slice %179 {offsets = [0, 96], sizes = [8, 32], strides = [1, 1]} : vector<8x128xf32> to vector<8x32xf32>
    %195 = arith.negf %194 : vector<8x32xf32>
    %196 = math.exp %195 : vector<8x32xf32>
    %cst_78 = arith.constant 1.000000e+00 : f32
    %197 = vector.broadcast %cst_78 : f32 to vector<8x32xf32>
    %198 = arith.addf %197, %196 : vector<8x32xf32>
    %199 = arith.divf %197, %198 : vector<8x32xf32>
    %200 = arith.mulf %191, %146 : vector<8x32xf32>
    %201 = arith.mulf %185, %193 : vector<8x32xf32>
    %202 = arith.addf %200, %201 : vector<8x32xf32>
    %203 = math.tanh %202 : vector<8x32xf32>
    %204 = arith.mulf %199, %203 : vector<8x32xf32>
    %c0_79 = arith.constant 0 : index
    %c0_80 = arith.constant 0 : index
    %205 = vector.load %arg15[%c0_79, %c0_80] : memref<8x32xf32, #tpu.memory_space<vmem>>, vector<8x32xf32>
    tpu.vector_store %arg15[%c0_79, %c0_80], %204 {strides = array<i32>} : memref<8x32xf32, #tpu.memory_space<vmem>>, vector<8x32xf32>,
    %c0_81 = arith.constant 0 : index
    %c0_82 = arith.constant 0 : index
    %206 = vector.load %arg16[%c0_81, %c0_82] : memref<8x32xf32, #tpu.memory_space<vmem>>, vector<8x32xf32>
    tpu.vector_store %arg16[%c0_81, %c0_82], %202 {strides = array<i32>} : memref<8x32xf32, #tpu.memory_space<vmem>>, vector<8x32xf32>,
    %207 = arith.index_cast %c2_i32 : i32 to index
    %c0_83 = arith.constant 0 : index
    %c0_84 = arith.constant 0 : index
    %208 = vector.load %arg14[%207, %c0_83, %c0_84] : memref<8x8x32xf32, #tpu.memory_space<vmem>>, vector<1x8x32xf32>
    %209 = vector.shape_cast %208 : vector<1x8x32xf32> to vector<8x32xf32>
    %210 = vector.shape_cast %204 : vector<8x32xf32> to vector<1x8x32xf32>
    tpu.vector_store %arg14[%207, %c0_83, %c0_84], %210 {strides = array<i32>} : memref<8x8x32xf32, #tpu.memory_space<vmem>>, vector<1x8x32xf32>,
    %c3_i32 = arith.constant 3 : i32
    %c0_85 = arith.constant 0 : index
    %c0_86 = arith.constant 0 : index
    %211 = vector.load %arg15[%c0_85, %c0_86] : memref<8x32xf32, #tpu.memory_space<vmem>>, vector<8x32xf32>
    %c0_87 = arith.constant 0 : index
    %c0_88 = arith.constant 0 : index
    %212 = vector.load %arg16[%c0_87, %c0_88] : memref<8x32xf32, #tpu.memory_space<vmem>>, vector<8x32xf32>
    %cst_89 = arith.constant dense<0.000000e+00> : vector<8x8xf32>
    %213 = tpu.matmul %211, %4, %cst_89 {dimension_numbers = #tpu.dot_dimension_numbers<[1], [0], [0], [1], [0, 0, 1, 1], [], []>} : vector<8x32xf32>, vector<32x8xf32>, vector<8x8xf32> -> vector<8x8xf32>
    %cst_90 = arith.constant dense<0.000000e+00> : vector<8x8xf32>
    %214 = tpu.matmul %212, %5, %cst_90 {dimension_numbers = #tpu.dot_dimension_numbers<[1], [0], [0], [1], [0, 0, 1, 1], [], []>} : vector<8x32xf32>, vector<32x8xf32>, vector<8x8xf32> -> vector<8x8xf32>
    %215 = arith.addf %213, %214 : vector<8x8xf32>
    %216 = vector.broadcast %6 : vector<1x8xf32> to vector<8x8xf32>
    %217 = arith.addf %215, %216 : vector<8x8xf32>
    %218 = vector.shape_cast %217 : vector<8x8xf32> to vector<8x1x8xf32>
    %219 = vector.broadcast %218 : vector<8x1x8xf32> to vector<8x4x8xf32>
    %220 = arith.addf %219, %3 : vector<8x4x8xf32>
    %221 = math.tanh %220 : vector<8x4x8xf32>
    %222 = vector.broadcast %8 : vector<1x1x8xf32> to vector<8x4x8xf32>
    %223 = arith.mulf %221, %222 : vector<8x4x8xf32>
    %cst_91 = arith.constant dense<0.000000e+00> : vector<8x4xf32>
    %224 = vector.multi_reduction <add>, %223, %cst_91 [2] : vector<8x4x8xf32> to vector<8x4xf32>
    %225 = vector.broadcast %9 : vector<1x1xf32> to vector<8x4xf32>
    %226 = arith.addf %224, %225 : vector<8x4xf32>
    %cst_92 = arith.constant dense<0xFF800000> : vector<8xf32>
    %227 = vector.multi_reduction <maximumf>, %226, %cst_92 [1] : vector<8x4xf32> to vector<8xf32>
    %228 = vector.shape_cast %227 : vector<8xf32> to vector<8x1xf32>
    %229 = vector.broadcast %228 : vector<8x1xf32> to vector<8x4xf32>
    %230 = arith.subf %226, %229 : vector<8x4xf32>
    %231 = math.exp %230 : vector<8x4xf32>
    %cst_93 = arith.constant dense<0.000000e+00> : vector<8xf32>
    %232 = vector.multi_reduction <add>, %231, %cst_93 [1] : vector<8x4xf32> to vector<8xf32>
    %233 = vector.shape_cast %232 : vector<8xf32> to vector<8x1xf32>
    %234 = tpu.reciprocal %233 {approx = true} : vector<8x1xf32> -> vector<8x1xf32>
    %235 = vector.broadcast %234 : vector<8x1xf32> to vector<8x4xf32>
    %236 = arith.mulf %231, %235 : vector<8x4xf32>
    %237 = arith.index_cast %c3_i32 : i32 to index
    %c0_94 = arith.constant 0 : index
    %c0_95 = arith.constant 0 : index
    %238 = vector.load %arg2[%237, %c0_94, %c0_95] : memref<8x8x4xf32, #tpu.memory_space<vmem>>, vector<1x8x4xf32>
    %239 = vector.shape_cast %238 : vector<1x8x4xf32> to vector<8x4xf32>
    %240 = arith.mulf %236, %239 : vector<8x4xf32>
    %cst_96 = arith.constant dense<0.000000e+00> : vector<8x128xf32>
    %241 = tpu.matmul %240, %10, %cst_96 {dimension_numbers = #tpu.dot_dimension_numbers<[1], [0], [0], [1], [0, 0, 1, 1], [], []>} : vector<8x4xf32>, vector<4x128xf32>, vector<8x128xf32> -> vector<8x128xf32>
    %cst_97 = arith.constant dense<0.000000e+00> : vector<8x128xf32>
    %242 = tpu.matmul %211, %11, %cst_97 {dimension_numbers = #tpu.dot_dimension_numbers<[1], [0], [0], [1], [0, 0, 1, 1], [], []>} : vector<8x32xf32>, vector<32x128xf32>, vector<8x128xf32> -> vector<8x128xf32>
    %243 = arith.addf %241, %242 : vector<8x128xf32>
    %244 = vector.broadcast %12 : vector<1x128xf32> to vector<8x128xf32>
    %245 = arith.addf %243, %244 : vector<8x128xf32>
    %246 = vector.extract_strided_slice %245 {offsets = [0, 0], sizes = [8, 32], strides = [1, 1]} : vector<8x128xf32> to vector<8x32xf32>
    %247 = arith.negf %246 : vector<8x32xf32>
    %248 = math.exp %247 : vector<8x32xf32>
    %cst_98 = arith.constant 1.000000e+00 : f32
    %249 = vector.broadcast %cst_98 : f32 to vector<8x32xf32>
    %250 = arith.addf %249, %248 : vector<8x32xf32>
    %251 = arith.divf %249, %250 : vector<8x32xf32>
    %252 = vector.extract_strided_slice %245 {offsets = [0, 32], sizes = [8, 32], strides = [1, 1]} : vector<8x128xf32> to vector<8x32xf32>
    %253 = arith.negf %252 : vector<8x32xf32>
    %254 = math.exp %253 : vector<8x32xf32>
    %cst_99 = arith.constant 1.000000e+00 : f32
    %255 = vector.broadcast %cst_99 : f32 to vector<8x32xf32>
    %256 = arith.addf %255, %254 : vector<8x32xf32>
    %257 = arith.divf %255, %256 : vector<8x32xf32>
    %258 = vector.extract_strided_slice %245 {offsets = [0, 64], sizes = [8, 32], strides = [1, 1]} : vector<8x128xf32> to vector<8x32xf32>
    %259 = math.tanh %258 : vector<8x32xf32>
    %260 = vector.extract_strided_slice %245 {offsets = [0, 96], sizes = [8, 32], strides = [1, 1]} : vector<8x128xf32> to vector<8x32xf32>
    %261 = arith.negf %260 : vector<8x32xf32>
    %262 = math.exp %261 : vector<8x32xf32>
    %cst_100 = arith.constant 1.000000e+00 : f32
    %263 = vector.broadcast %cst_100 : f32 to vector<8x32xf32>
    %264 = arith.addf %263, %262 : vector<8x32xf32>
    %265 = arith.divf %263, %264 : vector<8x32xf32>
    %266 = arith.mulf %257, %212 : vector<8x32xf32>
    %267 = arith.mulf %251, %259 : vector<8x32xf32>
    %268 = arith.addf %266, %267 : vector<8x32xf32>
    %269 = math.tanh %268 : vector<8x32xf32>
    %270 = arith.mulf %265, %269 : vector<8x32xf32>
    %c0_101 = arith.constant 0 : index
    %c0_102 = arith.constant 0 : index
    %271 = vector.load %arg15[%c0_101, %c0_102] : memref<8x32xf32, #tpu.memory_space<vmem>>, vector<8x32xf32>
    tpu.vector_store %arg15[%c0_101, %c0_102], %270 {strides = array<i32>} : memref<8x32xf32, #tpu.memory_space<vmem>>, vector<8x32xf32>,
    %c0_103 = arith.constant 0 : index
    %c0_104 = arith.constant 0 : index
    %272 = vector.load %arg16[%c0_103, %c0_104] : memref<8x32xf32, #tpu.memory_space<vmem>>, vector<8x32xf32>
    tpu.vector_store %arg16[%c0_103, %c0_104], %268 {strides = array<i32>} : memref<8x32xf32, #tpu.memory_space<vmem>>, vector<8x32xf32>,
    %273 = arith.index_cast %c3_i32 : i32 to index
    %c0_105 = arith.constant 0 : index
    %c0_106 = arith.constant 0 : index
    %274 = vector.load %arg14[%273, %c0_105, %c0_106] : memref<8x8x32xf32, #tpu.memory_space<vmem>>, vector<1x8x32xf32>
    %275 = vector.shape_cast %274 : vector<1x8x32xf32> to vector<8x32xf32>
    %276 = vector.shape_cast %270 : vector<8x32xf32> to vector<1x8x32xf32>
    tpu.vector_store %arg14[%273, %c0_105, %c0_106], %276 {strides = array<i32>} : memref<8x8x32xf32, #tpu.memory_space<vmem>>, vector<1x8x32xf32>,
    %c4_i32 = arith.constant 4 : i32
    %c0_107 = arith.constant 0 : index
    %c0_108 = arith.constant 0 : index
    %277 = vector.load %arg15[%c0_107, %c0_108] : memref<8x32xf32, #tpu.memory_space<vmem>>, vector<8x32xf32>
    %c0_109 = arith.constant 0 : index
    %c0_110 = arith.constant 0 : index
    %278 = vector.load %arg16[%c0_109, %c0_110] : memref<8x32xf32, #tpu.memory_space<vmem>>, vector<8x32xf32>
    %cst_111 = arith.constant dense<0.000000e+00> : vector<8x8xf32>
    %279 = tpu.matmul %277, %4, %cst_111 {dimension_numbers = #tpu.dot_dimension_numbers<[1], [0], [0], [1], [0, 0, 1, 1], [], []>} : vector<8x32xf32>, vector<32x8xf32>, vector<8x8xf32> -> vector<8x8xf32>
    %cst_112 = arith.constant dense<0.000000e+00> : vector<8x8xf32>
    %280 = tpu.matmul %278, %5, %cst_112 {dimension_numbers = #tpu.dot_dimension_numbers<[1], [0], [0], [1], [0, 0, 1, 1], [], []>} : vector<8x32xf32>, vector<32x8xf32>, vector<8x8xf32> -> vector<8x8xf32>
    %281 = arith.addf %279, %280 : vector<8x8xf32>
    %282 = vector.broadcast %6 : vector<1x8xf32> to vector<8x8xf32>
    %283 = arith.addf %281, %282 : vector<8x8xf32>
    %284 = vector.shape_cast %283 : vector<8x8xf32> to vector<8x1x8xf32>
    %285 = vector.broadcast %284 : vector<8x1x8xf32> to vector<8x4x8xf32>
    %286 = arith.addf %285, %3 : vector<8x4x8xf32>
    %287 = math.tanh %286 : vector<8x4x8xf32>
    %288 = vector.broadcast %8 : vector<1x1x8xf32> to vector<8x4x8xf32>
    %289 = arith.mulf %287, %288 : vector<8x4x8xf32>
    %cst_113 = arith.constant dense<0.000000e+00> : vector<8x4xf32>
    %290 = vector.multi_reduction <add>, %289, %cst_113 [2] : vector<8x4x8xf32> to vector<8x4xf32>
    %291 = vector.broadcast %9 : vector<1x1xf32> to vector<8x4xf32>
    %292 = arith.addf %290, %291 : vector<8x4xf32>
    %cst_114 = arith.constant dense<0xFF800000> : vector<8xf32>
    %293 = vector.multi_reduction <maximumf>, %292, %cst_114 [1] : vector<8x4xf32> to vector<8xf32>
    %294 = vector.shape_cast %293 : vector<8xf32> to vector<8x1xf32>
    %295 = vector.broadcast %294 : vector<8x1xf32> to vector<8x4xf32>
    %296 = arith.subf %292, %295 : vector<8x4xf32>
    %297 = math.exp %296 : vector<8x4xf32>
    %cst_115 = arith.constant dense<0.000000e+00> : vector<8xf32>
    %298 = vector.multi_reduction <add>, %297, %cst_115 [1] : vector<8x4xf32> to vector<8xf32>
    %299 = vector.shape_cast %298 : vector<8xf32> to vector<8x1xf32>
    %300 = tpu.reciprocal %299 {approx = true} : vector<8x1xf32> -> vector<8x1xf32>
    %301 = vector.broadcast %300 : vector<8x1xf32> to vector<8x4xf32>
    %302 = arith.mulf %297, %301 : vector<8x4xf32>
    %303 = arith.index_cast %c4_i32 : i32 to index
    %c0_116 = arith.constant 0 : index
    %c0_117 = arith.constant 0 : index
    %304 = vector.load %arg2[%303, %c0_116, %c0_117] : memref<8x8x4xf32, #tpu.memory_space<vmem>>, vector<1x8x4xf32>
    %305 = vector.shape_cast %304 : vector<1x8x4xf32> to vector<8x4xf32>
    %306 = arith.mulf %302, %305 : vector<8x4xf32>
    %cst_118 = arith.constant dense<0.000000e+00> : vector<8x128xf32>
    %307 = tpu.matmul %306, %10, %cst_118 {dimension_numbers = #tpu.dot_dimension_numbers<[1], [0], [0], [1], [0, 0, 1, 1], [], []>} : vector<8x4xf32>, vector<4x128xf32>, vector<8x128xf32> -> vector<8x128xf32>
    %cst_119 = arith.constant dense<0.000000e+00> : vector<8x128xf32>
    %308 = tpu.matmul %277, %11, %cst_119 {dimension_numbers = #tpu.dot_dimension_numbers<[1], [0], [0], [1], [0, 0, 1, 1], [], []>} : vector<8x32xf32>, vector<32x128xf32>, vector<8x128xf32> -> vector<8x128xf32>
    %309 = arith.addf %307, %308 : vector<8x128xf32>
    %310 = vector.broadcast %12 : vector<1x128xf32> to vector<8x128xf32>
    %311 = arith.addf %309, %310 : vector<8x128xf32>
    %312 = vector.extract_strided_slice %311 {offsets = [0, 0], sizes = [8, 32], strides = [1, 1]} : vector<8x128xf32> to vector<8x32xf32>
    %313 = arith.negf %312 : vector<8x32xf32>
    %314 = math.exp %313 : vector<8x32xf32>
    %cst_120 = arith.constant 1.000000e+00 : f32
    %315 = vector.broadcast %cst_120 : f32 to vector<8x32xf32>
    %316 = arith.addf %315, %314 : vector<8x32xf32>
    %317 = arith.divf %315, %316 : vector<8x32xf32>
    %318 = vector.extract_strided_slice %311 {offsets = [0, 32], sizes = [8, 32], strides = [1, 1]} : vector<8x128xf32> to vector<8x32xf32>
    %319 = arith.negf %318 : vector<8x32xf32>
    %320 = math.exp %319 : vector<8x32xf32>
    %cst_121 = arith.constant 1.000000e+00 : f32
    %321 = vector.broadcast %cst_121 : f32 to vector<8x32xf32>
    %322 = arith.addf %321, %320 : vector<8x32xf32>
    %323 = arith.divf %321, %322 : vector<8x32xf32>
    %324 = vector.extract_strided_slice %311 {offsets = [0, 64], sizes = [8, 32], strides = [1, 1]} : vector<8x128xf32> to vector<8x32xf32>
    %325 = math.tanh %324 : vector<8x32xf32>
    %326 = vector.extract_strided_slice %311 {offsets = [0, 96], sizes = [8, 32], strides = [1, 1]} : vector<8x128xf32> to vector<8x32xf32>
    %327 = arith.negf %326 : vector<8x32xf32>
    %328 = math.exp %327 : vector<8x32xf32>
    %cst_122 = arith.constant 1.000000e+00 : f32
    %329 = vector.broadcast %cst_122 : f32 to vector<8x32xf32>
    %330 = arith.addf %329, %328 : vector<8x32xf32>
    %331 = arith.divf %329, %330 : vector<8x32xf32>
    %332 = arith.mulf %323, %278 : vector<8x32xf32>
    %333 = arith.mulf %317, %325 : vector<8x32xf32>
    %334 = arith.addf %332, %333 : vector<8x32xf32>
    %335 = math.tanh %334 : vector<8x32xf32>
    %336 = arith.mulf %331, %335 : vector<8x32xf32>
    %c0_123 = arith.constant 0 : index
    %c0_124 = arith.constant 0 : index
    %337 = vector.load %arg15[%c0_123, %c0_124] : memref<8x32xf32, #tpu.memory_space<vmem>>, vector<8x32xf32>
    tpu.vector_store %arg15[%c0_123, %c0_124], %336 {strides = array<i32>} : memref<8x32xf32, #tpu.memory_space<vmem>>, vector<8x32xf32>,
    %c0_125 = arith.constant 0 : index
    %c0_126 = arith.constant 0 : index
    %338 = vector.load %arg16[%c0_125, %c0_126] : memref<8x32xf32, #tpu.memory_space<vmem>>, vector<8x32xf32>
    tpu.vector_store %arg16[%c0_125, %c0_126], %334 {strides = array<i32>} : memref<8x32xf32, #tpu.memory_space<vmem>>, vector<8x32xf32>,
    %339 = arith.index_cast %c4_i32 : i32 to index
    %c0_127 = arith.constant 0 : index
    %c0_128 = arith.constant 0 : index
    %340 = vector.load %arg14[%339, %c0_127, %c0_128] : memref<8x8x32xf32, #tpu.memory_space<vmem>>, vector<1x8x32xf32>
    %341 = vector.shape_cast %340 : vector<1x8x32xf32> to vector<8x32xf32>
    %342 = vector.shape_cast %336 : vector<8x32xf32> to vector<1x8x32xf32>
    tpu.vector_store %arg14[%339, %c0_127, %c0_128], %342 {strides = array<i32>} : memref<8x8x32xf32, #tpu.memory_space<vmem>>, vector<1x8x32xf32>,
    %c5_i32 = arith.constant 5 : i32
    %c0_129 = arith.constant 0 : index
    %c0_130 = arith.constant 0 : index
    %343 = vector.load %arg15[%c0_129, %c0_130] : memref<8x32xf32, #tpu.memory_space<vmem>>, vector<8x32xf32>
    %c0_131 = arith.constant 0 : index
    %c0_132 = arith.constant 0 : index
    %344 = vector.load %arg16[%c0_131, %c0_132] : memref<8x32xf32, #tpu.memory_space<vmem>>, vector<8x32xf32>
    %cst_133 = arith.constant dense<0.000000e+00> : vector<8x8xf32>
    %345 = tpu.matmul %343, %4, %cst_133 {dimension_numbers = #tpu.dot_dimension_numbers<[1], [0], [0], [1], [0, 0, 1, 1], [], []>} : vector<8x32xf32>, vector<32x8xf32>, vector<8x8xf32> -> vector<8x8xf32>
    %cst_134 = arith.constant dense<0.000000e+00> : vector<8x8xf32>
    %346 = tpu.matmul %344, %5, %cst_134 {dimension_numbers = #tpu.dot_dimension_numbers<[1], [0], [0], [1], [0, 0, 1, 1], [], []>} : vector<8x32xf32>, vector<32x8xf32>, vector<8x8xf32> -> vector<8x8xf32>
    %347 = arith.addf %345, %346 : vector<8x8xf32>
    %348 = vector.broadcast %6 : vector<1x8xf32> to vector<8x8xf32>
    %349 = arith.addf %347, %348 : vector<8x8xf32>
    %350 = vector.shape_cast %349 : vector<8x8xf32> to vector<8x1x8xf32>
    %351 = vector.broadcast %350 : vector<8x1x8xf32> to vector<8x4x8xf32>
    %352 = arith.addf %351, %3 : vector<8x4x8xf32>
    %353 = math.tanh %352 : vector<8x4x8xf32>
    %354 = vector.broadcast %8 : vector<1x1x8xf32> to vector<8x4x8xf32>
    %355 = arith.mulf %353, %354 : vector<8x4x8xf32>
    %cst_135 = arith.constant dense<0.000000e+00> : vector<8x4xf32>
    %356 = vector.multi_reduction <add>, %355, %cst_135 [2] : vector<8x4x8xf32> to vector<8x4xf32>
    %357 = vector.broadcast %9 : vector<1x1xf32> to vector<8x4xf32>
    %358 = arith.addf %356, %357 : vector<8x4xf32>
    %cst_136 = arith.constant dense<0xFF800000> : vector<8xf32>
    %359 = vector.multi_reduction <maximumf>, %358, %cst_136 [1] : vector<8x4xf32> to vector<8xf32>
    %360 = vector.shape_cast %359 : vector<8xf32> to vector<8x1xf32>
    %361 = vector.broadcast %360 : vector<8x1xf32> to vector<8x4xf32>
    %362 = arith.subf %358, %361 : vector<8x4xf32>
    %363 = math.exp %362 : vector<8x4xf32>
    %cst_137 = arith.constant dense<0.000000e+00> : vector<8xf32>
    %364 = vector.multi_reduction <add>, %363, %cst_137 [1] : vector<8x4xf32> to vector<8xf32>
    %365 = vector.shape_cast %364 : vector<8xf32> to vector<8x1xf32>
    %366 = tpu.reciprocal %365 {approx = true} : vector<8x1xf32> -> vector<8x1xf32>
    %367 = vector.broadcast %366 : vector<8x1xf32> to vector<8x4xf32>
    %368 = arith.mulf %363, %367 : vector<8x4xf32>
    %369 = arith.index_cast %c5_i32 : i32 to index
    %c0_138 = arith.constant 0 : index
    %c0_139 = arith.constant 0 : index
    %370 = vector.load %arg2[%369, %c0_138, %c0_139] : memref<8x8x4xf32, #tpu.memory_space<vmem>>, vector<1x8x4xf32>
    %371 = vector.shape_cast %370 : vector<1x8x4xf32> to vector<8x4xf32>
    %372 = arith.mulf %368, %371 : vector<8x4xf32>
    %cst_140 = arith.constant dense<0.000000e+00> : vector<8x128xf32>
    %373 = tpu.matmul %372, %10, %cst_140 {dimension_numbers = #tpu.dot_dimension_numbers<[1], [0], [0], [1], [0, 0, 1, 1], [], []>} : vector<8x4xf32>, vector<4x128xf32>, vector<8x128xf32> -> vector<8x128xf32>
    %cst_141 = arith.constant dense<0.000000e+00> : vector<8x128xf32>
    %374 = tpu.matmul %343, %11, %cst_141 {dimension_numbers = #tpu.dot_dimension_numbers<[1], [0], [0], [1], [0, 0, 1, 1], [], []>} : vector<8x32xf32>, vector<32x128xf32>, vector<8x128xf32> -> vector<8x128xf32>
    %375 = arith.addf %373, %374 : vector<8x128xf32>
    %376 = vector.broadcast %12 : vector<1x128xf32> to vector<8x128xf32>
    %377 = arith.addf %375, %376 : vector<8x128xf32>
    %378 = vector.extract_strided_slice %377 {offsets = [0, 0], sizes = [8, 32], strides = [1, 1]} : vector<8x128xf32> to vector<8x32xf32>
    %379 = arith.negf %378 : vector<8x32xf32>
    %380 = math.exp %379 : vector<8x32xf32>
    %cst_142 = arith.constant 1.000000e+00 : f32
    %381 = vector.broadcast %cst_142 : f32 to vector<8x32xf32>
    %382 = arith.addf %381, %380 : vector<8x32xf32>
    %383 = arith.divf %381, %382 : vector<8x32xf32>
    %384 = vector.extract_strided_slice %377 {offsets = [0, 32], sizes = [8, 32], strides = [1, 1]} : vector<8x128xf32> to vector<8x32xf32>
    %385 = arith.negf %384 : vector<8x32xf32>
    %386 = math.exp %385 : vector<8x32xf32>
    %cst_143 = arith.constant 1.000000e+00 : f32
    %387 = vector.broadcast %cst_143 : f32 to vector<8x32xf32>
    %388 = arith.addf %387, %386 : vector<8x32xf32>
    %389 = arith.divf %387, %388 : vector<8x32xf32>
    %390 = vector.extract_strided_slice %377 {offsets = [0, 64], sizes = [8, 32], strides = [1, 1]} : vector<8x128xf32> to vector<8x32xf32>
    %391 = math.tanh %390 : vector<8x32xf32>
    %392 = vector.extract_strided_slice %377 {offsets = [0, 96], sizes = [8, 32], strides = [1, 1]} : vector<8x128xf32> to vector<8x32xf32>
    %393 = arith.negf %392 : vector<8x32xf32>
    %394 = math.exp %393 : vector<8x32xf32>
    %cst_144 = arith.constant 1.000000e+00 : f32
    %395 = vector.broadcast %cst_144 : f32 to vector<8x32xf32>
    %396 = arith.addf %395, %394 : vector<8x32xf32>
    %397 = arith.divf %395, %396 : vector<8x32xf32>
    %398 = arith.mulf %389, %344 : vector<8x32xf32>
    %399 = arith.mulf %383, %391 : vector<8x32xf32>
    %400 = arith.addf %398, %399 : vector<8x32xf32>
    %401 = math.tanh %400 : vector<8x32xf32>
    %402 = arith.mulf %397, %401 : vector<8x32xf32>
    %c0_145 = arith.constant 0 : index
    %c0_146 = arith.constant 0 : index
    %403 = vector.load %arg15[%c0_145, %c0_146] : memref<8x32xf32, #tpu.memory_space<vmem>>, vector<8x32xf32>
    tpu.vector_store %arg15[%c0_145, %c0_146], %402 {strides = array<i32>} : memref<8x32xf32, #tpu.memory_space<vmem>>, vector<8x32xf32>,
    %c0_147 = arith.constant 0 : index
    %c0_148 = arith.constant 0 : index
    %404 = vector.load %arg16[%c0_147, %c0_148] : memref<8x32xf32, #tpu.memory_space<vmem>>, vector<8x32xf32>
    tpu.vector_store %arg16[%c0_147, %c0_148], %400 {strides = array<i32>} : memref<8x32xf32, #tpu.memory_space<vmem>>, vector<8x32xf32>,
    %405 = arith.index_cast %c5_i32 : i32 to index
    %c0_149 = arith.constant 0 : index
    %c0_150 = arith.constant 0 : index
    %406 = vector.load %arg14[%405, %c0_149, %c0_150] : memref<8x8x32xf32, #tpu.memory_space<vmem>>, vector<1x8x32xf32>
    %407 = vector.shape_cast %406 : vector<1x8x32xf32> to vector<8x32xf32>
    %408 = vector.shape_cast %402 : vector<8x32xf32> to vector<1x8x32xf32>
    tpu.vector_store %arg14[%405, %c0_149, %c0_150], %408 {strides = array<i32>} : memref<8x8x32xf32, #tpu.memory_space<vmem>>, vector<1x8x32xf32>,
    %c6_i32 = arith.constant 6 : i32
    %c0_151 = arith.constant 0 : index
    %c0_152 = arith.constant 0 : index
    %409 = vector.load %arg15[%c0_151, %c0_152] : memref<8x32xf32, #tpu.memory_space<vmem>>, vector<8x32xf32>
    %c0_153 = arith.constant 0 : index
    %c0_154 = arith.constant 0 : index
    %410 = vector.load %arg16[%c0_153, %c0_154] : memref<8x32xf32, #tpu.memory_space<vmem>>, vector<8x32xf32>
    %cst_155 = arith.constant dense<0.000000e+00> : vector<8x8xf32>
    %411 = tpu.matmul %409, %4, %cst_155 {dimension_numbers = #tpu.dot_dimension_numbers<[1], [0], [0], [1], [0, 0, 1, 1], [], []>} : vector<8x32xf32>, vector<32x8xf32>, vector<8x8xf32> -> vector<8x8xf32>
    %cst_156 = arith.constant dense<0.000000e+00> : vector<8x8xf32>
    %412 = tpu.matmul %410, %5, %cst_156 {dimension_numbers = #tpu.dot_dimension_numbers<[1], [0], [0], [1], [0, 0, 1, 1], [], []>} : vector<8x32xf32>, vector<32x8xf32>, vector<8x8xf32> -> vector<8x8xf32>
    %413 = arith.addf %411, %412 : vector<8x8xf32>
    %414 = vector.broadcast %6 : vector<1x8xf32> to vector<8x8xf32>
    %415 = arith.addf %413, %414 : vector<8x8xf32>
    %416 = vector.shape_cast %415 : vector<8x8xf32> to vector<8x1x8xf32>
    %417 = vector.broadcast %416 : vector<8x1x8xf32> to vector<8x4x8xf32>
    %418 = arith.addf %417, %3 : vector<8x4x8xf32>
    %419 = math.tanh %418 : vector<8x4x8xf32>
    %420 = vector.broadcast %8 : vector<1x1x8xf32> to vector<8x4x8xf32>
    %421 = arith.mulf %419, %420 : vector<8x4x8xf32>
    %cst_157 = arith.constant dense<0.000000e+00> : vector<8x4xf32>
    %422 = vector.multi_reduction <add>, %421, %cst_157 [2] : vector<8x4x8xf32> to vector<8x4xf32>
    %423 = vector.broadcast %9 : vector<1x1xf32> to vector<8x4xf32>
    %424 = arith.addf %422, %423 : vector<8x4xf32>
    %cst_158 = arith.constant dense<0xFF800000> : vector<8xf32>
    %425 = vector.multi_reduction <maximumf>, %424, %cst_158 [1] : vector<8x4xf32> to vector<8xf32>
    %426 = vector.shape_cast %425 : vector<8xf32> to vector<8x1xf32>
    %427 = vector.broadcast %426 : vector<8x1xf32> to vector<8x4xf32>
    %428 = arith.subf %424, %427 : vector<8x4xf32>
    %429 = math.exp %428 : vector<8x4xf32>
    %cst_159 = arith.constant dense<0.000000e+00> : vector<8xf32>
    %430 = vector.multi_reduction <add>, %429, %cst_159 [1] : vector<8x4xf32> to vector<8xf32>
    %431 = vector.shape_cast %430 : vector<8xf32> to vector<8x1xf32>
    %432 = tpu.reciprocal %431 {approx = true} : vector<8x1xf32> -> vector<8x1xf32>
    %433 = vector.broadcast %432 : vector<8x1xf32> to vector<8x4xf32>
    %434 = arith.mulf %429, %433 : vector<8x4xf32>
    %435 = arith.index_cast %c6_i32 : i32 to index
    %c0_160 = arith.constant 0 : index
    %c0_161 = arith.constant 0 : index
    %436 = vector.load %arg2[%435, %c0_160, %c0_161] : memref<8x8x4xf32, #tpu.memory_space<vmem>>, vector<1x8x4xf32>
    %437 = vector.shape_cast %436 : vector<1x8x4xf32> to vector<8x4xf32>
    %438 = arith.mulf %434, %437 : vector<8x4xf32>
    %cst_162 = arith.constant dense<0.000000e+00> : vector<8x128xf32>
    %439 = tpu.matmul %438, %10, %cst_162 {dimension_numbers = #tpu.dot_dimension_numbers<[1], [0], [0], [1], [0, 0, 1, 1], [], []>} : vector<8x4xf32>, vector<4x128xf32>, vector<8x128xf32> -> vector<8x128xf32>
    %cst_163 = arith.constant dense<0.000000e+00> : vector<8x128xf32>
    %440 = tpu.matmul %409, %11, %cst_163 {dimension_numbers = #tpu.dot_dimension_numbers<[1], [0], [0], [1], [0, 0, 1, 1], [], []>} : vector<8x32xf32>, vector<32x128xf32>, vector<8x128xf32> -> vector<8x128xf32>
    %441 = arith.addf %439, %440 : vector<8x128xf32>
    %442 = vector.broadcast %12 : vector<1x128xf32> to vector<8x128xf32>
    %443 = arith.addf %441, %442 : vector<8x128xf32>
    %444 = vector.extract_strided_slice %443 {offsets = [0, 0], sizes = [8, 32], strides = [1, 1]} : vector<8x128xf32> to vector<8x32xf32>
    %445 = arith.negf %444 : vector<8x32xf32>
    %446 = math.exp %445 : vector<8x32xf32>
    %cst_164 = arith.constant 1.000000e+00 : f32
    %447 = vector.broadcast %cst_164 : f32 to vector<8x32xf32>
    %448 = arith.addf %447, %446 : vector<8x32xf32>
    %449 = arith.divf %447, %448 : vector<8x32xf32>
    %450 = vector.extract_strided_slice %443 {offsets = [0, 32], sizes = [8, 32], strides = [1, 1]} : vector<8x128xf32> to vector<8x32xf32>
    %451 = arith.negf %450 : vector<8x32xf32>
    %452 = math.exp %451 : vector<8x32xf32>
    %cst_165 = arith.constant 1.000000e+00 : f32
    %453 = vector.broadcast %cst_165 : f32 to vector<8x32xf32>
    %454 = arith.addf %453, %452 : vector<8x32xf32>
    %455 = arith.divf %453, %454 : vector<8x32xf32>
    %456 = vector.extract_strided_slice %443 {offsets = [0, 64], sizes = [8, 32], strides = [1, 1]} : vector<8x128xf32> to vector<8x32xf32>
    %457 = math.tanh %456 : vector<8x32xf32>
    %458 = vector.extract_strided_slice %443 {offsets = [0, 96], sizes = [8, 32], strides = [1, 1]} : vector<8x128xf32> to vector<8x32xf32>
    %459 = arith.negf %458 : vector<8x32xf32>
    %460 = math.exp %459 : vector<8x32xf32>
    %cst_166 = arith.constant 1.000000e+00 : f32
    %461 = vector.broadcast %cst_166 : f32 to vector<8x32xf32>
    %462 = arith.addf %461, %460 : vector<8x32xf32>
    %463 = arith.divf %461, %462 : vector<8x32xf32>
    %464 = arith.mulf %455, %410 : vector<8x32xf32>
    %465 = arith.mulf %449, %457 : vector<8x32xf32>
    %466 = arith.addf %464, %465 : vector<8x32xf32>
    %467 = math.tanh %466 : vector<8x32xf32>
    %468 = arith.mulf %463, %467 : vector<8x32xf32>
    %c0_167 = arith.constant 0 : index
    %c0_168 = arith.constant 0 : index
    %469 = vector.load %arg15[%c0_167, %c0_168] : memref<8x32xf32, #tpu.memory_space<vmem>>, vector<8x32xf32>
    tpu.vector_store %arg15[%c0_167, %c0_168], %468 {strides = array<i32>} : memref<8x32xf32, #tpu.memory_space<vmem>>, vector<8x32xf32>,
    %c0_169 = arith.constant 0 : index
    %c0_170 = arith.constant 0 : index
    %470 = vector.load %arg16[%c0_169, %c0_170] : memref<8x32xf32, #tpu.memory_space<vmem>>, vector<8x32xf32>
    tpu.vector_store %arg16[%c0_169, %c0_170], %466 {strides = array<i32>} : memref<8x32xf32, #tpu.memory_space<vmem>>, vector<8x32xf32>,
    %471 = arith.index_cast %c6_i32 : i32 to index
    %c0_171 = arith.constant 0 : index
    %c0_172 = arith.constant 0 : index
    %472 = vector.load %arg14[%471, %c0_171, %c0_172] : memref<8x8x32xf32, #tpu.memory_space<vmem>>, vector<1x8x32xf32>
    %473 = vector.shape_cast %472 : vector<1x8x32xf32> to vector<8x32xf32>
    %474 = vector.shape_cast %468 : vector<8x32xf32> to vector<1x8x32xf32>
    tpu.vector_store %arg14[%471, %c0_171, %c0_172], %474 {strides = array<i32>} : memref<8x8x32xf32, #tpu.memory_space<vmem>>, vector<1x8x32xf32>,
    %c7_i32 = arith.constant 7 : i32
    %c0_173 = arith.constant 0 : index
    %c0_174 = arith.constant 0 : index
    %475 = vector.load %arg15[%c0_173, %c0_174] : memref<8x32xf32, #tpu.memory_space<vmem>>, vector<8x32xf32>
    %c0_175 = arith.constant 0 : index
    %c0_176 = arith.constant 0 : index
    %476 = vector.load %arg16[%c0_175, %c0_176] : memref<8x32xf32, #tpu.memory_space<vmem>>, vector<8x32xf32>
    %cst_177 = arith.constant dense<0.000000e+00> : vector<8x8xf32>
    %477 = tpu.matmul %475, %4, %cst_177 {dimension_numbers = #tpu.dot_dimension_numbers<[1], [0], [0], [1], [0, 0, 1, 1], [], []>} : vector<8x32xf32>, vector<32x8xf32>, vector<8x8xf32> -> vector<8x8xf32>
    %cst_178 = arith.constant dense<0.000000e+00> : vector<8x8xf32>
    %478 = tpu.matmul %476, %5, %cst_178 {dimension_numbers = #tpu.dot_dimension_numbers<[1], [0], [0], [1], [0, 0, 1, 1], [], []>} : vector<8x32xf32>, vector<32x8xf32>, vector<8x8xf32> -> vector<8x8xf32>
    %479 = arith.addf %477, %478 : vector<8x8xf32>
    %480 = vector.broadcast %6 : vector<1x8xf32> to vector<8x8xf32>
    %481 = arith.addf %479, %480 : vector<8x8xf32>
    %482 = vector.shape_cast %481 : vector<8x8xf32> to vector<8x1x8xf32>
    %483 = vector.broadcast %482 : vector<8x1x8xf32> to vector<8x4x8xf32>
    %484 = arith.addf %483, %3 : vector<8x4x8xf32>
    %485 = math.tanh %484 : vector<8x4x8xf32>
    %486 = vector.broadcast %8 : vector<1x1x8xf32> to vector<8x4x8xf32>
    %487 = arith.mulf %485, %486 : vector<8x4x8xf32>
    %cst_179 = arith.constant dense<0.000000e+00> : vector<8x4xf32>
    %488 = vector.multi_reduction <add>, %487, %cst_179 [2] : vector<8x4x8xf32> to vector<8x4xf32>
    %489 = vector.broadcast %9 : vector<1x1xf32> to vector<8x4xf32>
    %490 = arith.addf %488, %489 : vector<8x4xf32>
    %cst_180 = arith.constant dense<0xFF800000> : vector<8xf32>
    %491 = vector.multi_reduction <maximumf>, %490, %cst_180 [1] : vector<8x4xf32> to vector<8xf32>
    %492 = vector.shape_cast %491 : vector<8xf32> to vector<8x1xf32>
    %493 = vector.broadcast %492 : vector<8x1xf32> to vector<8x4xf32>
    %494 = arith.subf %490, %493 : vector<8x4xf32>
    %495 = math.exp %494 : vector<8x4xf32>
    %cst_181 = arith.constant dense<0.000000e+00> : vector<8xf32>
    %496 = vector.multi_reduction <add>, %495, %cst_181 [1] : vector<8x4xf32> to vector<8xf32>
    %497 = vector.shape_cast %496 : vector<8xf32> to vector<8x1xf32>
    %498 = tpu.reciprocal %497 {approx = true} : vector<8x1xf32> -> vector<8x1xf32>
    %499 = vector.broadcast %498 : vector<8x1xf32> to vector<8x4xf32>
    %500 = arith.mulf %495, %499 : vector<8x4xf32>
    %501 = arith.index_cast %c7_i32 : i32 to index
    %c0_182 = arith.constant 0 : index
    %c0_183 = arith.constant 0 : index
    %502 = vector.load %arg2[%501, %c0_182, %c0_183] : memref<8x8x4xf32, #tpu.memory_space<vmem>>, vector<1x8x4xf32>
    %503 = vector.shape_cast %502 : vector<1x8x4xf32> to vector<8x4xf32>
    %504 = arith.mulf %500, %503 : vector<8x4xf32>
    %cst_184 = arith.constant dense<0.000000e+00> : vector<8x128xf32>
    %505 = tpu.matmul %504, %10, %cst_184 {dimension_numbers = #tpu.dot_dimension_numbers<[1], [0], [0], [1], [0, 0, 1, 1], [], []>} : vector<8x4xf32>, vector<4x128xf32>, vector<8x128xf32> -> vector<8x128xf32>
    %cst_185 = arith.constant dense<0.000000e+00> : vector<8x128xf32>
    %506 = tpu.matmul %475, %11, %cst_185 {dimension_numbers = #tpu.dot_dimension_numbers<[1], [0], [0], [1], [0, 0, 1, 1], [], []>} : vector<8x32xf32>, vector<32x128xf32>, vector<8x128xf32> -> vector<8x128xf32>
    %507 = arith.addf %505, %506 : vector<8x128xf32>
    %508 = vector.broadcast %12 : vector<1x128xf32> to vector<8x128xf32>
    %509 = arith.addf %507, %508 : vector<8x128xf32>
    %510 = vector.extract_strided_slice %509 {offsets = [0, 0], sizes = [8, 32], strides = [1, 1]} : vector<8x128xf32> to vector<8x32xf32>
    %511 = arith.negf %510 : vector<8x32xf32>
    %512 = math.exp %511 : vector<8x32xf32>
    %cst_186 = arith.constant 1.000000e+00 : f32
    %513 = vector.broadcast %cst_186 : f32 to vector<8x32xf32>
    %514 = arith.addf %513, %512 : vector<8x32xf32>
    %515 = arith.divf %513, %514 : vector<8x32xf32>
    %516 = vector.extract_strided_slice %509 {offsets = [0, 32], sizes = [8, 32], strides = [1, 1]} : vector<8x128xf32> to vector<8x32xf32>
    %517 = arith.negf %516 : vector<8x32xf32>
    %518 = math.exp %517 : vector<8x32xf32>
    %cst_187 = arith.constant 1.000000e+00 : f32
    %519 = vector.broadcast %cst_187 : f32 to vector<8x32xf32>
    %520 = arith.addf %519, %518 : vector<8x32xf32>
    %521 = arith.divf %519, %520 : vector<8x32xf32>
    %522 = vector.extract_strided_slice %509 {offsets = [0, 64], sizes = [8, 32], strides = [1, 1]} : vector<8x128xf32> to vector<8x32xf32>
    %523 = math.tanh %522 : vector<8x32xf32>
    %524 = vector.extract_strided_slice %509 {offsets = [0, 96], sizes = [8, 32], strides = [1, 1]} : vector<8x128xf32> to vector<8x32xf32>
    %525 = arith.negf %524 : vector<8x32xf32>
    %526 = math.exp %525 : vector<8x32xf32>
    %cst_188 = arith.constant 1.000000e+00 : f32
    %527 = vector.broadcast %cst_188 : f32 to vector<8x32xf32>
    %528 = arith.addf %527, %526 : vector<8x32xf32>
    %529 = arith.divf %527, %528 : vector<8x32xf32>
    %530 = arith.mulf %521, %476 : vector<8x32xf32>
    %531 = arith.mulf %515, %523 : vector<8x32xf32>
    %532 = arith.addf %530, %531 : vector<8x32xf32>
    %533 = math.tanh %532 : vector<8x32xf32>
    %534 = arith.mulf %529, %533 : vector<8x32xf32>
    %c0_189 = arith.constant 0 : index
    %c0_190 = arith.constant 0 : index
    %535 = vector.load %arg15[%c0_189, %c0_190] : memref<8x32xf32, #tpu.memory_space<vmem>>, vector<8x32xf32>
    tpu.vector_store %arg15[%c0_189, %c0_190], %534 {strides = array<i32>} : memref<8x32xf32, #tpu.memory_space<vmem>>, vector<8x32xf32>,
    %c0_191 = arith.constant 0 : index
    %c0_192 = arith.constant 0 : index
    %536 = vector.load %arg16[%c0_191, %c0_192] : memref<8x32xf32, #tpu.memory_space<vmem>>, vector<8x32xf32>
    tpu.vector_store %arg16[%c0_191, %c0_192], %532 {strides = array<i32>} : memref<8x32xf32, #tpu.memory_space<vmem>>, vector<8x32xf32>,
    %537 = arith.index_cast %c7_i32 : i32 to index
    %c0_193 = arith.constant 0 : index
    %c0_194 = arith.constant 0 : index
    %538 = vector.load %arg14[%537, %c0_193, %c0_194] : memref<8x8x32xf32, #tpu.memory_space<vmem>>, vector<1x8x32xf32>
    %539 = vector.shape_cast %538 : vector<1x8x32xf32> to vector<8x32xf32>
    %540 = vector.shape_cast %534 : vector<8x32xf32> to vector<1x8x32xf32>
    tpu.vector_store %arg14[%537, %c0_193, %c0_194], %540 {strides = array<i32>} : memref<8x8x32xf32, #tpu.memory_space<vmem>>, vector<1x8x32xf32>,
    %c8_i32 = arith.constant 8 : i32
    return
  }
  func.func @transform_0(%arg0: i32, %arg1: i32) -> (i32, i32, i32) {
    %c0_i32 = arith.constant 0 : i32
    %c0_i32_0 = arith.constant 0 : i32
    return %arg1, %arg0, %c0_i32 : i32, i32, i32
  }
  func.func @transform_1(%arg0: i32, %arg1: i32) -> (i32, i32, i32) {
    %c0_i32 = arith.constant 0 : i32
    %c0_i32_0 = arith.constant 0 : i32
    %c0_i32_1 = arith.constant 0 : i32
    return %arg0, %c0_i32, %c0_i32_0 : i32, i32, i32
  }
  func.func @transform_2(%arg0: i32, %arg1: i32) -> (i32, i32) {
    %c0_i32 = arith.constant 0 : i32
    %c0_i32_0 = arith.constant 0 : i32
    %c0_i32_1 = arith.constant 0 : i32
    return %c0_i32, %c0_i32_0 : i32, i32
  }
  func.func @transform_3(%arg0: i32, %arg1: i32) -> (i32, i32) {
    %c0_i32 = arith.constant 0 : i32
    %c0_i32_0 = arith.constant 0 : i32
    %c0_i32_1 = arith.constant 0 : i32
    return %c0_i32, %c0_i32_0 : i32, i32
  }
  func.func @transform_4(%arg0: i32, %arg1: i32) -> (i32, i32) {
    %c0_i32 = arith.constant 0 : i32
    %c0_i32_0 = arith.constant 0 : i32
    %c0_i32_1 = arith.constant 0 : i32
    return %c0_i32, %c0_i32_0 : i32, i32
  }
  func.func @transform_5(%arg0: i32, %arg1: i32) -> (i32, i32) {
    %c0_i32 = arith.constant 0 : i32
    %c0_i32_0 = arith.constant 0 : i32
    %c0_i32_1 = arith.constant 0 : i32
    return %c0_i32, %c0_i32_0 : i32, i32
  }
  func.func @transform_6(%arg0: i32, %arg1: i32) -> (i32, i32) {
    %c0_i32 = arith.constant 0 : i32
    %c0_i32_0 = arith.constant 0 : i32
    %c0_i32_1 = arith.constant 0 : i32
    return %c0_i32, %c0_i32_0 : i32, i32
  }
  func.func @transform_7(%arg0: i32, %arg1: i32) -> (i32, i32) {
    %c0_i32 = arith.constant 0 : i32
    %c0_i32_0 = arith.constant 0 : i32
    %c0_i32_1 = arith.constant 0 : i32
    return %c0_i32, %c0_i32_0 : i32, i32
  }
  func.func @transform_8(%arg0: i32, %arg1: i32) -> (i32, i32) {
    %c0_i32 = arith.constant 0 : i32
    %c0_i32_0 = arith.constant 0 : i32
    %c0_i32_1 = arith.constant 0 : i32
    return %c0_i32, %c0_i32_0 : i32, i32
  }
  func.func @transform_9(%arg0: i32, %arg1: i32) -> (i32, i32) {
    %c0_i32 = arith.constant 0 : i32
    %c0_i32_0 = arith.constant 0 : i32
    %c0_i32_1 = arith.constant 0 : i32
    return %c0_i32, %c0_i32_0 : i32, i32
  }
  func.func @transform_10(%arg0: i32, %arg1: i32) -> (i32, i32) {
    %c0_i32 = arith.constant 0 : i32
    %c0_i32_0 = arith.constant 0 : i32
    %c0_i32_1 = arith.constant 0 : i32
    return %c0_i32, %c0_i32_0 : i32, i32
  }
  func.func @transform_11(%arg0: i32, %arg1: i32) -> (i32, i32) {
    %c0_i32 = arith.constant 0 : i32
    %c0_i32_0 = arith.constant 0 : i32
    %c0_i32_1 = arith.constant 0 : i32
    return %c0_i32, %c0_i32_0 : i32, i32
  }
  func.func @transform_12(%arg0: i32, %arg1: i32) -> (i32, i32, i32) {
    %c0_i32 = arith.constant 0 : i32
    %c0_i32_0 = arith.constant 0 : i32
    return %arg1, %arg0, %c0_i32 : i32, i32, i32
  }
}

</mosaic_0001>

<bundles_post_ra>
// kernel: attention_encoder_forward.1
= control target key start
LH: loop header
LB: loop body
LE: loop exit
PB: predicated region body
PF: predicated region fallthrough
CT: control target
= control target key end

     0   :  { %vm66_vm0 = vcmask 64512   ;;  %v8739_v0 = vmov 0.0   ;;  %vm47_vm1 = vcmask 261120   ;;  %vm8740_vm2 = vmmov 0   ;;  %s8744_s13 = smov 32   ;;  %s8745_s14 = smov 64   ;;  %s10707_s5 = inlined_call_operand.vmem [shape: f32[8,8], index: 5, kind: input, shape index: {}]   ;;  %s10708_s1 = inlined_call_operand.vmem [shape: f32[8,4,8], index: 1, kind: input, shape index: {}]   ;;  %s10709_s3 = inlined_call_operand.vmem [shape: f32[32,8], index: 3, kind: input, shape index: {}]   ;;  %s10710_s2 = inlined_call_operand.vmem [shape: f32[32,8], index: 2, kind: input, shape index: {}]   ;;  %s10711_s8 = inlined_call_operand.<no memory space> [shape: f32[1,1], index: 8, kind: input, shape index: {}]   ;;  %s10712_s6 = inlined_call_operand.vmem [shape: f32[1,8], index: 6, kind: input, shape index: {}]   ;;  %s10713_s4 = inlined_call_operand.vmem [shape: f32[1,8], index: 4, kind: input, shape index: {}]   ;;  %s10714_s7 = inlined_call_operand.vmem [shape: f32[1,8], index: 7, kind: input, shape index: {}]   ;;  %s10715_s0 = inlined_call_operand.vmem [shape: f32[8,8,4], index: 0, kind: input, shape index: {}]   ;;  %s10716_s10 = inlined_call_operand.vmem [shape: f32[32,128], index: 10, kind: input, shape index: {}]   ;;  %s10717_s9 = inlined_call_operand.vmem [shape: f32[4,128], index: 9, kind: input, shape index: {}]   ;;  %s10718_s11 = inlined_call_operand.vmem [shape: f32[1,128], index: 11, kind: input, shape index: {}]   ;;  %s10719_s12 = inlined_call_operand.vmem [shape: f32[8,8,32], index: 12, kind: output, shape index: {}]  }
   0x1   :  { %7869 = vmatprep.subr.mxu0 %v8739_v0  ;;  %7874 = vmatprep.subr.mxu1 %v8739_v0  ;;  %v50_v1 = vld [vmem:[%s10707_s5] sm:$0xff]  ;;  %49 = vst.msk [vmem:[#allocation3] sm:$0xff] %vm47_vm1, %v8739_v0  ;;  %48 = vst.msk [vmem:[#allocation2] sm:$0xff] %vm47_vm1, %v8739_v0  ;;  %v53_v4 = vld [vmem:[%s10708_s1 + $0x8] sm:$0xf]  ;;  %v8741_v20 = vmov 0.0|0.0   ;;  %v17_v26 = vstv %s10711_s8  ;;  %v846_v54 = vlaneseq }
   0x2   :  { %v51_v2 = vld [vmem:[%s10708_s1] sm:$0xf]  ;;  %v52_v3 = vld [vmem:[%s10708_s1 + $0x4] sm:$0xf]  ;;  %7870 = vmatpush3.msra.mxu0 %v50_v1  ;;  %7871 = vmatprep.mubr.msk.f32.mxu0 %vm8740_vm2, %v8739_v0  ;;  %v54_v5 = vld [vmem:[%s10708_s1 + $0xc] sm:$0xf] }
   0x3   :  { %7875 = vmatpush3.msra.mxu1 %v50_v1  ;;  %7876 = vmatprep.mubr.msk.f32.mxu1 %vm8740_vm2, %v8739_v0  ;;  %v55_v6 = vld [vmem:[%s10708_s1 + $0x10] sm:$0xf]  ;;  %v56_v7 = vld [vmem:[%s10708_s1 + $0x14] sm:$0xf]  ;;  %v672_v8 = vld [vmem:[%s10709_s3] sm:$0xff]  ;;  %v8742_v25 = vmov 0  }
   0x4   :  { %7872 = vmatmul.mubr.msk.f32.vlgmr.msra.gmra.mrb[0].mxu0 %vm66_vm0, %v51_v2  ;;  %7877 = vmatmul.mubr.msk.f32.vlgmr.msra.gmra.mrb[0].mxu1 %vm66_vm0, %v52_v3  ;;  %v673_v9 = vld [vmem:[%s10709_s3 + $0x8] sm:$0xff]  ;;  %v668_v10 = vld [vmem:[%s10710_s2] sm:$0xff]  ;;  %v57_v12 = vld [vmem:[%s10708_s1 + $0x18] sm:$0xf]  ;;  %18 = vst [vmem:[#allocation5] sm:$0x1] %v17_v26 }
   0x5   :  { %7879 = vmatprep.subr.mxu0 %v8739_v0  ;;  %7884 = vmatprep.subr.mxu1 %v8739_v0  ;;  %v669_v11 = vld [vmem:[%s10710_s2 + $0x8] sm:$0xff]  ;;  %v58_v13 = vld [vmem:[%s10708_s1 + $0x1c] sm:$0xf]  ;;  %v8881_v14 = vpack.c.bf16 %v673_v9, %v672_v8  ;;  %v674_v16 = vld [vmem:[%s10709_s3 + $0x10] sm:$0xff]  ;;  %vm651_vm3 = vcmask 60416   ;;  %v8948_v56 = vshrl.u32 %v846_v54, 7 }
   0x6   :  { %7880 = vmatpush3.msra.mxu0 %v50_v1  ;;  %7885 = vmatpush3.msra.mxu1 %v50_v1  ;;  %v8883_v15 = vpack.c.bf16 %v669_v11, %v668_v10  ;;  %v675_v17 = vld [vmem:[%s10709_s3 + $0x18] sm:$0xff]  ;;  %v670_v18 = vld [vmem:[%s10710_s2 + $0x10] sm:$0xff]  ;;  %v7642_v27 = vld [vmem:[%s10712_s6] ss:$0 sm:$0xff]  ;;  %v8743_v52 = vmov 1966171168  }
   0x7   :  { %7881 = vmatprep.mubr.msk.f32.mxu0 %vm8740_vm2, %v8739_v0  ;;  %7886 = vmatprep.mubr.msk.f32.mxu1 %vm8740_vm2, %v8739_v0  ;;  %v671_v19 = vld [vmem:[%s10710_s2 + $0x18] sm:$0xff]  ;;  %v8907_v21 = vpack.c.bf16 %v675_v17, %v674_v16  ;;  %v844_v53 = vunpack.c.l.s4 %v8743_v52  ;;  %v8953_v58 = vld [vmem:[%s10713_s4] ss:$0 sm:$0xff]  ;;  %vm1045_vm4 = vcmask 1041409   ;;  %vm1047_vm5 = vcmask 1042434   ;;  %s8746_s15 = smov 96  }
   0x8   :  { %7882 = vmatmul.mubr.msk.f32.vlgmr.msra.gmra.mrb[2].mxu0 %vm66_vm0, %v53_v4  ;;  %7887 = vmatmul.mubr.msk.f32.vlgmr.msra.gmra.mrb[2].mxu1 %vm66_vm0, %v54_v5  ;;  %v8909_v22 = vpack.c.bf16 %v671_v19, %v670_v18  ;;  %v8919_v23 = vld [vmem:[#allocation3] sm:$0xff]  ;;  %v8921_v24 = vld [vmem:[#allocation2] sm:$0xff]  ;;  %v8961_v4 = vsub.s32 0, %v8948_v56  ;;  %vm1049_vm6 = vcmask 1043459   ;;  %vm1051_vm7 = vcmask 1044484  }
   0x9   :  { %7889 = vmatprep.subr.mxu0 %v8739_v0  ;;  %7894 = vmatprep.subr.mxu1 %v8739_v0  ;;  %v845_v55 = vunpack.c.0.s8 %v844_v53  ;;  %vm1053_vm8 = vcmask 1045509   ;;  %vm1055_vm9 = vcmask 1046534   ;;  %vm1057_vm10 = vcmask 1047559  }
   0xa   :  { %7890 = vmatpush3.msra.mxu0 %v50_v1  ;;  %7895 = vmatpush3.msra.mxu1 %v50_v1  ;;  %vm1060_vm11 = vcmask 31744   ;;  %vm1471_vm12 = vcmask 1043456  }
   0xb   :  { %7891 = vmatprep.mubr.msk.f32.mxu0 %vm8740_vm2, %v8739_v0  ;;  %7896 = vmatprep.mubr.msk.f32.mxu1 %vm8740_vm2, %v8739_v0  ;;  %v8956_v61 = vsub.s32 %v845_v55, %v8948_v56 }
   0xc   :  { %7892 = vmatmul.mubr.msk.f32.vlgmr.msra.gmra.mrb[4].mxu0 %vm66_vm0, %v55_v6  ;;  %7897 = vmatmul.mubr.msk.f32.vlgmr.msra.gmra.mrb[4].mxu1 %vm66_vm0, %v56_v7 }
   0xd   :  { %7899 = vmatprep.subr.mxu0 %v8739_v0  ;;  %7904 = vmatprep.subr.mxu1 %v8739_v0 }
   0xe   :  { %7900 = vmatpush3.msra.mxu0 %v50_v1  ;;  %7905 = vmatpush3.msra.mxu1 %v50_v1 }
   0xf   :  { %7901 = vmatprep.mubr.msk.f32.mxu0 %vm8740_vm2, %v8739_v0  ;;  %7906 = vmatprep.mubr.msk.f32.mxu1 %vm8740_vm2, %v8739_v0 }
  0x10   :  { %8213 = vmatprep.subr.bf16.mxu0 %v8741_v20  ;;  %8219 = vmatprep.subr.bf16.mxu1 %v8741_v20 }
  0x11   :  { %7902 = vmatmul.mubr.msk.f32.vlgmr.msra.gmra.mrb[6].mxu0 %vm66_vm0, %v57_v12  ;;  %7907 = vmatmul.mubr.msk.f32.vlgmr.msra.gmra.mrb[6].mxu1 %vm66_vm0, %v58_v13 }
  0x12   :  { %8215 = vmatpush3.bf16.msra.mxu0 %v8881_v14  ;;  %8221 = vmatpush3.bf16.msra.mxu1 %v8883_v15 }
  0x13   :  { %8216 = vmatprep.subr.bf16.mxu0 %v8741_v20  ;;  %8222 = vmatprep.subr.bf16.mxu1 %v8741_v20 }
  0x14   :  { %7917 = vmatprep.mubr.msk.f32.mxu0 %vm8740_vm2, %v8739_v0  ;;  %7928 = vmatprep.mubr.msk.f32.mxu1 %vm8740_vm2, %v8739_v0 }
  0x15   :  { %8365 = vset.pattern.permute.xlu0 %v8742_v25  ;;  %8366 = vset.pattern.permute.xlu1 %v8742_v25 }
  0x16   :  { %8218 = vmatpush3.bf16.msra.mxu0 %v8907_v21  ;;  %8224 = vmatpush3.bf16.msra.mxu1 %v8909_v22 }
  0x17   :  { %8225 = vmatprep.subr.bf16.mxu0 %v8741_v20  ;;  %7942 = vmatprep.subr.mxu1 %v8739_v0 }
  0x19   :  { %7918 = vmatmul.mubr.msk.f32.vlgmr.msra.gmra.mrb[8].mxu0 %vm47_vm1, %v8919_v23  ;;  %7929 = vmatmul.mubr.msk.f32.vlgmr.msra.gmra.mrb[8].mxu1 %vm47_vm1, %v8921_v24 }
  0x1a   :  { %7939 = vmatprep.mubr.msk.f32.mxu0 %vm8740_vm2, %v8739_v0  ;;  %7944 = vmatprep.mubr.msk.f32.mxu1 %vm8740_vm2, %v8739_v0 }
  0xd7   :  { %v136_v28 = vpop.f32.mrb[0].mxu0  ;;  %v209_v29 = vpop.f32.mrb[0].mxu1 }
  0xd8   :  { %v137_v30 = vadd.f32 %v7642_v27, %v136_v28  ;;  %v210_v31 = vadd.f32 %v7642_v27, %v209_v29  ;;  %v7873_v32 = vpop.f32.mrb[1].mxu0  ;;  %v7878_v33 = vpop.f32.mrb[1].mxu1 }
  0xda   :  { %652 = vst.msk [vmem:[#allocation4] sm:$0xf] %vm651_vm3, %v137_v30  ;;  %653 = vst.msk [vmem:[#allocation4 + $0x4] sm:$0xf] %vm651_vm3, %v210_v31 }
  0xdb   :  { %v282_v34 = vpop.f32.mrb[2].mxu0  ;;  %v355_v35 = vpop.f32.mrb[2].mxu1 }
  0xdc   :  { %v283_v36 = vadd.f32 %v7642_v27, %v282_v34  ;;  %v356_v37 = vadd.f32 %v7642_v27, %v355_v35  ;;  %v7883_v38 = vpop.f32.mrb[3].mxu0  ;;  %v7888_v39 = vpop.f32.mrb[3].mxu1 }
  0xde   :  { %654 = vst.msk [vmem:[#allocation4 + $0x8] sm:$0xf] %vm651_vm3, %v283_v36  ;;  %655 = vst.msk [vmem:[#allocation4 + $0xc] sm:$0xf] %vm651_vm3, %v356_v37 }
  0xdf   :  { %v428_v40 = vpop.f32.mrb[4].mxu0  ;;  %v501_v41 = vpop.f32.mrb[4].mxu1 }
  0xe0   :  { %v429_v42 = vadd.f32 %v7642_v27, %v428_v40  ;;  %v502_v43 = vadd.f32 %v7642_v27, %v501_v41  ;;  %v7893_v44 = vpop.f32.mrb[5].mxu0  ;;  %v7898_v45 = vpop.f32.mrb[5].mxu1 }
  0xe1   :  { %v8968_v13 = vld [vmem:[#allocation4] sm:$0xf]  ;;  %v8975_v28 = vld [vmem:[#allocation4 + $0x4] sm:$0xf] }
  0xe2   :  { %656 = vst.msk [vmem:[#allocation4 + $0x10] sm:$0xf] %vm651_vm3, %v429_v42  ;;  %657 = vst.msk [vmem:[#allocation4 + $0x14] sm:$0xf] %vm651_vm3, %v502_v43 }
  0xe4   :  { %v574_v46 = vpop.f32.mrb[6].mxu0  ;;  %v647_v47 = vpop.f32.mrb[6].mxu1 }
  0xe5   :  { %v575_v48 = vadd.f32 %v7642_v27, %v574_v46  ;;  %v648_v49 = vadd.f32 %v7642_v27, %v647_v47  ;;  %v7903_v50 = vpop.f32.mrb[7].mxu0  ;;  %v7908_v51 = vpop.f32.mrb[7].mxu1  ;;  %v8977_v29 = vld [vmem:[#allocation4 + $0x8] sm:$0xf]  ;;  %v8987_v38 = vld [vmem:[#allocation4 + $0xc] sm:$0xf] }
  0xe6   :  { %v9002_v46 = vld [vmem:[%s10714_s7] ss:$0 sm:$0xff] }
  0xe7   :  { %658 = vst.msk [vmem:[#allocation4 + $0x18] sm:$0xf] %vm651_vm3, %v575_v48  ;;  %659 = vst.msk [vmem:[#allocation4 + $0x1c] sm:$0xf] %vm651_vm3, %v648_v49 }
  0xe9   :  { %v8979_v30 = vld [vmem:[#allocation4 + $0x10] sm:$0xf]  ;;  %v8990_v40 = vld [vmem:[#allocation4 + $0x14] sm:$0xf] }
  0xec   :  { %v757_v57 = vpop.f32.mrb[8].mxu0  ;;  %v830_v59 = vpop.f32.mrb[8].mxu1 }
  0xed   :  { %v831_v60 = vadd.f32 %v830_v59, %v757_v57  ;;  %v7919_v62 = vpop.f32.mrb[9].mxu0  ;;  %v7930_v63 = vpop.f32.mrb[9].mxu1 }
  0xee   :  { %v8993_v42 = vld [vmem:[#allocation4 + $0x18] sm:$0xf]  ;;  %v8997_v45 = vld [vmem:[#allocation4 + $0x1c] sm:$0xf] }
  0xef   :  { %v840_v1 = vadd.f32 %v8953_v58, %v831_v60 }
  0xf1   :  { %v842_v2 = vcombine.high %v840_v1, %v840_v1  ;;  %v849_v3 = vrot.slane %v840_v1, %v8956_v61 }
  0xf3   :  { %v856_v5 = vrot.slane %v842_v2, %v8956_v61  ;;  %v857_v6 = vcombine.high %v849_v3, %v849_v3  ;;  %v865_v7 = vrot.slane %v849_v3, %v8956_v61 }
  0xf5   :  { %v858_v8 = vcombine.high %v856_v5, %v856_v5  ;;  %v872_v9 = vrot.slane %v856_v5, %v8956_v61  ;;  %v879_v10 = vrot.slane %v857_v6, %v8956_v61  ;;  %v887_v11 = vcombine.high %v865_v7, %v865_v7 }
  0xf6   :  { %v894_v12 = vrot.slane %v865_v7, %v8961_v4 }
  0xf7   :  { %v886_v16 = vrot.slane %v858_v8, %v8956_v61  ;;  %v888_v17 = vcombine.high %v872_v9, %v872_v9  ;;  %v889_v18 = vcombine.high %v879_v10, %v879_v10  ;;  %v898_v19 = vrot.slane %v879_v10, %v8961_v4 }
  0xf8   :  { %v902_v25 = vrot.slane %v887_v11, %v8961_v4  ;;  %v910_v26 = vrot.slane %v872_v9, %v8961_v4  ;;  %v931_v27 = vadd.f32 %v894_v12, %v8968_v13 }
  0xf9   :  { %v890_v31 = vcombine.high %v886_v16, %v886_v16  ;;  %v906_v32 = vrot.slane %v889_v18, %v8961_v4  ;;  %v914_v33 = vrot.slane %v886_v16, %v8961_v4  ;;  %v918_v34 = vrot.slane %v888_v17, %v8961_v4  ;;  %v7655_v17 = vld [vmem:[#allocation5] ss:$0 sm:$0xff] }
  0xfa   :  { %v932_v35 = vadd.f32 %v898_v19, %v8975_v28  ;;  %v933_v36 = vadd.f32 %v902_v25, %v8977_v29  ;;  %v935_v37 = vadd.f32 %v910_v26, %v8979_v30  ;;  %8367 = vtanh.f32 %v931_v27 }
  0xfb   :  { %v934_v39 = vadd.f32 %v906_v32, %v8987_v38  ;;  %v936_v41 = vadd.f32 %v914_v33, %v8990_v40  ;;  %v922_v43 = vrot.slane %v890_v31, %v8961_v4  ;;  %v937_v44 = vadd.f32 %v918_v34, %v8993_v42 }
  0xfc   :  { %8369 = vtanh.f32 %v932_v35  ;;  %v1012_v31 = vand.u32 127, %v846_v54 }
  0xfd   :  { %8371 = vtanh.f32 %v935_v37  ;;  %v938_v47 = vadd.f32 %v922_v43, %v8997_v45 }
  0xfe   :  { %8373 = vtanh.f32 %v933_v36  ;;  %v9023_v34 = vsub.s32 %v1012_v31, %v8948_v56  ;;  %v9074_v31 = vsub.s32 4, %v8948_v56 }
  0xff   :  { %8375 = vtanh.f32 %v934_v39 }
 0x100   :  { %8377 = vtanh.f32 %v936_v41 }
 0x101   :  { %8379 = vtanh.f32 %v937_v44 }
 0x102   :  { %8381 = vtanh.f32 %v938_v47 }
 0x104   :  { %v8368_v48 = vpop.eup %8367 }
 0x105   :  { %v953_v49 = vmul.f32 %v8368_v48, %v9002_v46 }
 0x106   :  { %v8370_v50 = vpop.eup %8369 }
 0x107   :  { %v8372_v51 = vpop.eup %8371  ;;  %v962_v52 = vsel %vm651_vm3, %v953_v49, 0.0  ;;  %v954_v53 = vmul.f32 %v8370_v50, %v9002_v46 }
 0x108   :  { %v8374_v55 = vpop.eup %8373  ;;  %963 = vadd.xlane.f32.xlu0 %v962_v52  ;;  %v957_v2 = vmul.f32 %v8372_v51, %v9002_v46 }
 0x109   :  { %v8376_v57 = vpop.eup %8375  ;;  %v955_v59 = vmul.f32 %v8374_v55, %v9002_v46  ;;  %v965_v63 = vsel %vm651_vm3, %v954_v53, 0.0 }
 0x10a   :  { %v8378_v60 = vpop.eup %8377  ;;  %v956_v1 = vmul.f32 %v8376_v57, %v9002_v46  ;;  %v974_v6 = vsel %vm651_vm3, %v957_v2, 0.0 }
 0x10b   :  { %v968_v62 = vsel %vm651_vm3, %v955_v59, 0.0  ;;  %v8380_v3 = vpop.eup %8379  ;;  %v958_v7 = vmul.f32 %v8378_v60, %v9002_v46 }
 0x10c   :  { %969 = vadd.xlane.f32.xlu1 %v968_v62  ;;  %966 = vadd.xlane.f32.xlu0 %v965_v63  ;;  %v971_v5 = vsel %vm651_vm3, %v956_v1, 0.0  ;;  %v959_v8 = vmul.f32 %v8380_v3, %v9002_v46  ;;  %v8382_v9 = vpop.eup %8381 }
 0x10d   :  { %v977_v10 = vsel %vm651_vm3, %v958_v7, 0.0  ;;  %v960_v12 = vmul.f32 %v8382_v9, %v9002_v46  ;;  %v9058_v7 = vsub.s32 1, %v8948_v56  ;;  %v9064_v9 = vsub.s32 2, %v8948_v56 }
 0x10e   :  { %v980_v11 = vsel %vm651_vm3, %v959_v8, 0.0  ;;  %v9061_v8 = vsub.s32 7, %v8948_v56 }
 0x10f   :  { %v983_v16 = vsel %vm651_vm3, %v960_v12, 0.0 }
 0x110   :  { %972 = vadd.xlane.f32.xlu1 %v971_v5  ;;  %975 = vadd.xlane.f32.xlu0 %v974_v6 }
 0x114   :  { %978 = vadd.xlane.f32.xlu1 %v977_v10  ;;  %981 = vadd.xlane.f32.xlu0 %v980_v11 }
 0x118   :  { %984 = vadd.xlane.f32.xlu1 %v983_v16 }
 0x12a   :  { %992 = vperm.xlu0 %8365, %v7655_v17   ;;  %v9070_v17 = vsub.s32 3, %v8948_v56 }
 0x195   :  { %v964_v18 = vpop.xlane.xlu0 %963 }
 0x199   :  { %v967_v19 = vpop.xlane.xlu0 %966  ;;  %v970_v25 = vpop.xlane.xlu1 %969 }
 0x19d   :  { %v976_v26 = vpop.xlane.xlu0 %975  ;;  %v973_v27 = vpop.xlane.xlu1 %972 }
 0x1a1   :  { %v982_v32 = vpop.xlane.xlu0 %981  ;;  %v979_v33 = vpop.xlane.xlu1 %978 }
 0x1a5   :  { %v985_v49 = vpop.xlane.xlu1 %984 }
 0x1a9   :  { %v9025_v35 = vpop.permute.xlu0 %992 }
 0x1aa   :  { %v995_v36 = vadd.f32 %v9025_v35, %v964_v18  ;;  %v996_v37 = vadd.f32 %v9025_v35, %v967_v19  ;;  %v997_v39 = vadd.f32 %v9025_v35, %v970_v25  ;;  %v998_v41 = vadd.f32 %v9025_v35, %v973_v27 }
 0x1ab   :  { %v999_v43 = vadd.f32 %v9025_v35, %v976_v26  ;;  %v9033_v54 = vadd.f32 %v9025_v35, %v979_v33  ;;  %v9039_v50 = vadd.f32 %v9025_v35, %v982_v32  ;;  %v1002_v51 = vadd.f32 %v9025_v35, %v985_v49 }
 0x1ac   :  { %v1016_v44 = vrot.slane %v995_v36, %v9023_v34  ;;  %v1020_v47 = vrot.slane %v996_v37, %v9023_v34  ;;  %v1024_v48 = vrot.slane %v997_v39, %v9023_v34  ;;  %v1028_v52 = vrot.slane %v998_v41, %v9023_v34 }
 0x1ad   :  { %v1032_v55 = vrot.slane %v999_v43, %v9023_v34  ;;  %v1036_v59 = vrot.slane %v9033_v54, %v9023_v34  ;;  %v1040_v62 = vrot.slane %v9039_v50, %v9023_v34  ;;  %v1044_v1 = vrot.slane %v1002_v51, %v9023_v34 }
 0x1ae   :  { %v1046_v53 = vsel %vm1045_vm4, %v1020_v47, %v1016_v44 }
 0x1af   :  { %v1048_v57 = vsel %vm1047_vm5, %v1024_v48, %v1046_v53  ;;  %v9078_v48 = vsub.s32 5, %v8948_v56 }
 0x1b0   :  { %v1050_v60 = vsel %vm1049_vm6, %v1028_v52, %v1048_v57 }
 0x1b1   :  { %v1052_v63 = vsel %vm1051_vm7, %v1032_v55, %v1050_v60 }
 0x1b2   :  { %v1054_v2 = vsel %vm1053_vm8, %v1036_v59, %v1052_v63 }
 0x1b3   :  { %v1056_v3 = vsel %vm1055_vm9, %v1040_v62, %v1054_v2 }
 0x1b4   :  { %v1058_v5 = vsel %vm1057_vm10, %v1044_v1, %v1056_v3 }
 0x1b5   :  { %v1061_v6 = vsel %vm1060_vm11, %v1058_v5, -inf  ;;  %v1254_v5 = vld [vmem:[%s10715_s0] sm:$0xff] }
 0x1b6   :  { %1062 = vmax.xlane.f32.xlu1 %v1061_v6  ;;  %v1259_v6 = vrot.slane %v1254_v5, %v8961_v4 }
 0x243   :  { %v1063_v10 = vpop.xlane.xlu1 %1062 }
 0x244   :  { %v1068_v11 = vrot.slane %v1063_v10, %v8961_v4  ;;  %v1072_v12 = vrot.slane %v1063_v10, %v9058_v7  ;;  %v1096_v16 = vrot.slane %v1063_v10, %v9061_v8  ;;  %v1076_v18 = vrot.slane %v1063_v10, %v9064_v9 }
 0x245   :  { %v1080_v33 = vrot.slane %v1063_v10, %v9070_v17  ;;  %v1084_v49 = vrot.slane %v1063_v10, %v9074_v31  ;;  %v1088_v52 = vrot.slane %v1063_v10, %v9078_v48 }
 0x246   :  { %v1105_v19 = vsub.f32 %v995_v36, %v1068_v11  ;;  %v1106_v25 = vsub.f32 %v996_v37, %v1072_v12  ;;  %v1112_v26 = vsub.f32 %v1002_v51, %v1096_v16  ;;  %v1107_v47 = vsub.f32 %v997_v39, %v1076_v18 }
 0x247   :  { %v1108_v37 = vsub.f32 %v998_v41, %v1080_v33  ;;  %v9082_v51 = vsub.s32 6, %v8948_v56  ;;  %v1109_v55 = vsub.f32 %v999_v43, %v1084_v49  ;;  %v1110_v56 = vsub.f32 %v9033_v54, %v1088_v52 }
 0x248   :  { %v1113_v27 = vmul.f32 1.442695, %v1105_v19  ;;  %v1127_v32 = vmul.f32 1.442695, %v1112_v26  ;;  %v1115_v44 = vmul.f32 1.442695, %v1106_v25  ;;  %v1273_v11 = vrot.slane %v1254_v5, %v9064_v9 }
 0x249   :  { %v1117_v36 = vmul.f32 1.442695, %v1107_v47  ;;  %v1119_v53 = vmul.f32 1.442695, %v1108_v37  ;;  %v1092_v59 = vrot.slane %v1063_v10, %v9082_v51  ;;  %v1121_v41 = vmul.f32 1.442695, %v1109_v55 }
 0x24a   :  { %8383 = vpow2.f32 %v1113_v27  ;;  %v1123_v43 = vmul.f32 1.442695, %v1110_v56  ;;  %v1266_v10 = vrot.slane %v1254_v5, %v9058_v7  ;;  %v1280_v12 = vrot.slane %v1254_v5, %v9070_v17 }
 0x24b   :  { %8385 = vpow2.f32 %v1127_v32  ;;  %v1111_v62 = vsub.f32 %v9039_v50, %v1092_v59  ;;  %v1287_v16 = vrot.slane %v1254_v5, %v9074_v31  ;;  %v1294_v18 = vrot.slane %v1254_v5, %v9078_v48 }
 0x24c   :  { %8387 = vpow2.f32 %v1115_v44  ;;  %v1301_v19 = vrot.slane %v1254_v5, %v9082_v51  ;;  %v1308_v25 = vrot.slane %v1254_v5, %v9061_v8 }
 0x24d   :  { %8389 = vpow2.f32 %v1117_v36  ;;  %v1125_v1 = vmul.f32 1.442695, %v1111_v62 }
 0x24e   :  { %8391 = vpow2.f32 %v1119_v53 }
 0x24f   :  { %8393 = vpow2.f32 %v1121_v41 }
 0x250   :  { %8395 = vpow2.f32 %v1123_v43 }
 0x251   :  { %8397 = vpow2.f32 %v1125_v1 }
 0x254   :  { %v9085_v57 = vpop.eup %8383 }
 0x255   :  { %v9087_v39 = vpop.eup %8385  ;;  %1138 = vperm.xlu1 %8366, %v9085_v57  }
 0x256   :  { %1159 = vperm.xlu0 %8365, %v9087_v39   ;;  %v9093_v60 = vpop.eup %8387 }
 0x257   :  { %v9097_v63 = vpop.eup %8389 }
 0x258   :  { %v9100_v2 = vpop.eup %8391 }
 0x259   :  { %1141 = vperm.xlu1 %8366, %v9093_v60   ;;  %v9103_v54 = vpop.eup %8393 }
 0x25a   :  { %v9106_v3 = vpop.eup %8395  ;;  %1261 = vbcast.lane.b32.xlu0 %v1259_v6, 256 }
 0x25b   :  { %v8398_v50 = vpop.eup %8397 }
 0x25d   :  { %1144 = vperm.xlu1 %8366, %v9097_v63  }
 0x25e   :  { %1268 = vbcast.lane.b32.xlu0 %v1266_v10, 256 }
 0x261   :  { %1147 = vperm.xlu1 %8366, %v9100_v2  }
 0x262   :  { %1275 = vbcast.lane.b32.xlu0 %v1273_v11, 256 }
 0x265   :  { %1150 = vperm.xlu1 %8366, %v9103_v54  }
 0x266   :  { %1282 = vbcast.lane.b32.xlu0 %v1280_v12, 256 }
 0x269   :  { %1153 = vperm.xlu1 %8366, %v9106_v3  }
 0x26a   :  { %1289 = vbcast.lane.b32.xlu0 %v1287_v16, 256 }
 0x26d   :  { %1156 = vperm.xlu1 %8366, %v8398_v50  }
 0x26e   :  { %1296 = vbcast.lane.b32.xlu0 %v1294_v18, 256 }
 0x272   :  { %1303 = vbcast.lane.b32.xlu0 %v1301_v19, 256 }
 0x276   :  { %1310 = vbcast.lane.b32.xlu0 %v1308_v25, 256 }
 0x2d4   :  { %v1139_v26 = vpop.permute.xlu1 %1138 }
 0x2d5   :  { %v1164_v36 = vrot.slane %v1139_v26, %v9023_v34  ;;  %v1160_v41 = vpop.permute.xlu0 %1159 }
 0x2d6   :  { %v1192_v6 = vrot.slane %v1160_v41, %v9023_v34 }
 0x2d8   :  { %v1142_v27 = vpop.permute.xlu1 %1141 }
 0x2d9   :  { %v1168_v47 = vrot.slane %v1142_v27, %v9023_v34  ;;  %v1262_v18 = vpop.permute.xlu0 %1261 }
 0x2db   :  { %v1193_v55 = vsel %vm1045_vm4, %v1168_v47, %v1164_v36 }
 0x2dc   :  { %v1145_v32 = vpop.permute.xlu1 %1144 }
 0x2dd   :  { %v1172_v49 = vrot.slane %v1145_v32, %v9023_v34  ;;  %v1269_v19 = vpop.permute.xlu0 %1268 }
 0x2df   :  { %v1194_v56 = vsel %vm1047_vm5, %v1172_v49, %v1193_v55 }
 0x2e0   :  { %v1148_v33 = vpop.permute.xlu1 %1147 }
 0x2e1   :  { %v1176_v37 = vrot.slane %v1148_v33, %v9023_v34  ;;  %v1276_v25 = vpop.permute.xlu0 %1275 }
 0x2e3   :  { %v1195_v43 = vsel %vm1049_vm6, %v1176_v37, %v1194_v56 }
 0x2e4   :  { %v1151_v44 = vpop.permute.xlu1 %1150 }
 0x2e5   :  { %v1180_v53 = vrot.slane %v1151_v44, %v9023_v34  ;;  %v1283_v27 = vpop.permute.xlu0 %1282 }
 0x2e7   :  { %v1196_v1 = vsel %vm1051_vm7, %v1180_v53, %v1195_v43 }
 0x2e8   :  { %v1154_v52 = vpop.permute.xlu1 %1153 }
 0x2e9   :  { %v1184_v59 = vrot.slane %v1154_v52, %v9023_v34  ;;  %v1290_v32 = vpop.permute.xlu0 %1289 }
 0x2eb   :  { %v1197_v10 = vsel %vm1053_vm8, %v1184_v59, %v1196_v1 }
 0x2ec   :  { %v1157_v62 = vpop.permute.xlu1 %1156 }
 0x2ed   :  { %v1188_v5 = vrot.slane %v1157_v62, %v9023_v34  ;;  %v1297_v37 = vpop.permute.xlu0 %1296 }
 0x2ef   :  { %v1198_v11 = vsel %vm1055_vm9, %v1188_v5, %v1197_v10 }
 0x2f0   :  { %v1199_v12 = vsel %vm1057_vm10, %v1192_v6, %v1198_v11 }
 0x2f1   :  { %v1201_v16 = vsel %vm1060_vm11, %v1199_v12, 0.0  ;;  %v1304_v62 = vpop.permute.xlu0 %1303 }
 0x2f2   :  { %1202 = vadd.xlane.f32.xlu1 %v1201_v16 }
 0x37f   :  { %v1203_v26 = vpop.xlane.xlu1 %1202 }
 0x380   :  { %8399 = vrcp.f32 %v1203_v26 }
 0x38a   :  { %v8400_v33 = vpop.eup %8399 }
 0x38b   :  { %v1233_v44 = vrot.slane %v8400_v33, %v9082_v51  ;;  %v1209_v47 = vrot.slane %v8400_v33, %v8961_v4  ;;  %v1213_v49 = vrot.slane %v8400_v33, %v9058_v7  ;;  %v1217_v36 = vrot.slane %v8400_v33, %v9064_v9 }
 0x38c   :  { %v1221_v55 = vrot.slane %v8400_v33, %v9070_v17  ;;  %v1225_v1 = vrot.slane %v8400_v33, %v9074_v31  ;;  %v1237_v12 = vrot.slane %v8400_v33, %v9061_v8 }
 0x38d   :  { %v1246_v52 = vmul.f32 %v9085_v57, %v1209_v47  ;;  %v1247_v53 = vmul.f32 %v9093_v60, %v1213_v49  ;;  %v1252_v59 = vmul.f32 %v8398_v50, %v1233_v44  ;;  %v1248_v43 = vmul.f32 %v9097_v63, %v1217_v36 }
 0x38e   :  { %v1249_v10 = vmul.f32 %v9100_v2, %v1221_v55  ;;  %v1250_v57 = vmul.f32 %v9103_v54, %v1225_v1  ;;  %v1229_v60 = vrot.slane %v8400_v33, %v9078_v48  ;;  %v680_v54 = vld [vmem:[%s10716_s10] sm:$0xff] }
 0x38f   :  { %v1320_v41 = vmul.f32 %v1262_v18, %v1246_v52  ;;  %v1321_v56 = vmul.f32 %v1269_v19, %v1247_v53  ;;  %v1326_v5 = vmul.f32 %v1304_v62, %v1252_v59  ;;  %v1322_v6 = vmul.f32 %v1276_v25, %v1248_v43  ;;  %v1311_v19 = vpop.permute.xlu0 %1310  ;;  %v681_v25 = vld [vmem:[%s10716_s10 + $0x8] sm:$0xff] }
 0x390   :  { %v1323_v50 = vmul.f32 %v1283_v27, %v1249_v10  ;;  %v1324_v11 = vmul.f32 %v1290_v32, %v1250_v57  ;;  %v1251_v63 = vmul.f32 %v9106_v3, %v1229_v60  ;;  %v1253_v18 = vmul.f32 %v9087_v39, %v1237_v12  ;;  %v682_v3 = vld [vmem:[%s10716_s10 + $0x10] sm:$0xff]  ;;  %v683_v39 = vld [vmem:[%s10716_s10 + $0x18] sm:$0xff]  ;;  %v9171_v32 = vld [vmem:[%s10717_s9] sm:$0xf] }
 0x391   :  { %1407 = vperm.xlu0 %8365, %v1320_v41   ;;  %1410 = vperm.xlu1 %8366, %v1321_v56   ;;  %v9157_v26 = vpack.c.bf16 %v681_v25, %v680_v54  ;;  %v9166_v27 = vpack.c.bf16 %v683_v39, %v682_v3  ;;  %v9214_v12 = vld [vmem:[%s10718_s11] ss:$0 sm:$0xff] }
 0x392   :  { %v1325_v16 = vmul.f32 %v1297_v37, %v1251_v63  ;;  %v1327_v2 = vmul.f32 %v1311_v19, %v1253_v18  ;;  %7943 = vmatpush3.msk.msra.mxu1 %vm1471_vm12, %v9171_v32 }
 0x393   :  { %8227 = vmatpush3.bf16.msra.mxu0 %v9157_v26  ;;  %8231 = vmatprep.subr.bf16.mxu1 %v8741_v20 }
 0x394   :  { %8228 = vmatprep.subr.bf16.mxu0 %v8741_v20 }
 0x395   :  { %1413 = vperm.xlu0 %8365, %v1322_v6   ;;  %1425 = vperm.xlu1 %8366, %v1326_v5  }
 0x397   :  { %8230 = vmatpush3.bf16.msra.mxu0 %v9166_v27 }
 0x398   :  { %8237 = vmatprep.subr.bf16.mxu0 %v8741_v20 }
 0x399   :  { %1416 = vperm.xlu0 %8365, %v1323_v50  }
 0x39a   :  { %7940 = vmatmul.mubr.msk.f32.vlgmr.msra.gmra.mrb[10].mxu0 %vm47_vm1, %v8921_v24 }
 0x39b   :  { %8239 = vmatpush3.bf16.msra.mxu0 %v8883_v15  ;;  %7966 = vmatprep.mubr.msk.f32.mxu0 %vm8740_vm2, %v8739_v0 }
 0x39c   :  { %8240 = vmatprep.subr.bf16.mxu0 %v8741_v20 }
 0x39d   :  { %1419 = vperm.xlu0 %8365, %v1324_v11  }
 0x39f   :  { %8242 = vmatpush3.bf16.msra.mxu0 %v8909_v22 }
 0x3a0   :  { %7980 = vmatprep.subr.mxu0 %v8739_v0 }
 0x3a1   :  { %1422 = vperm.xlu0 %8365, %v1325_v16  }
 0x3a5   :  { %1428 = vperm.xlu0 %8365, %v1327_v2  }
 0x3a9   :  { %1559 = vrot.lane.b32.xlu0 %v8919_v23, %s8744_s13 }
 0x410   :  { %v1408_v33 = vpop.permute.xlu0 %1407  ;;  %v1411_v44 = vpop.permute.xlu1 %1410 }
 0x411   :  { %v1437_v49 = vrot.slane %v1411_v44, %v9023_v34  ;;  %v1433_v36 = vrot.slane %v1408_v33, %v9023_v34 }
 0x413   :  { %v1462_v55 = vsel %vm1045_vm4, %v1437_v49, %v1433_v36 }
 0x414   :  { %v1414_v23 = vpop.permute.xlu0 %1413  ;;  %v1426_v56 = vpop.permute.xlu1 %1425 }
 0x415   :  { %v1441_v24 = vrot.slane %v1414_v23, %v9023_v34  ;;  %v1457_v6 = vrot.slane %v1426_v56, %v9023_v34 }
 0x417   :  { %v1463_v59 = vsel %vm1047_vm5, %v1441_v24, %v1462_v55 }
 0x418   :  { %v1417_v47 = vpop.permute.xlu0 %1416 }
 0x419   :  { %v1445_v52 = vrot.slane %v1417_v47, %v9023_v34 }
 0x41b   :  { %v1464_v43 = vsel %vm1049_vm6, %v1445_v52, %v1463_v59 }
 0x41c   :  { %v1420_v37 = vpop.permute.xlu0 %1419 }
 0x41d   :  { %v1449_v53 = vrot.slane %v1420_v37, %v9023_v34 }
 0x41f   :  { %v1465_v1 = vsel %vm1051_vm7, %v1449_v53, %v1464_v43 }
 0x420   :  { %v1423_v41 = vpop.permute.xlu0 %1422 }
 0x421   :  { %v1453_v62 = vrot.slane %v1423_v41, %v9023_v34 }
 0x423   :  { %v1466_v5 = vsel %vm1053_vm8, %v1453_v62, %v1465_v1 }
 0x424   :  { %v1429_v10 = vpop.permute.xlu0 %1428  ;;  %v1467_v60 = vsel %vm1055_vm9, %v1457_v6, %v1466_v5 }
 0x425   :  { %v1461_v57 = vrot.slane %v1429_v10, %v9023_v34 }
 0x427   :  { %v1468_v50 = vsel %vm1057_vm10, %v1461_v57, %v1467_v60 }
 0x428   :  { %7945 = vmatmul.mubr.msk.f32.vlgmr.msra.gmra.mrb[10].mxu1 %vm1060_vm11, %v1468_v50  ;;  %v1560_v47 = vpop.permute.xlu0 %1559 }
 0x429   :  { %8233 = vmatpush3.bf16.msra.mxu1 %v8881_v14  ;;  %7955 = vmatprep.mubr.msk.f32.mxu1 %vm8740_vm2, %v8739_v0 }
 0x42a   :  { %8234 = vmatprep.subr.bf16.mxu1 %v8741_v20 }
 0x42d   :  { %8236 = vmatpush3.bf16.msra.mxu1 %v8907_v21 }
 0x42e   :  { %8243 = vmatprep.subr.bf16.mxu1 %v8741_v20 }
 0x46d   :  { %v1394_v11 = vpop.f32.mrb[10].mxu0 }
 0x46e   :  { %v7941_v63 = vpop.f32.mrb[11].mxu0 }
 0x4fb   :  { %v1541_v16 = vpop.f32.mrb[10].mxu1 }
 0x4fc   :  { %v1542_v18 = vadd.f32 %v1541_v16, %v1394_v11  ;;  %v7946_v19 = vpop.f32.mrb[11].mxu1 }
 0x4fe   :  { %v1551_v2 = vadd.f32 %v9214_v12, %v1542_v18 }
 0x500   :  { %8401 = vtanh.f32 %v1551_v2  ;;  %v7660_v25 = vmul.f32 -1.442695, %v1551_v2 }
 0x502   :  { %8403 = vpow2.f32 %v7660_v25 }
 0x50a   :  { %v8402_v54 = vpop.eup %8401 }
 0x50b   :  { %1564 = vrot.lane.b32.xlu1 %v8402_v54, %s8745_s14 }
 0x50c   :  { %v8404_v3 = vpop.eup %8403 }
 0x50d   :  { %v1555_v39 = vadd.f32 1.0, %v8404_v3 }
 0x50f   :  { %8405 = vrcp.f32 %v1555_v39 }
 0x519   :  { %v8406_v33 = vpop.eup %8405 }
 0x51a   :  { %v1562_v49 = vmul.f32 %v8406_v33, %v1560_v47 }
 0x57d   :  { %v1565_v23 = vpop.permute.xlu1 %1564 }
 0x57e   :  { %v1567_v44 = vmul.f32 %v8406_v33, %v1565_v23 }
 0x580   :  { %1569 = vrot.lane.b32.xlu1 %v1567_v44, %s8744_s13 }
 0x5f2   :  { %v1570_v36 = vpop.permute.xlu1 %1569 }
 0x5f3   :  { %v1572_v24 = vadd.f32 %v1570_v36, %v1562_v49 }
 0x5f5   :  { %8407 = vtanh.f32 %v1572_v24 }
 0x5ff   :  { %v8408_v37 = vpop.eup %8407 }
 0x600   :  { %1575 = vrot.lane.b32.xlu0 %v8408_v37, %s8745_s14 }
 0x604   :  { %1585 = vrot.lane.b32.xlu0 %v1572_v24, %s8746_s15 }
 0x672   :  { %v1576_v52 = vpop.permute.xlu0 %1575 }
 0x673   :  { %v1578_v53 = vmul.f32 %v8406_v33, %v1576_v52 }
 0x675   :  { %1580 = vrot.lane.b32.xlu1 %v1578_v53, %s8744_s13 }
 0x676   :  { %v1586_v55 = vpop.permute.xlu0 %1585 }
 0x677   :  { %1588 = vst.msk [vmem:[#allocation3] sm:$0xff] %vm47_vm1, %v1586_v55 }
 0x67e   :  { %v9223_v59 = vld [vmem:[#allocation3] sm:$0xff] }
 0x67f   :  { %7956 = vmatmul.mubr.msk.f32.vlgmr.msra.gmra.mrb[12].mxu1 %vm47_vm1, %v9223_v59 }
 0x680   :  { %8245 = vmatpush3.bf16.msra.mxu1 %v9157_v26  ;;  %7977 = vmatprep.mubr.msk.f32.mxu1 %vm8740_vm2, %v8739_v0 }
 0x681   :  { %8246 = vmatprep.subr.bf16.mxu1 %v8741_v20 }
 0x684   :  { %8248 = vmatpush3.bf16.msra.mxu1 %v9166_v27 }
 0x685   :  { %8255 = vmatprep.subr.bf16.mxu1 %v8741_v20 }
 0x6e7   :  { %v1581_v41 = vpop.permute.xlu1 %1580 }
 0x6e8   :  { %1583 = vst.msk [vmem:[#allocation2] sm:$0xff] %vm47_vm1, %v1581_v41  ;;  %1589 = vst.msk [vmem:[%s10719_s12] sm:$0xff] %vm47_vm1, %v1581_v41 }
 0x6ef   :  { %v1590_v56 = vld [vmem:[#allocation2] sm:$0xff] }
 0x6f0   :  { %7967 = vmatmul.mubr.msk.f32.vlgmr.msra.gmra.mrb[12].mxu0 %vm47_vm1, %v1590_v56  ;;  %7978 = vmatmul.mubr.msk.f32.vlgmr.msra.gmra.mrb[14].mxu1 %vm47_vm1, %v1590_v56 }
 0x6f1   :  { %7981 = vmatpush3.msk.msra.mxu0 %vm1471_vm12, %v9171_v32  ;;  %7982 = vmatprep.mubr.msk.f32.mxu0 %vm8740_vm2, %v8739_v0 }
 0x6f2   :  { %8249 = vmatprep.subr.bf16.mxu0 %v8741_v20  ;;  %8257 = vmatpush3.bf16.msra.mxu1 %v8883_v15 }
 0x6f3   :  { %8258 = vmatprep.subr.bf16.mxu1 %v8741_v20  ;;  %8004 = vmatprep.mubr.msk.f32.mxu1 %vm8740_vm2, %v8739_v0 }
 0x6f6   :  { %8260 = vmatpush3.bf16.msra.mxu1 %v8909_v22 }
 0x6f7   :  { %8018 = vmatprep.subr.mxu1 %v8739_v0 }
 0x752   :  { %v1661_v43 = vpop.f32.mrb[12].mxu1 }
 0x753   :  { %v7957_v62 = vpop.f32.mrb[13].mxu1 }
 0x7c3   :  { %v1734_v1 = vpop.f32.mrb[12].mxu0  ;;  %v9251_v5 = vpop.f32.mrb[14].mxu1 }
 0x7c4   :  { %v1735_v6 = vadd.f32 %v1734_v1, %v1661_v43  ;;  %v7968_v10 = vpop.f32.mrb[13].mxu0  ;;  %v7979_v57 = vpop.f32.mrb[15].mxu1 }
 0x7c6   :  { %v1738_v60 = vadd.f32 %v8953_v58, %v1735_v6 }
 0x7c8   :  { %v1740_v50 = vcombine.high %v1738_v60, %v1738_v60  ;;  %v1747_v11 = vrot.slane %v1738_v60, %v8956_v61 }
 0x7ca   :  { %v1754_v63 = vrot.slane %v1740_v50, %v8956_v61  ;;  %v1755_v16 = vcombine.high %v1747_v11, %v1747_v11  ;;  %v1763_v18 = vrot.slane %v1747_v11, %v8956_v61 }
 0x7cc   :  { %v1756_v19 = vcombine.high %v1754_v63, %v1754_v63  ;;  %v1770_v2 = vrot.slane %v1754_v63, %v8956_v61  ;;  %v1777_v54 = vrot.slane %v1755_v16, %v8956_v61  ;;  %v1785_v25 = vcombine.high %v1763_v18, %v1763_v18 }
 0x7cd   :  { %v1792_v3 = vrot.slane %v1763_v18, %v8961_v4 }
 0x7ce   :  { %v1784_v39 = vrot.slane %v1756_v19, %v8956_v61  ;;  %v1787_v33 = vcombine.high %v1777_v54, %v1777_v54  ;;  %v1796_v58 = vrot.slane %v1777_v54, %v8961_v4  ;;  %v1786_v23 = vcombine.high %v1770_v2, %v1770_v2 }
 0x7cf   :  { %v1800_v44 = vrot.slane %v1785_v25, %v8961_v4  ;;  %v1808_v47 = vrot.slane %v1770_v2, %v8961_v4  ;;  %v1829_v49 = vadd.f32 %v1792_v3, %v8968_v13 }
 0x7d0   :  { %v1788_v36 = vcombine.high %v1784_v39, %v1784_v39  ;;  %v1804_v24 = vrot.slane %v1787_v33, %v8961_v4  ;;  %v1812_v37 = vrot.slane %v1784_v39, %v8961_v4  ;;  %v1830_v52 = vadd.f32 %v1796_v58, %v8975_v28 }
 0x7d1   :  { %v1831_v53 = vadd.f32 %v1800_v44, %v8977_v29  ;;  %v1833_v55 = vadd.f32 %v1808_v47, %v8979_v30  ;;  %8409 = vtanh.f32 %v1829_v49  ;;  %v1816_v43 = vrot.slane %v1786_v23, %v8961_v4 }
 0x7d2   :  { %v1820_v41 = vrot.slane %v1788_v36, %v8961_v4  ;;  %v1832_v56 = vadd.f32 %v1804_v24, %v8987_v38  ;;  %8411 = vtanh.f32 %v1830_v52  ;;  %v1834_v13 = vadd.f32 %v1812_v37, %v8990_v40 }
 0x7d3   :  { %8413 = vtanh.f32 %v1831_v53  ;;  %v1835_v28 = vadd.f32 %v1816_v43, %v8993_v42 }
 0x7d4   :  { %8415 = vtanh.f32 %v1833_v55  ;;  %v1836_v62 = vadd.f32 %v1820_v41, %v8997_v45 }
 0x7d5   :  { %8417 = vtanh.f32 %v1832_v56 }
 0x7d6   :  { %8419 = vtanh.f32 %v1834_v13 }
 0x7d7   :  { %8421 = vtanh.f32 %v1836_v62 }
 0x7d8   :  { %8423 = vtanh.f32 %v1835_v28 }
 0x7db   :  { %v8410_v29 = vpop.eup %8409 }
 0x7dc   :  { %v1845_v30 = vmul.f32 %v8410_v29, %v9002_v46  ;;  %v8412_v1 = vpop.eup %8411 }
 0x7dd   :  { %v8414_v38 = vpop.eup %8413  ;;  %v1846_v10 = vmul.f32 %v8412_v1, %v9002_v46 }
 0x7de   :  { %v1853_v6 = vsel %vm651_vm3, %v1845_v30, 0.0  ;;  %v8416_v40 = vpop.eup %8415  ;;  %v1847_v45 = vmul.f32 %v8414_v38, %v9002_v46 }
 0x7df   :  { %1854 = vadd.xlane.f32.xlu1 %v1853_v6  ;;  %v8418_v57 = vpop.eup %8417  ;;  %v1856_v60 = vsel %vm651_vm3, %v1846_v10, 0.0  ;;  %v1849_v19 = vmul.f32 %v8416_v40, %v9002_v46 }
 0x7e0   :  { %v8420_v50 = vpop.eup %8419  ;;  %1857 = vadd.xlane.f32.xlu0 %v1856_v60  ;;  %v1848_v42 = vmul.f32 %v8418_v57, %v9002_v46  ;;  %v1859_v18 = vsel %vm651_vm3, %v1847_v45, 0.0 }
 0x7e1   :  { %v1850_v63 = vmul.f32 %v8420_v50, %v9002_v46  ;;  %v8422_v16 = vpop.eup %8421  ;;  %v1865_v3 = vsel %vm651_vm3, %v1849_v19, 0.0 }
 0x7e2   :  { %v1862_v11 = vsel %vm651_vm3, %v1848_v42, 0.0  ;;  %v8424_v2 = vpop.eup %8423  ;;  %v1852_v25 = vmul.f32 %v8422_v16, %v9002_v46 }
 0x7e3   :  { %1863 = vadd.xlane.f32.xlu1 %v1862_v11  ;;  %v1868_v54 = vsel %vm651_vm3, %v1850_v63, 0.0  ;;  %v1851_v39 = vmul.f32 %v8424_v2, %v9002_v46 }
 0x7e4   :  { %1860 = vadd.xlane.f32.xlu0 %v1859_v18  ;;  %v1874_v33 = vsel %vm651_vm3, %v1852_v25, 0.0 }
 0x7e5   :  { %v1871_v58 = vsel %vm651_vm3, %v1851_v39, 0.0 }
 0x7e7   :  { %1869 = vadd.xlane.f32.xlu1 %v1868_v54 }
 0x7e8   :  { %1866 = vadd.xlane.f32.xlu0 %v1865_v3 }
 0x7eb   :  { %1875 = vadd.xlane.f32.xlu1 %v1874_v33 }
 0x7ec   :  { %1872 = vadd.xlane.f32.xlu0 %v1871_v58 }
 0x86c   :  { %v1855_v23 = vpop.xlane.xlu1 %1854 }
 0x86d   :  { %v1858_v44 = vpop.xlane.xlu0 %1857  ;;  %v1877_v49 = vadd.f32 %v1855_v23, %v9025_v35 }
 0x86e   :  { %v1878_v47 = vadd.f32 %v1858_v44, %v9025_v35 }
 0x86f   :  { %v1896_v46 = vrot.slane %v1877_v49, %v9023_v34 }
 0x870   :  { %v1864_v36 = vpop.xlane.xlu1 %1863  ;;  %v1900_v24 = vrot.slane %v1878_v47, %v9023_v34 }
 0x871   :  { %v1861_v37 = vpop.xlane.xlu0 %1860  ;;  %v1880_v53 = vadd.f32 %v1864_v36, %v9025_v35 }
 0x872   :  { %v1879_v52 = vadd.f32 %v1861_v37, %v9025_v35  ;;  %v1925_v56 = vsel %vm1045_vm4, %v1900_v24, %v1896_v46 }
 0x873   :  { %v1908_v28 = vrot.slane %v1880_v53, %v9023_v34 }
 0x874   :  { %v1904_v55 = vrot.slane %v1879_v52, %v9023_v34  ;;  %v1870_v41 = vpop.xlane.xlu1 %1869 }
 0x875   :  { %v1867_v43 = vpop.xlane.xlu0 %1866  ;;  %v1882_v29 = vadd.f32 %v1870_v41, %v9025_v35 }
 0x876   :  { %v1926_v13 = vsel %vm1047_vm5, %v1904_v55, %v1925_v56  ;;  %v1881_v62 = vadd.f32 %v1867_v43, %v9025_v35 }
 0x877   :  { %v1927_v10 = vsel %vm1049_vm6, %v1908_v28, %v1926_v13  ;;  %v1916_v60 = vrot.slane %v1882_v29, %v9023_v34 }
 0x878   :  { %v1912_v30 = vrot.slane %v1881_v62, %v9023_v34  ;;  %v1876_v1 = vpop.xlane.xlu1 %1875 }
 0x879   :  { %v1884_v38 = vadd.f32 %v1876_v1, %v9025_v35  ;;  %v1873_v6 = vpop.xlane.xlu0 %1872 }
 0x87a   :  { %v1883_v40 = vadd.f32 %v1873_v6, %v9025_v35  ;;  %v1928_v57 = vsel %vm1051_vm7, %v1912_v30, %v1927_v10 }
 0x87b   :  { %v1924_v50 = vrot.slane %v1884_v38, %v9023_v34  ;;  %v1929_v42 = vsel %vm1053_vm8, %v1916_v60, %v1928_v57  ;;  %v7663_v57 = vld [vmem:[%s10715_s0 + $0x8] sm:$0xff] }
 0x87c   :  { %v1920_v45 = vrot.slane %v1883_v40, %v9023_v34  ;;  %v2132_v60 = vrot.slane %v7663_v57, %v8961_v4 }
 0x87e   :  { %v1930_v11 = vsel %vm1055_vm9, %v1920_v45, %v1929_v42  ;;  %v2139_v45 = vrot.slane %v7663_v57, %v9058_v7  ;;  %v2153_v42 = vrot.slane %v7663_v57, %v9070_v17 }
 0x87f   :  { %v1931_v63 = vsel %vm1057_vm10, %v1924_v50, %v1930_v11  ;;  %v2146_v50 = vrot.slane %v7663_v57, %v9064_v9  ;;  %v2160_v11 = vrot.slane %v7663_v57, %v9074_v31 }
 0x880   :  { %v1933_v16 = vsel %vm1060_vm11, %v1931_v63, -inf  ;;  %v2167_v63 = vrot.slane %v7663_v57, %v9078_v48 }
 0x881   :  { %1934 = vmax.xlane.f32.xlu0 %v1933_v16  ;;  %v2174_v16 = vrot.slane %v7663_v57, %v9082_v51 }
 0x90e   :  { %v1935_v18 = vpop.xlane.xlu0 %1934 }
 0x90f   :  { %v1940_v19 = vrot.slane %v1935_v18, %v8961_v4  ;;  %v1944_v2 = vrot.slane %v1935_v18, %v9058_v7  ;;  %v1948_v54 = vrot.slane %v1935_v18, %v9064_v9  ;;  %v1956_v25 = vrot.slane %v1935_v18, %v9074_v31 }
 0x910   :  { %v1964_v3 = vrot.slane %v1935_v18, %v9082_v51  ;;  %v1952_v58 = vrot.slane %v1935_v18, %v9070_v17  ;;  %v1960_v55 = vrot.slane %v1935_v18, %v9078_v48  ;;  %v1968_v13 = vrot.slane %v1935_v18, %v9061_v8 }
 0x911   :  { %v1978_v39 = vsub.f32 %v1878_v47, %v1944_v2  ;;  %v1977_v33 = vsub.f32 %v1877_v49, %v1940_v19  ;;  %v1981_v23 = vsub.f32 %v1881_v62, %v1956_v25  ;;  %v1979_v44 = vsub.f32 %v1879_v52, %v1948_v54 }
 0x912   :  { %v1983_v46 = vsub.f32 %v1883_v40, %v1964_v3  ;;  %v1980_v56 = vsub.f32 %v1880_v53, %v1952_v58  ;;  %v1982_v49 = vsub.f32 %v1882_v29, %v1960_v55  ;;  %v1984_v62 = vsub.f32 %v1884_v38, %v1968_v13 }
 0x913   :  { %v1987_v36 = vmul.f32 1.442695, %v1978_v39  ;;  %v1985_v24 = vmul.f32 1.442695, %v1977_v33  ;;  %v1993_v37 = vmul.f32 1.442695, %v1981_v23  ;;  %v2181_v18 = vrot.slane %v7663_v57, %v9061_v8 }
 0x914   :  { %v1989_v41 = vmul.f32 1.442695, %v1979_v44  ;;  %v1997_v43 = vmul.f32 1.442695, %v1983_v46  ;;  %v1991_v47 = vmul.f32 1.442695, %v1980_v56 }
 0x915   :  { %8425 = vpow2.f32 %v1987_v36  ;;  %v1995_v52 = vmul.f32 1.442695, %v1982_v49  ;;  %v1999_v53 = vmul.f32 1.442695, %v1984_v62 }
 0x916   :  { %8427 = vpow2.f32 %v1985_v24 }
 0x917   :  { %8429 = vpow2.f32 %v1993_v37 }
 0x918   :  { %8431 = vpow2.f32 %v1989_v41 }
 0x919   :  { %8433 = vpow2.f32 %v1997_v43 }
 0x91a   :  { %8435 = vpow2.f32 %v1991_v47 }
 0x91b   :  { %8437 = vpow2.f32 %v1995_v52 }
 0x91c   :  { %8439 = vpow2.f32 %v1999_v53 }
 0x91f   :  { %v9324_v28 = vpop.eup %8425 }
 0x920   :  { %v9326_v30 = vpop.eup %8427  ;;  %2013 = vperm.xlu0 %8365, %v9324_v28  }
 0x921   :  { %2010 = vperm.xlu1 %8366, %v9326_v30   ;;  %v9330_v1 = vpop.eup %8429 }
 0x922   :  { %v9332_v6 = vpop.eup %8431 }
 0x923   :  { %v9336_v29 = vpop.eup %8433 }
 0x924   :  { %2022 = vperm.xlu0 %8365, %v9330_v1   ;;  %v9338_v38 = vpop.eup %8435 }
 0x925   :  { %2016 = vperm.xlu1 %8366, %v9332_v6   ;;  %v9342_v10 = vpop.eup %8437 }
 0x926   :  { %v9345_v40 = vpop.eup %8439 }
 0x928   :  { %2028 = vperm.xlu0 %8365, %v9336_v29  }
 0x929   :  { %2019 = vperm.xlu1 %8366, %v9338_v38  }
 0x92d   :  { %2025 = vperm.xlu1 %8366, %v9342_v10  }
 0x931   :  { %2031 = vperm.xlu1 %8366, %v9345_v40  }
 0x935   :  { %2134 = vbcast.lane.b32.xlu1 %v2132_v60, 256 }
 0x939   :  { %2141 = vbcast.lane.b32.xlu1 %v2139_v45, 256 }
 0x93d   :  { %2148 = vbcast.lane.b32.xlu1 %v2146_v50, 256 }
 0x941   :  { %2155 = vbcast.lane.b32.xlu1 %v2153_v42, 256 }
 0x945   :  { %2162 = vbcast.lane.b32.xlu1 %v2160_v11, 256 }
 0x949   :  { %2169 = vbcast.lane.b32.xlu1 %v2167_v63, 256 }
 0x94d   :  { %2176 = vbcast.lane.b32.xlu1 %v2174_v16, 256 }
 0x951   :  { %2183 = vbcast.lane.b32.xlu1 %v2181_v18, 256 }
 0x99f   :  { %v2014_v2 = vpop.permute.xlu0 %2013 }
 0x9a0   :  { %v2011_v19 = vpop.permute.xlu1 %2010  ;;  %v2040_v25 = vrot.slane %v2014_v2, %v9023_v34 }
 0x9a1   :  { %v2036_v3 = vrot.slane %v2011_v19, %v9023_v34 }
 0x9a3   :  { %v2023_v33 = vpop.permute.xlu0 %2022  ;;  %v2065_v23 = vsel %vm1045_vm4, %v2040_v25, %v2036_v3 }
 0x9a4   :  { %v2017_v54 = vpop.permute.xlu1 %2016  ;;  %v2052_v37 = vrot.slane %v2023_v33, %v9023_v34 }
 0x9a5   :  { %v2044_v39 = vrot.slane %v2017_v54, %v9023_v34 }
 0x9a7   :  { %v2066_v36 = vsel %vm1047_vm5, %v2044_v39, %v2065_v23  ;;  %v2029_v55 = vpop.permute.xlu0 %2028 }
 0x9a8   :  { %v2020_v58 = vpop.permute.xlu1 %2019  ;;  %v2060_v13 = vrot.slane %v2029_v55, %v9023_v34 }
 0x9a9   :  { %v2048_v44 = vrot.slane %v2020_v58, %v9023_v34 }
 0x9ab   :  { %v2067_v24 = vsel %vm1049_vm6, %v2048_v44, %v2066_v36 }
 0x9ac   :  { %v2026_v46 = vpop.permute.xlu1 %2025  ;;  %v2068_v56 = vsel %vm1051_vm7, %v2052_v37, %v2067_v24 }
 0x9ad   :  { %v2056_v41 = vrot.slane %v2026_v46, %v9023_v34 }
 0x9af   :  { %v2069_v43 = vsel %vm1053_vm8, %v2056_v41, %v2068_v56 }
 0x9b0   :  { %v2032_v47 = vpop.permute.xlu1 %2031  ;;  %v2070_v52 = vsel %vm1055_vm9, %v2060_v13, %v2069_v43 }
 0x9b1   :  { %v2064_v49 = vrot.slane %v2032_v47, %v9023_v34 }
 0x9b3   :  { %v2071_v62 = vsel %vm1057_vm10, %v2064_v49, %v2070_v52 }
 0x9b4   :  { %v2073_v53 = vsel %vm1060_vm11, %v2071_v62, 0.0  ;;  %v2135_v57 = vpop.permute.xlu1 %2134 }
 0x9b5   :  { %2074 = vadd.xlane.f32.xlu0 %v2073_v53 }
 0x9b8   :  { %v2142_v60 = vpop.permute.xlu1 %2141 }
 0x9bc   :  { %v2149_v45 = vpop.permute.xlu1 %2148 }
 0x9c0   :  { %v2156_v42 = vpop.permute.xlu1 %2155 }
 0x9c4   :  { %v2163_v11 = vpop.permute.xlu1 %2162 }
 0x9c8   :  { %v2170_v54 = vpop.permute.xlu1 %2169 }
 0x9cc   :  { %v2177_v36 = vpop.permute.xlu1 %2176 }
 0x9d0   :  { %v2184_v47 = vpop.permute.xlu1 %2183 }
 0xa42   :  { %v2075_v50 = vpop.xlane.xlu0 %2074 }
 0xa43   :  { %8441 = vrcp.f32 %v2075_v50 }
 0xa4d   :  { %v8442_v63 = vpop.eup %8441 }
 0xa4e   :  { %v2105_v16 = vrot.slane %v8442_v63, %v9082_v51  ;;  %v2081_v18 = vrot.slane %v8442_v63, %v8961_v4  ;;  %v2085_v19 = vrot.slane %v8442_v63, %v9058_v7  ;;  %v2089_v2 = vrot.slane %v8442_v63, %v9064_v9 }
 0xa4f   :  { %v2093_v39 = vrot.slane %v8442_v63, %v9070_v17  ;;  %v2097_v24 = vrot.slane %v8442_v63, %v9074_v31  ;;  %v2109_v56 = vrot.slane %v8442_v63, %v9061_v8 }
 0xa50   :  { %v2118_v25 = vmul.f32 %v9326_v30, %v2081_v18  ;;  %v2119_v3 = vmul.f32 %v9324_v28, %v2085_v19  ;;  %v2124_v33 = vmul.f32 %v9336_v29, %v2105_v16  ;;  %v2120_v44 = vmul.f32 %v9332_v6, %v2089_v2 }
 0xa51   :  { %v2121_v55 = vmul.f32 %v9338_v38, %v2093_v39  ;;  %v2122_v28 = vmul.f32 %v9330_v1, %v2097_v24  ;;  %v2101_v30 = vrot.slane %v8442_v63, %v9078_v48  ;;  %v2125_v13 = vmul.f32 %v9345_v40, %v2109_v56 }
 0xa52   :  { %v2193_v58 = vmul.f32 %v2135_v57, %v2118_v25  ;;  %v2194_v23 = vmul.f32 %v2142_v60, %v2119_v3  ;;  %v2199_v37 = vmul.f32 %v2177_v36, %v2124_v33  ;;  %v2195_v46 = vmul.f32 %v2149_v45, %v2120_v44 }
 0xa53   :  { %v2196_v29 = vmul.f32 %v2156_v42, %v2121_v55  ;;  %v2197_v41 = vmul.f32 %v2163_v11, %v2122_v28  ;;  %v2123_v6 = vmul.f32 %v9342_v10, %v2101_v30  ;;  %v2200_v38 = vmul.f32 %v2184_v47, %v2125_v13 }
 0xa54   :  { %2280 = vperm.xlu0 %8365, %v2193_v58   ;;  %2283 = vperm.xlu1 %8366, %v2194_v23  }
 0xa55   :  { %v2198_v43 = vmul.f32 %v2170_v54, %v2123_v6 }
 0xa58   :  { %2286 = vperm.xlu1 %8366, %v2195_v46   ;;  %2298 = vperm.xlu0 %8365, %v2199_v37  }
 0xa5c   :  { %2289 = vperm.xlu1 %8366, %v2196_v29  }
 0xa60   :  { %2292 = vperm.xlu1 %8366, %v2197_v41  }
 0xa64   :  { %2295 = vperm.xlu1 %8366, %v2198_v43  }
 0xa68   :  { %2301 = vperm.xlu1 %8366, %v2200_v38  }
 0xa6c   :  { %2422 = vrot.lane.b32.xlu1 %v9223_v59, %s8744_s13 }
 0xad3   :  { %v2284_v1 = vpop.permute.xlu1 %2283  ;;  %v2281_v52 = vpop.permute.xlu0 %2280 }
 0xad4   :  { %v2306_v53 = vrot.slane %v2281_v52, %v9023_v34  ;;  %v2310_v10 = vrot.slane %v2284_v1, %v9023_v34 }
 0xad6   :  { %v2335_v50 = vsel %vm1045_vm4, %v2310_v10, %v2306_v53 }
 0xad7   :  { %v2287_v49 = vpop.permute.xlu1 %2286  ;;  %v2299_v11 = vpop.permute.xlu0 %2298 }
 0xad8   :  { %v2314_v57 = vrot.slane %v2287_v49, %v9023_v34  ;;  %v2330_v2 = vrot.slane %v2299_v11, %v9023_v34 }
 0xada   :  { %v2336_v42 = vsel %vm1047_vm5, %v2314_v57, %v2335_v50 }
 0xadb   :  { %v2290_v62 = vpop.permute.xlu1 %2289 }
 0xadc   :  { %v2318_v40 = vrot.slane %v2290_v62, %v9023_v34 }
 0xade   :  { %v2337_v63 = vsel %vm1049_vm6, %v2318_v40, %v2336_v42 }
 0xadf   :  { %v2293_v60 = vpop.permute.xlu1 %2292 }
 0xae0   :  { %v2322_v45 = vrot.slane %v2293_v60, %v9023_v34  ;;  %v9456_v60 = vld [vmem:[%s10713_s4] ss:$0 sm:$0xff] }
 0xae2   :  { %v2338_v18 = vsel %vm1051_vm7, %v2322_v45, %v2337_v63 }
 0xae3   :  { %v2296_v59 = vpop.permute.xlu1 %2295 }
 0xae4   :  { %v2326_v16 = vrot.slane %v2296_v59, %v9023_v34 }
 0xae6   :  { %v2339_v19 = vsel %vm1053_vm8, %v2326_v16, %v2338_v18 }
 0xae7   :  { %v2302_v54 = vpop.permute.xlu1 %2301  ;;  %v2340_v3 = vsel %vm1055_vm9, %v2330_v2, %v2339_v19 }
 0xae8   :  { %v2334_v25 = vrot.slane %v2302_v54, %v9023_v34 }
 0xaea   :  { %v2341_v39 = vsel %vm1057_vm10, %v2334_v25, %v2340_v3 }
 0xaeb   :  { %7983 = vmatmul.mubr.msk.f32.vlgmr.msra.gmra.mrb[14].mxu0 %vm1060_vm11, %v2341_v39  ;;  %v2423_v29 = vpop.permute.xlu1 %2422 }
 0xaec   :  { %8251 = vmatpush3.bf16.msra.mxu0 %v8881_v14  ;;  %7993 = vmatprep.mubr.msk.f32.mxu0 %vm8740_vm2, %v8739_v0 }
 0xaed   :  { %8252 = vmatprep.subr.bf16.mxu0 %v8741_v20 }
 0xaf0   :  { %8254 = vmatpush3.bf16.msra.mxu0 %v8907_v21 }
 0xaf1   :  { %8261 = vmatprep.subr.bf16.mxu0 %v8741_v20 }
 0xbbe   :  { %v2410_v33 = vpop.f32.mrb[14].mxu0 }
 0xbbf   :  { %v2411_v58 = vadd.f32 %v2410_v33, %v9251_v5  ;;  %v7984_v23 = vpop.f32.mrb[15].mxu0 }
 0xbc0   :  { %v9469_v23 = vld [vmem:[#allocation4] sm:$0xf] }
 0xbc1   :  { %v2414_v44 = vadd.f32 %v9214_v12, %v2411_v58 }
 0xbc3   :  { %8443 = vtanh.f32 %v2414_v44  ;;  %v7667_v24 = vmul.f32 -1.442695, %v2414_v44 }
 0xbc5   :  { %8445 = vpow2.f32 %v7667_v24 }
 0xbcd   :  { %v8444_v36 = vpop.eup %8443 }
 0xbce   :  { %2427 = vrot.lane.b32.xlu0 %v8444_v36, %s8745_s14 }
 0xbcf   :  { %v8446_v37 = vpop.eup %8445 }
 0xbd0   :  { %v2418_v46 = vadd.f32 1.0, %v8446_v37 }
 0xbd2   :  { %8447 = vrcp.f32 %v2418_v46 }
 0xbdc   :  { %v8448_v55 = vpop.eup %8447 }
 0xbdd   :  { %v2425_v41 = vmul.f32 %v8448_v55, %v2423_v29 }
 0xc40   :  { %v2428_v28 = vpop.permute.xlu0 %2427 }
 0xc41   :  { %v2430_v30 = vmul.f32 %v8448_v55, %v2428_v28 }
 0xc43   :  { %2432 = vrot.lane.b32.xlu0 %v2430_v30, %s8744_s13  ;;  %v9478_v30 = vld [vmem:[#allocation4 + $0x8] sm:$0xf] }
 0xcb5   :  { %v2433_v5 = vpop.permute.xlu0 %2432 }
 0xcb6   :  { %v2435_v6 = vadd.f32 %v2433_v5, %v2425_v41  ;;  %v9481_v41 = vld [vmem:[#allocation4 + $0x10] sm:$0xf] }
 0xcb8   :  { %8449 = vtanh.f32 %v2435_v6 }
 0xcc2   :  { %v8450_v12 = vpop.eup %8449 }
 0xcc3   :  { %2438 = vrot.lane.b32.xlu1 %v8450_v12, %s8745_s14 }
 0xcc7   :  { %2448 = vrot.lane.b32.xlu1 %v2435_v6, %s8746_s15  ;;  %v9484_v6 = vld [vmem:[#allocation4 + $0xc] sm:$0xf] }
 0xd35   :  { %v2439_v56 = vpop.permute.xlu1 %2438 }
 0xd36   :  { %v2441_v43 = vmul.f32 %v8448_v55, %v2439_v56  ;;  %v9475_v55 = vld [vmem:[#allocation4 + $0x4] sm:$0xf]  ;;  %v9487_v56 = vld [vmem:[#allocation4 + $0x18] sm:$0xf] }
 0xd38   :  { %2443 = vrot.lane.b32.xlu0 %v2441_v43, %s8744_s13 }
 0xd39   :  { %v2449_v13 = vpop.permute.xlu1 %2448 }
 0xd3a   :  { %2451 = vst.msk [vmem:[#allocation3] sm:$0xff] %vm47_vm1, %v2449_v13 }
 0xd41   :  { %v9423_v47 = vld [vmem:[#allocation3] sm:$0xff] }
 0xd42   :  { %7994 = vmatmul.mubr.msk.f32.vlgmr.msra.gmra.mrb[16].mxu0 %vm47_vm1, %v9423_v47 }
 0xd43   :  { %8263 = vmatpush3.bf16.msra.mxu0 %v9157_v26  ;;  %8015 = vmatprep.mubr.msk.f32.mxu0 %vm8740_vm2, %v8739_v0 }
 0xd44   :  { %8264 = vmatprep.subr.bf16.mxu0 %v8741_v20 }
 0xd47   :  { %8266 = vmatpush3.bf16.msra.mxu0 %v9166_v27 }
 0xd48   :  { %8273 = vmatprep.subr.bf16.mxu0 %v8741_v20 }
 0xdaa   :  { %v2444_v38 = vpop.permute.xlu0 %2443 }
 0xdab   :  { %2446 = vst.msk [vmem:[#allocation2] sm:$0xff] %vm47_vm1, %v2444_v38  ;;  %7668 = vst.msk [vmem:[%s10719_s12 + $0x8] sm:$0xff] %vm47_vm1, %v2444_v38  ;;  %v9491_v38 = vld [vmem:[#allocation4 + $0x14] sm:$0xf] }
 0xdb2   :  { %v2454_v1 = vld [vmem:[#allocation2] sm:$0xff] }
 0xdb3   :  { %8005 = vmatmul.mubr.msk.f32.vlgmr.msra.gmra.mrb[16].mxu1 %vm47_vm1, %v2454_v1  ;;  %8016 = vmatmul.mubr.msk.f32.vlgmr.msra.gmra.mrb[18].mxu0 %vm47_vm1, %v2454_v1 }
 0xdb4   :  { %8019 = vmatpush3.msk.msra.mxu1 %vm1471_vm12, %v9171_v32  ;;  %8020 = vmatprep.mubr.msk.f32.mxu1 %vm8740_vm2, %v8739_v0 }
 0xdb5   :  { %8267 = vmatprep.subr.bf16.mxu1 %v8741_v20  ;;  %8275 = vmatpush3.bf16.msra.mxu0 %v8883_v15 }
 0xdb6   :  { %8276 = vmatprep.subr.bf16.mxu0 %v8741_v20  ;;  %8042 = vmatprep.mubr.msk.f32.mxu0 %vm8740_vm2, %v8739_v0 }
 0xdb9   :  { %8278 = vmatpush3.bf16.msra.mxu0 %v8909_v22 }
 0xdba   :  { %8056 = vmatprep.subr.mxu0 %v8739_v0 }
 0xe15   :  { %v2525_v49 = vpop.f32.mrb[16].mxu0 }
 0xe16   :  { %v7995_v52 = vpop.f32.mrb[17].mxu0 }
 0xe86   :  { %v2598_v62 = vpop.f32.mrb[16].mxu1  ;;  %v9451_v32 = vpop.f32.mrb[18].mxu0 }
 0xe87   :  { %v2599_v53 = vadd.f32 %v2598_v62, %v2525_v49  ;;  %v8006_v10 = vpop.f32.mrb[17].mxu1  ;;  %v8017_v57 = vpop.f32.mrb[19].mxu0  ;;  %v9494_v49 = vld [vmem:[#allocation4 + $0x1c] sm:$0xf] }
 0xe89   :  { %v2602_v40 = vadd.f32 %v9456_v60, %v2599_v53  ;;  %v9500_v53 = vld [vmem:[%s10714_s7] ss:$0 sm:$0xff] }
 0xe8b   :  { %v2604_v45 = vcombine.high %v2602_v40, %v2602_v40  ;;  %v2611_v50 = vrot.slane %v2602_v40, %v8956_v61 }
 0xe8d   :  { %v2618_v42 = vrot.slane %v2604_v45, %v8956_v61  ;;  %v2619_v59 = vcombine.high %v2611_v50, %v2611_v50  ;;  %v2627_v11 = vrot.slane %v2611_v50, %v8956_v61 }
 0xe8f   :  { %v2620_v63 = vcombine.high %v2618_v42, %v2618_v42  ;;  %v2634_v16 = vrot.slane %v2618_v42, %v8956_v61  ;;  %v2641_v18 = vrot.slane %v2619_v59, %v8956_v61  ;;  %v2649_v19 = vcombine.high %v2627_v11, %v2627_v11 }
 0xe90   :  { %v2656_v2 = vrot.slane %v2627_v11, %v8961_v4 }
 0xe91   :  { %v2648_v54 = vrot.slane %v2620_v63, %v8956_v61  ;;  %v2650_v25 = vcombine.high %v2634_v16, %v2634_v16  ;;  %v2651_v3 = vcombine.high %v2641_v18, %v2641_v18  ;;  %v2660_v39 = vrot.slane %v2641_v18, %v8961_v4 }
 0xe92   :  { %v2664_v33 = vrot.slane %v2649_v19, %v8961_v4  ;;  %v2672_v58 = vrot.slane %v2634_v16, %v8961_v4  ;;  %v2693_v44 = vadd.f32 %v9469_v23, %v2656_v2 }
 0xe93   :  { %v2652_v36 = vcombine.high %v2648_v54, %v2648_v54  ;;  %v2668_v24 = vrot.slane %v2651_v3, %v8961_v4  ;;  %v2676_v37 = vrot.slane %v2648_v54, %v8961_v4  ;;  %v2680_v46 = vrot.slane %v2650_v25, %v8961_v4 }
 0xe94   :  { %v2694_v28 = vadd.f32 %v9475_v55, %v2660_v39  ;;  %v2695_v29 = vadd.f32 %v9478_v30, %v2664_v33  ;;  %v2697_v5 = vadd.f32 %v9481_v41, %v2672_v58  ;;  %8451 = vtanh.f32 %v2693_v44 }
 0xe95   :  { %v2696_v12 = vadd.f32 %v9484_v6, %v2668_v24  ;;  %v2699_v43 = vadd.f32 %v9487_v56, %v2680_v46  ;;  %v2684_v13 = vrot.slane %v2652_v36, %v8961_v4  ;;  %v2698_v1 = vadd.f32 %v9491_v38, %v2676_v37 }
 0xe96   :  { %8453 = vtanh.f32 %v2694_v28 }
 0xe97   :  { %8455 = vtanh.f32 %v2695_v29  ;;  %v2700_v52 = vadd.f32 %v9494_v49, %v2684_v13 }
 0xe98   :  { %8457 = vtanh.f32 %v2697_v5 }
 0xe99   :  { %8459 = vtanh.f32 %v2696_v12 }
 0xe9a   :  { %8461 = vtanh.f32 %v2699_v43 }
 0xe9b   :  { %8463 = vtanh.f32 %v2698_v1 }
 0xe9c   :  { %8465 = vtanh.f32 %v2700_v52 }
 0xe9e   :  { %v8452_v62 = vpop.eup %8451 }
 0xe9f   :  { %v2709_v10 = vmul.f32 %v9500_v53, %v8452_v62 }
 0xea0   :  { %v8454_v57 = vpop.eup %8453 }
 0xea1   :  { %v8456_v40 = vpop.eup %8455  ;;  %v2717_v45 = vsel %vm651_vm3, %v2709_v10, 0.0  ;;  %v2710_v50 = vmul.f32 %v9500_v53, %v8454_v57 }
 0xea2   :  { %v8458_v42 = vpop.eup %8457  ;;  %2718 = vadd.xlane.f32.xlu0 %v2717_v45  ;;  %v2711_v59 = vmul.f32 %v9500_v53, %v8456_v40 }
 0xea3   :  { %v8460_v11 = vpop.eup %8459  ;;  %v2720_v63 = vsel %vm651_vm3, %v2710_v50, 0.0  ;;  %v2713_v16 = vmul.f32 %v9500_v53, %v8458_v42 }
 0xea4   :  { %v8462_v18 = vpop.eup %8461  ;;  %2721 = vadd.xlane.f32.xlu1 %v2720_v63  ;;  %v2723_v19 = vsel %vm651_vm3, %v2711_v59, 0.0  ;;  %v2712_v2 = vmul.f32 %v9500_v53, %v8460_v11 }
 0xea5   :  { %v8464_v54 = vpop.eup %8463  ;;  %v2729_v25 = vsel %vm651_vm3, %v2713_v16, 0.0  ;;  %v2715_v3 = vmul.f32 %v9500_v53, %v8462_v18 }
 0xea6   :  { %2724 = vadd.xlane.f32.xlu0 %v2723_v19  ;;  %v2726_v39 = vsel %vm651_vm3, %v2712_v2, 0.0  ;;  %v2714_v33 = vmul.f32 %v9500_v53, %v8464_v54  ;;  %v8466_v58 = vpop.eup %8465 }
 0xea7   :  { %v2735_v44 = vsel %vm651_vm3, %v2715_v3, 0.0  ;;  %v2716_v24 = vmul.f32 %v9500_v53, %v8466_v58 }
 0xea8   :  { %2730 = vadd.xlane.f32.xlu1 %v2729_v25  ;;  %v2732_v36 = vsel %vm651_vm3, %v2714_v33, 0.0 }
 0xea9   :  { %v2738_v37 = vsel %vm651_vm3, %v2716_v24, 0.0 }
 0xeaa   :  { %2727 = vadd.xlane.f32.xlu0 %v2726_v39 }
 0xeac   :  { %2736 = vadd.xlane.f32.xlu1 %v2735_v44 }
 0xeae   :  { %2733 = vadd.xlane.f32.xlu0 %v2732_v36 }
 0xeb2   :  { %2739 = vadd.xlane.f32.xlu0 %v2738_v37 }
 0xf2f   :  { %v2719_v46 = vpop.xlane.xlu0 %2718 }
 0xf30   :  { %v2741_v29 = vadd.f32 %v2719_v46, %v9025_v35 }
 0xf31   :  { %v2722_v28 = vpop.xlane.xlu1 %2721 }
 0xf32   :  { %v2742_v5 = vadd.f32 %v2722_v28, %v9025_v35  ;;  %v2760_v52 = vrot.slane %v2741_v29, %v9023_v34 }
 0xf33   :  { %v2725_v12 = vpop.xlane.xlu0 %2724 }
 0xf34   :  { %v2764_v43 = vrot.slane %v2742_v5, %v9023_v34  ;;  %v2743_v13 = vadd.f32 %v2725_v12, %v9025_v35 }
 0xf35   :  { %v2731_v1 = vpop.xlane.xlu1 %2730 }
 0xf36   :  { %v2768_v62 = vrot.slane %v2743_v13, %v9023_v34  ;;  %v2789_v57 = vsel %vm1045_vm4, %v2764_v43, %v2760_v52  ;;  %v2745_v45 = vadd.f32 %v2731_v1, %v9025_v35 }
 0xf37   :  { %v2728_v10 = vpop.xlane.xlu0 %2727 }
 0xf38   :  { %v2744_v40 = vadd.f32 %v2728_v10, %v9025_v35  ;;  %v2790_v59 = vsel %vm1047_vm5, %v2768_v62, %v2789_v57  ;;  %v2776_v18 = vrot.slane %v2745_v45, %v9023_v34 }
 0xf39   :  { %v2737_v42 = vpop.xlane.xlu1 %2736 }
 0xf3a   :  { %v2772_v50 = vrot.slane %v2744_v40, %v9023_v34  ;;  %v2747_v19 = vadd.f32 %v2737_v42, %v9025_v35 }
 0xf3b   :  { %v2734_v11 = vpop.xlane.xlu0 %2733 }
 0xf3c   :  { %v2791_v63 = vsel %vm1049_vm6, %v2772_v50, %v2790_v59  ;;  %v2746_v16 = vadd.f32 %v2734_v11, %v9025_v35  ;;  %v2784_v33 = vrot.slane %v2747_v19, %v9023_v34 }
 0xf3d   :  { %v2792_v25 = vsel %vm1051_vm7, %v2776_v18, %v2791_v63 }
 0xf3e   :  { %v2780_v2 = vrot.slane %v2746_v16, %v9023_v34 }
 0xf3f   :  { %v2740_v54 = vpop.xlane.xlu0 %2739 }
 0xf40   :  { %v2748_v3 = vadd.f32 %v2740_v54, %v9025_v35  ;;  %v2793_v39 = vsel %vm1053_vm8, %v2780_v2, %v2792_v25 }
 0xf41   :  { %v2794_v44 = vsel %vm1055_vm9, %v2784_v33, %v2793_v39 }
 0xf42   :  { %v2788_v58 = vrot.slane %v2748_v3, %v9023_v34 }
 0xf44   :  { %v2795_v36 = vsel %vm1057_vm10, %v2788_v58, %v2794_v44 }
 0xf45   :  { %v2797_v24 = vsel %vm1060_vm11, %v2795_v36, -inf }
 0xf46   :  { %2798 = vmax.xlane.f32.xlu1 %v2797_v24 }
 0xfd3   :  { %v2799_v37 = vpop.xlane.xlu1 %2798 }
 0xfd4   :  { %v2804_v46 = vrot.slane %v2799_v37, %v8961_v4  ;;  %v2808_v28 = vrot.slane %v2799_v37, %v9058_v7  ;;  %v2812_v12 = vrot.slane %v2799_v37, %v9064_v9  ;;  %v2816_v43 = vrot.slane %v2799_v37, %v9070_v17 }
 0xfd5   :  { %v2820_v62 = vrot.slane %v2799_v37, %v9074_v31  ;;  %v2824_v50 = vrot.slane %v2799_v37, %v9078_v48  ;;  %v2828_v11 = vrot.slane %v2799_v37, %v9082_v51  ;;  %v2832_v2 = vrot.slane %v2799_v37, %v9061_v8  ;;  %v7671_v37 = vld [vmem:[%s10715_s0 + $0x10] sm:$0xff] }
 0xfd6   :  { %v2842_v1 = vsub.f32 %v2742_v5, %v2808_v28  ;;  %v2841_v52 = vsub.f32 %v2741_v29, %v2804_v46  ;;  %v2843_v10 = vsub.f32 %v2743_v13, %v2812_v12  ;;  %v2844_v59 = vsub.f32 %v2744_v40, %v2816_v43 }
 0xfd7   :  { %v2845_v63 = vsub.f32 %v2745_v45, %v2820_v62  ;;  %v2846_v25 = vsub.f32 %v2746_v16, %v2824_v50  ;;  %v2847_v5 = vsub.f32 %v2747_v19, %v2828_v11  ;;  %v2848_v39 = vsub.f32 %v2748_v3, %v2832_v2 }
 0xfd8   :  { %v2851_v57 = vmul.f32 1.442695, %v2842_v1  ;;  %v2849_v42 = vmul.f32 1.442695, %v2841_v52  ;;  %v2853_v18 = vmul.f32 1.442695, %v2843_v10  ;;  %v2996_v46 = vrot.slane %v7671_v37, %v8961_v4 }
 0xfd9   :  { %v2855_v54 = vmul.f32 1.442695, %v2844_v59  ;;  %v2857_v29 = vmul.f32 1.442695, %v2845_v63  ;;  %v2859_v13 = vmul.f32 1.442695, %v2846_v25  ;;  %v3003_v28 = vrot.slane %v7671_v37, %v9058_v7 }
 0xfda   :  { %8467 = vpow2.f32 %v2851_v57  ;;  %v2861_v33 = vmul.f32 1.442695, %v2847_v5  ;;  %v2863_v40 = vmul.f32 1.442695, %v2848_v39  ;;  %v3010_v12 = vrot.slane %v7671_v37, %v9064_v9 }
 0xfdb   :  { %8469 = vpow2.f32 %v2849_v42  ;;  %v3017_v43 = vrot.slane %v7671_v37, %v9070_v17  ;;  %v3024_v1 = vrot.slane %v7671_v37, %v9074_v31  ;;  %v3031_v52 = vrot.slane %v7671_v37, %v9078_v48 }
 0xfdc   :  { %8471 = vpow2.f32 %v2853_v18  ;;  %v3038_v62 = vrot.slane %v7671_v37, %v9082_v51  ;;  %v3045_v10 = vrot.slane %v7671_v37, %v9061_v8 }
 0xfdd   :  { %8473 = vpow2.f32 %v2855_v54 }
 0xfde   :  { %8475 = vpow2.f32 %v2857_v29 }
 0xfdf   :  { %8477 = vpow2.f32 %v2859_v13 }
 0xfe0   :  { %8479 = vpow2.f32 %v2861_v33 }
 0xfe1   :  { %8481 = vpow2.f32 %v2863_v40 }
 0xfe4   :  { %v9550_v58 = vpop.eup %8467 }
 0xfe5   :  { %v9552_v45 = vpop.eup %8469  ;;  %2877 = vperm.xlu1 %8366, %v9550_v58  }
 0xfe6   :  { %2874 = vperm.xlu0 %8365, %v9552_v45   ;;  %v9556_v16 = vpop.eup %8471 }
 0xfe7   :  { %v9558_v19 = vpop.eup %8473 }
 0xfe8   :  { %v9562_v3 = vpop.eup %8475 }
 0xfe9   :  { %2880 = vperm.xlu1 %8366, %v9556_v16   ;;  %v9564_v44 = vpop.eup %8477 }
 0xfea   :  { %2883 = vperm.xlu0 %8365, %v9558_v19   ;;  %v8480_v36 = vpop.eup %8479 }
 0xfeb   :  { %v9568_v24 = vpop.eup %8481 }
 0xfed   :  { %2886 = vperm.xlu1 %8366, %v9562_v3  }
 0xfee   :  { %2889 = vperm.xlu0 %8365, %v9564_v44  }
 0xff1   :  { %2892 = vperm.xlu1 %8366, %v8480_v36  }
 0xff2   :  { %2895 = vperm.xlu0 %8365, %v9568_v24  }
 0xff6   :  { %2998 = vbcast.lane.b32.xlu0 %v2996_v46, 256 }
 0xffa   :  { %3005 = vbcast.lane.b32.xlu0 %v3003_v28, 256 }
 0xffe   :  { %3012 = vbcast.lane.b32.xlu0 %v3010_v12, 256 }
0x1002   :  { %3019 = vbcast.lane.b32.xlu0 %v3017_v43, 256 }
0x1006   :  { %3026 = vbcast.lane.b32.xlu0 %v3024_v1, 256 }
0x100a   :  { %3033 = vbcast.lane.b32.xlu0 %v3031_v52, 256 }
0x100e   :  { %3040 = vbcast.lane.b32.xlu0 %v3038_v62, 256 }
0x1012   :  { %3047 = vbcast.lane.b32.xlu0 %v3045_v10, 256 }
0x1064   :  { %v2878_v57 = vpop.permute.xlu1 %2877 }
0x1065   :  { %v2875_v50 = vpop.permute.xlu0 %2874  ;;  %v2904_v42 = vrot.slane %v2878_v57, %v9023_v34 }
0x1066   :  { %v2900_v59 = vrot.slane %v2875_v50, %v9023_v34 }
0x1068   :  { %v2881_v11 = vpop.permute.xlu1 %2880  ;;  %v2929_v2 = vsel %vm1045_vm4, %v2904_v42, %v2900_v59 }
0x1069   :  { %v2908_v63 = vrot.slane %v2881_v11, %v9023_v34  ;;  %v2884_v18 = vpop.permute.xlu0 %2883 }
0x106a   :  { %v2912_v54 = vrot.slane %v2884_v18, %v9023_v34 }
0x106b   :  { %v2930_v25 = vsel %vm1047_vm5, %v2908_v63, %v2929_v2 }
0x106c   :  { %v2887_v5 = vpop.permute.xlu1 %2886  ;;  %v2931_v39 = vsel %vm1049_vm6, %v2912_v54, %v2930_v25 }
0x106d   :  { %v2916_v29 = vrot.slane %v2887_v5, %v9023_v34  ;;  %v2890_v13 = vpop.permute.xlu0 %2889 }
0x106e   :  { %v2920_v33 = vrot.slane %v2890_v13, %v9023_v34 }
0x106f   :  { %v2932_v40 = vsel %vm1051_vm7, %v2916_v29, %v2931_v39 }
0x1070   :  { %v2893_v37 = vpop.permute.xlu1 %2892  ;;  %v2933_v12 = vsel %vm1053_vm8, %v2920_v33, %v2932_v40 }
0x1071   :  { %v2924_v46 = vrot.slane %v2893_v37, %v9023_v34  ;;  %v2896_v28 = vpop.permute.xlu0 %2895 }
0x1072   :  { %v2928_v43 = vrot.slane %v2896_v28, %v9023_v34 }
0x1073   :  { %v2934_v1 = vsel %vm1055_vm9, %v2924_v46, %v2933_v12 }
0x1074   :  { %v2935_v52 = vsel %vm1057_vm10, %v2928_v43, %v2934_v1 }
0x1075   :  { %v2937_v62 = vsel %vm1060_vm11, %v2935_v52, 0.0  ;;  %v2999_v10 = vpop.permute.xlu0 %2998 }
0x1076   :  { %2938 = vadd.xlane.f32.xlu1 %v2937_v62 }
0x1079   :  { %v3006_v57 = vpop.permute.xlu0 %3005 }
0x107d   :  { %v3013_v50 = vpop.permute.xlu0 %3012 }
0x1081   :  { %v3020_v59 = vpop.permute.xlu0 %3019 }
0x1085   :  { %v3027_v11 = vpop.permute.xlu0 %3026 }
0x1089   :  { %v3034_v5 = vpop.permute.xlu0 %3033 }
0x108d   :  { %v3041_v28 = vpop.permute.xlu0 %3040 }
0x1103   :  { %v2939_v42 = vpop.xlane.xlu1 %2938 }
0x1104   :  { %8483 = vrcp.f32 %v2939_v42 }
0x110e   :  { %v8484_v63 = vpop.eup %8483 }
0x110f   :  { %v2969_v18 = vrot.slane %v8484_v63, %v9082_v51  ;;  %v2945_v2 = vrot.slane %v8484_v63, %v8961_v4  ;;  %v2949_v54 = vrot.slane %v8484_v63, %v9058_v7  ;;  %v2953_v25 = vrot.slane %v8484_v63, %v9064_v9 }
0x1110   :  { %v2957_v39 = vrot.slane %v8484_v63, %v9070_v17  ;;  %v2961_v12 = vrot.slane %v8484_v63, %v9074_v31 }
0x1111   :  { %v2982_v29 = vmul.f32 %v9552_v45, %v2945_v2  ;;  %v2983_v13 = vmul.f32 %v9550_v58, %v2949_v54  ;;  %v2988_v33 = vmul.f32 %v8480_v36, %v2969_v18  ;;  %v2984_v46 = vmul.f32 %v9556_v16, %v2953_v25 }
0x1112   :  { %v2985_v52 = vmul.f32 %v9558_v19, %v2957_v39  ;;  %v2986_v58 = vmul.f32 %v9562_v3, %v2961_v12  ;;  %v2965_v45 = vrot.slane %v8484_v63, %v9078_v48 }
0x1113   :  { %v3057_v40 = vmul.f32 %v2999_v10, %v2982_v29  ;;  %v3058_v37 = vmul.f32 %v3006_v57, %v2983_v13  ;;  %v3063_v43 = vmul.f32 %v3041_v28, %v2988_v33  ;;  %v3059_v1 = vmul.f32 %v3013_v50, %v2984_v46  ;;  %v3048_v50 = vpop.permute.xlu0 %3047 }
0x1114   :  { %v3060_v36 = vmul.f32 %v3020_v59, %v2985_v52  ;;  %v3061_v62 = vmul.f32 %v3027_v11, %v2986_v58  ;;  %v2987_v16 = vmul.f32 %v9564_v44, %v2965_v45  ;;  %v2973_v10 = vrot.slane %v8484_v63, %v9061_v8 }
0x1115   :  { %3144 = vperm.xlu0 %8365, %v3057_v40   ;;  %3147 = vperm.xlu1 %8366, %v3058_v37  }
0x1116   :  { %v3062_v57 = vmul.f32 %v3034_v5, %v2987_v16  ;;  %v2989_v42 = vmul.f32 %v9568_v24, %v2973_v10 }
0x1118   :  { %v3064_v19 = vmul.f32 %v3048_v50, %v2989_v42 }
0x1119   :  { %3150 = vperm.xlu0 %8365, %v3059_v1   ;;  %3162 = vperm.xlu1 %8366, %v3063_v43  }
0x111d   :  { %3153 = vperm.xlu0 %8365, %v3060_v36   ;;  %v9641_v36 = vld [vmem:[%s10718_s11] ss:$0 sm:$0xff] }
0x1121   :  { %3156 = vperm.xlu0 %8365, %v3061_v62  }
0x1125   :  { %3159 = vperm.xlu0 %8365, %v3062_v57  }
0x1129   :  { %3165 = vperm.xlu0 %8365, %v3064_v19  }
0x112d   :  { %3286 = vrot.lane.b32.xlu0 %v9423_v47, %s8744_s13 }
0x1194   :  { %v3145_v3 = vpop.permute.xlu0 %3144  ;;  %v3148_v59 = vpop.permute.xlu1 %3147 }
0x1195   :  { %v3174_v11 = vrot.slane %v3148_v59, %v9023_v34  ;;  %v3170_v44 = vrot.slane %v3145_v3, %v9023_v34 }
0x1197   :  { %v3199_v5 = vsel %vm1045_vm4, %v3174_v11, %v3170_v44 }
0x1198   :  { %v3151_v18 = vpop.permute.xlu0 %3150  ;;  %v3163_v13 = vpop.permute.xlu1 %3162 }
0x1199   :  { %v3178_v63 = vrot.slane %v3151_v18, %v9023_v34  ;;  %v3194_v46 = vrot.slane %v3163_v13, %v9023_v34 }
0x119b   :  { %v3200_v29 = vsel %vm1047_vm5, %v3178_v63, %v3199_v5 }
0x119c   :  { %v3154_v2 = vpop.permute.xlu0 %3153 }
0x119d   :  { %v3182_v24 = vrot.slane %v3154_v2, %v9023_v34 }
0x119f   :  { %v3201_v39 = vsel %vm1049_vm6, %v3182_v24, %v3200_v29  ;;  %v9670_v29 = vld [vmem:[%s10717_s9] sm:$0xf] }
0x11a0   :  { %v3157_v54 = vpop.permute.xlu0 %3156 }
0x11a1   :  { %v3186_v25 = vrot.slane %v3157_v54, %v9023_v34 }
0x11a3   :  { %v3202_v40 = vsel %vm1051_vm7, %v3186_v25, %v3201_v39 }
0x11a4   :  { %v3160_v47 = vpop.permute.xlu0 %3159 }
0x11a5   :  { %v3190_v33 = vrot.slane %v3160_v47, %v9023_v34 }
0x11a7   :  { %v3203_v37 = vsel %vm1053_vm8, %v3190_v33, %v3202_v40 }
0x11a8   :  { %v3166_v28 = vpop.permute.xlu0 %3165  ;;  %v3204_v43 = vsel %vm1055_vm9, %v3194_v46, %v3203_v37 }
0x11a9   :  { %v3198_v12 = vrot.slane %v3166_v28, %v9023_v34 }
0x11ab   :  { %v3205_v1 = vsel %vm1057_vm10, %v3198_v12, %v3204_v43 }
0x11ac   :  { %8021 = vmatmul.mubr.msk.f32.vlgmr.msra.gmra.mrb[18].mxu1 %vm1060_vm11, %v3205_v1  ;;  %v3287_v3 = vpop.permute.xlu0 %3286 }
0x11ad   :  { %8269 = vmatpush3.bf16.msra.mxu1 %v8881_v14  ;;  %8031 = vmatprep.mubr.msk.f32.mxu1 %vm8740_vm2, %v8739_v0 }
0x11ae   :  { %8270 = vmatprep.subr.bf16.mxu1 %v8741_v20 }
0x11b1   :  { %8272 = vmatpush3.bf16.msra.mxu1 %v8907_v21 }
0x11b2   :  { %8279 = vmatprep.subr.bf16.mxu1 %v8741_v20 }
0x127f   :  { %v3274_v52 = vpop.f32.mrb[18].mxu1 }
0x1280   :  { %v3275_v58 = vadd.f32 %v3274_v52, %v9451_v32  ;;  %v8022_v45 = vpop.f32.mrb[19].mxu1 }
0x1282   :  { %v3278_v62 = vadd.f32 %v9641_v36, %v3275_v58 }
0x1284   :  { %8485 = vtanh.f32 %v3278_v62  ;;  %v7675_v10 = vmul.f32 -1.442695, %v3278_v62 }
0x1286   :  { %8487 = vpow2.f32 %v7675_v10 }
0x128e   :  { %v8486_v16 = vpop.eup %8485 }
0x128f   :  { %3291 = vrot.lane.b32.xlu1 %v8486_v16, %s8745_s14 }
0x1290   :  { %v8488_v57 = vpop.eup %8487 }
0x1291   :  { %v3282_v42 = vadd.f32 1.0, %v8488_v57 }
0x1293   :  { %8489 = vrcp.f32 %v3282_v42 }
0x129d   :  { %v8490_v50 = vpop.eup %8489 }
0x129e   :  { %v3289_v18 = vmul.f32 %v8490_v50, %v3287_v3 }
0x1301   :  { %v3292_v19 = vpop.permute.xlu1 %3291 }
0x1302   :  { %v3294_v32 = vmul.f32 %v8490_v50, %v3292_v19 }
0x1304   :  { %3296 = vrot.lane.b32.xlu1 %v3294_v32, %s8744_s13 }
0x1376   :  { %v3297_v59 = vpop.permute.xlu1 %3296 }
0x1377   :  { %v3299_v2 = vadd.f32 %v3297_v59, %v3289_v18 }
0x1379   :  { %8491 = vtanh.f32 %v3299_v2 }
0x1383   :  { %v8492_v11 = vpop.eup %8491 }
0x1384   :  { %3302 = vrot.lane.b32.xlu0 %v8492_v11, %s8745_s14 }
0x1388   :  { %3312 = vrot.lane.b32.xlu0 %v3299_v2, %s8746_s15 }
0x13f6   :  { %v3303_v44 = vpop.permute.xlu0 %3302 }
0x13f7   :  { %v3305_v63 = vmul.f32 %v8490_v50, %v3303_v44 }
0x13f9   :  { %3307 = vrot.lane.b32.xlu1 %v3305_v63, %s8744_s13 }
0x13fa   :  { %v3313_v54 = vpop.permute.xlu0 %3312 }
0x13fb   :  { %3315 = vst.msk [vmem:[#allocation3] sm:$0xff] %vm47_vm1, %v3313_v54 }
0x1402   :  { %v9650_v24 = vld [vmem:[#allocation3] sm:$0xff] }
0x1403   :  { %8032 = vmatmul.mubr.msk.f32.vlgmr.msra.gmra.mrb[20].mxu1 %vm47_vm1, %v9650_v24 }
0x1404   :  { %8281 = vmatpush3.bf16.msra.mxu1 %v9157_v26  ;;  %8053 = vmatprep.mubr.msk.f32.mxu1 %vm8740_vm2, %v8739_v0 }
0x1405   :  { %8282 = vmatprep.subr.bf16.mxu1 %v8741_v20 }
0x1408   :  { %8284 = vmatpush3.bf16.msra.mxu1 %v9166_v27 }
0x1409   :  { %8291 = vmatprep.subr.bf16.mxu1 %v8741_v20 }
0x146b   :  { %v3308_v25 = vpop.permute.xlu1 %3307 }
0x146c   :  { %3310 = vst.msk [vmem:[#allocation2] sm:$0xff] %vm47_vm1, %v3308_v25  ;;  %7676 = vst.msk [vmem:[%s10719_s12 + $0x10] sm:$0xff] %vm47_vm1, %v3308_v25 }
0x1473   :  { %v3318_v5 = vld [vmem:[#allocation2] sm:$0xff] }
0x1474   :  { %8043 = vmatmul.mubr.msk.f32.vlgmr.msra.gmra.mrb[20].mxu0 %vm47_vm1, %v3318_v5  ;;  %8054 = vmatmul.mubr.msk.f32.vlgmr.msra.gmra.mrb[22].mxu1 %vm47_vm1, %v3318_v5 }
0x1475   :  { %8057 = vmatpush3.msk.msra.mxu0 %vm1471_vm12, %v9670_v29  ;;  %8058 = vmatprep.mubr.msk.f32.mxu0 %vm8740_vm2, %v8739_v0 }
0x1476   :  { %8285 = vmatprep.subr.bf16.mxu0 %v8741_v20  ;;  %8293 = vmatpush3.bf16.msra.mxu1 %v8883_v15 }
0x1477   :  { %8294 = vmatprep.subr.bf16.mxu1 %v8741_v20  ;;  %8080 = vmatprep.mubr.msk.f32.mxu1 %vm8740_vm2, %v8739_v0 }
0x147a   :  { %8296 = vmatpush3.bf16.msra.mxu1 %v8909_v22 }
0x147b   :  { %8094 = vmatprep.subr.mxu1 %v8739_v0 }
0x14d6   :  { %v3389_v47 = vpop.f32.mrb[20].mxu1 }
0x14d7   :  { %v8033_v13 = vpop.f32.mrb[21].mxu1 }
0x1547   :  { %v3462_v39 = vpop.f32.mrb[20].mxu0  ;;  %v9683_v33 = vpop.f32.mrb[22].mxu1 }
0x1548   :  { %v3463_v40 = vadd.f32 %v3462_v39, %v3389_v47  ;;  %v8044_v37 = vpop.f32.mrb[21].mxu0  ;;  %v8055_v46 = vpop.f32.mrb[23].mxu1 }
0x154a   :  { %v3466_v28 = vadd.f32 %v9456_v60, %v3463_v40 }
0x154c   :  { %v3468_v12 = vcombine.high %v3466_v28, %v3466_v28  ;;  %v3475_v43 = vrot.slane %v3466_v28, %v8956_v61 }
0x154e   :  { %v3482_v1 = vrot.slane %v3468_v12, %v8956_v61  ;;  %v3483_v52 = vcombine.high %v3475_v43, %v3475_v43  ;;  %v3491_v58 = vrot.slane %v3475_v43, %v8956_v61 }
0x1550   :  { %v3484_v45 = vcombine.high %v3482_v1, %v3482_v1  ;;  %v3498_v62 = vrot.slane %v3482_v1, %v8956_v61  ;;  %v3505_v16 = vrot.slane %v3483_v52, %v8956_v61  ;;  %v3513_v10 = vcombine.high %v3491_v58, %v3491_v58 }
0x1551   :  { %v3520_v57 = vrot.slane %v3491_v58, %v8961_v4 }
0x1552   :  { %v3512_v42 = vrot.slane %v3484_v45, %v8956_v61  ;;  %v3515_v50 = vcombine.high %v3505_v16, %v3505_v16  ;;  %v3524_v60 = vrot.slane %v3505_v16, %v8961_v4  ;;  %v3514_v19 = vcombine.high %v3498_v62, %v3498_v62 }
0x1553   :  { %v3528_v32 = vrot.slane %v3513_v10, %v8961_v4  ;;  %v3536_v3 = vrot.slane %v3498_v62, %v8961_v4  ;;  %v3557_v18 = vadd.f32 %v9469_v23, %v3520_v57 }
0x1554   :  { %v3516_v59 = vcombine.high %v3512_v42, %v3512_v42  ;;  %v3532_v2 = vrot.slane %v3515_v50, %v8961_v4  ;;  %v3540_v11 = vrot.slane %v3512_v42, %v8961_v4  ;;  %v3558_v44 = vadd.f32 %v9475_v55, %v3524_v60 }
0x1555   :  { %v3559_v63 = vadd.f32 %v9478_v30, %v3528_v32  ;;  %v3561_v54 = vadd.f32 %v9481_v41, %v3536_v3  ;;  %8493 = vtanh.f32 %v3557_v18  ;;  %v3544_v47 = vrot.slane %v3514_v19, %v8961_v4 }
0x1556   :  { %v3548_v25 = vrot.slane %v3516_v59, %v8961_v4  ;;  %v3560_v5 = vadd.f32 %v9484_v6, %v3532_v2  ;;  %v3562_v23 = vadd.f32 %v9491_v38, %v3540_v11  ;;  %8495 = vtanh.f32 %v3558_v44 }
0x1557   :  { %8497 = vtanh.f32 %v3559_v63  ;;  %v3563_v55 = vadd.f32 %v9487_v56, %v3544_v47 }
0x1558   :  { %8499 = vtanh.f32 %v3561_v54  ;;  %v3564_v13 = vadd.f32 %v9494_v49, %v3548_v25 }
0x1559   :  { %8501 = vtanh.f32 %v3560_v5 }
0x155a   :  { %8503 = vtanh.f32 %v3562_v23 }
0x155b   :  { %8505 = vtanh.f32 %v3564_v13 }
0x155c   :  { %8507 = vtanh.f32 %v3563_v55 }
0x155f   :  { %v8494_v30 = vpop.eup %8493 }
0x1560   :  { %v3573_v41 = vmul.f32 %v9500_v53, %v8494_v30  ;;  %v8496_v39 = vpop.eup %8495 }
0x1561   :  { %v8498_v6 = vpop.eup %8497  ;;  %v3574_v38 = vmul.f32 %v9500_v53, %v8496_v39 }
0x1562   :  { %v3581_v40 = vsel %vm651_vm3, %v3573_v41, 0.0  ;;  %v8500_v37 = vpop.eup %8499  ;;  %v3575_v49 = vmul.f32 %v9500_v53, %v8498_v6 }
0x1563   :  { %3582 = vadd.xlane.f32.xlu1 %v3581_v40  ;;  %v8502_v46 = vpop.eup %8501  ;;  %v3584_v28 = vsel %vm651_vm3, %v3574_v38, 0.0  ;;  %v3577_v45 = vmul.f32 %v9500_v53, %v8500_v37 }
0x1564   :  { %v8504_v56 = vpop.eup %8503  ;;  %3585 = vadd.xlane.f32.xlu0 %v3584_v28  ;;  %v3576_v12 = vmul.f32 %v9500_v53, %v8502_v46  ;;  %v3587_v58 = vsel %vm651_vm3, %v3575_v49, 0.0 }
0x1565   :  { %v3578_v1 = vmul.f32 %v9500_v53, %v8504_v56  ;;  %v8506_v52 = vpop.eup %8505  ;;  %v3593_v57 = vsel %vm651_vm3, %v3577_v45, 0.0 }
0x1566   :  { %v3590_v43 = vsel %vm651_vm3, %v3576_v12, 0.0  ;;  %v8508_v62 = vpop.eup %8507  ;;  %v3580_v10 = vmul.f32 %v9500_v53, %v8506_v52 }
0x1567   :  { %3591 = vadd.xlane.f32.xlu1 %v3590_v43  ;;  %v3596_v16 = vsel %vm651_vm3, %v3578_v1, 0.0  ;;  %v3579_v42 = vmul.f32 %v9500_v53, %v8508_v62 }
0x1568   :  { %3588 = vadd.xlane.f32.xlu0 %v3587_v58  ;;  %v3602_v50 = vsel %vm651_vm3, %v3580_v10, 0.0 }
0x1569   :  { %v3599_v60 = vsel %vm651_vm3, %v3579_v42, 0.0 }
0x156b   :  { %3597 = vadd.xlane.f32.xlu1 %v3596_v16 }
0x156c   :  { %3594 = vadd.xlane.f32.xlu0 %v3593_v57 }
0x156f   :  { %3603 = vadd.xlane.f32.xlu1 %v3602_v50 }
0x1570   :  { %3600 = vadd.xlane.f32.xlu0 %v3599_v60 }
0x15f0   :  { %v3583_v19 = vpop.xlane.xlu1 %3582 }
0x15f1   :  { %v3586_v32 = vpop.xlane.xlu0 %3585  ;;  %v3605_v18 = vadd.f32 %v3583_v19, %v9025_v35 }
0x15f2   :  { %v3606_v3 = vadd.f32 %v3586_v32, %v9025_v35 }
0x15f3   :  { %v3624_v53 = vrot.slane %v3605_v18, %v9023_v34 }
0x15f4   :  { %v3592_v59 = vpop.xlane.xlu1 %3591  ;;  %v3628_v2 = vrot.slane %v3606_v3, %v9023_v34 }
0x15f5   :  { %v3589_v11 = vpop.xlane.xlu0 %3588  ;;  %v3608_v63 = vadd.f32 %v3592_v59, %v9025_v35 }
0x15f6   :  { %v3607_v44 = vadd.f32 %v3589_v11, %v9025_v35  ;;  %v3653_v5 = vsel %vm1045_vm4, %v3628_v2, %v3624_v53 }
0x15f7   :  { %v3636_v55 = vrot.slane %v3608_v63, %v9023_v34 }
0x15f8   :  { %v3632_v54 = vrot.slane %v3607_v44, %v9023_v34  ;;  %v3598_v25 = vpop.xlane.xlu1 %3597 }
0x15f9   :  { %v3595_v47 = vpop.xlane.xlu0 %3594  ;;  %v3610_v30 = vadd.f32 %v3598_v25, %v9025_v35 }
0x15fa   :  { %v3654_v23 = vsel %vm1047_vm5, %v3632_v54, %v3653_v5  ;;  %v3609_v13 = vadd.f32 %v3595_v47, %v9025_v35 }
0x15fb   :  { %v3655_v6 = vsel %vm1049_vm6, %v3636_v55, %v3654_v23  ;;  %v3644_v28 = vrot.slane %v3610_v30, %v9023_v34 }
0x15fc   :  { %v3640_v41 = vrot.slane %v3609_v13, %v9023_v34  ;;  %v3604_v39 = vpop.xlane.xlu1 %3603 }
0x15fd   :  { %v3612_v40 = vadd.f32 %v3604_v39, %v9025_v35  ;;  %v3601_v38 = vpop.xlane.xlu0 %3600 }
0x15fe   :  { %v3656_v37 = vsel %vm1051_vm7, %v3640_v41, %v3655_v6  ;;  %v3611_v46 = vadd.f32 %v3601_v38, %v9025_v35 }
0x15ff   :  { %v3652_v56 = vrot.slane %v3612_v40, %v9023_v34  ;;  %v3657_v12 = vsel %vm1053_vm8, %v3644_v28, %v3656_v37 }
0x1600   :  { %v3648_v49 = vrot.slane %v3611_v46, %v9023_v34 }
0x1602   :  { %v3658_v43 = vsel %vm1055_vm9, %v3648_v49, %v3657_v12 }
0x1603   :  { %v3659_v1 = vsel %vm1057_vm10, %v3652_v56, %v3658_v43 }
0x1604   :  { %v3661_v52 = vsel %vm1060_vm11, %v3659_v1, -inf }
0x1605   :  { %3662 = vmax.xlane.f32.xlu0 %v3661_v52 }
0x1692   :  { %v3663_v58 = vpop.xlane.xlu0 %3662 }
0x1693   :  { %v3668_v45 = vrot.slane %v3663_v58, %v8961_v4  ;;  %v3672_v62 = vrot.slane %v3663_v58, %v9058_v7  ;;  %v3676_v16 = vrot.slane %v3663_v58, %v9064_v9  ;;  %v3684_v10 = vrot.slane %v3663_v58, %v9074_v31 }
0x1694   :  { %v3680_v57 = vrot.slane %v3663_v58, %v9070_v17  ;;  %v3692_v19 = vrot.slane %v3663_v58, %v9082_v51  ;;  %v3688_v11 = vrot.slane %v3663_v58, %v9078_v48  ;;  %v3696_v47 = vrot.slane %v3663_v58, %v9061_v8 }
0x1695   :  { %v3705_v42 = vsub.f32 %v3605_v18, %v3668_v45  ;;  %v3706_v50 = vsub.f32 %v3606_v3, %v3672_v62  ;;  %v3707_v60 = vsub.f32 %v3607_v44, %v3676_v16  ;;  %v3709_v32 = vsub.f32 %v3609_v13, %v3684_v10 }
0x1696   :  { %v3708_v53 = vsub.f32 %v3608_v63, %v3680_v57  ;;  %v3711_v25 = vsub.f32 %v3611_v46, %v3692_v19  ;;  %v3710_v23 = vsub.f32 %v3610_v30, %v3688_v11  ;;  %v3712_v44 = vsub.f32 %v3612_v40, %v3696_v47  ;;  %v7679_v46 = vld [vmem:[%s10715_s0 + $0x18] sm:$0xff] }
0x1697   :  { %v3713_v59 = vmul.f32 1.442695, %v3705_v42  ;;  %v3715_v2 = vmul.f32 1.442695, %v3706_v50  ;;  %v3717_v54 = vmul.f32 1.442695, %v3707_v60  ;;  %v3860_v28 = vrot.slane %v7679_v46, %v8961_v4 }
0x1698   :  { %v3721_v5 = vmul.f32 1.442695, %v3709_v32  ;;  %v3719_v18 = vmul.f32 1.442695, %v3708_v53  ;;  %v3725_v3 = vmul.f32 1.442695, %v3711_v25  ;;  %v3867_v49 = vrot.slane %v7679_v46, %v9058_v7 }
0x1699   :  { %8509 = vpow2.f32 %v3713_v59  ;;  %v3723_v13 = vmul.f32 1.442695, %v3710_v23  ;;  %v3727_v63 = vmul.f32 1.442695, %v3712_v44  ;;  %v3874_v56 = vrot.slane %v7679_v46, %v9064_v9 }
0x169a   :  { %8511 = vpow2.f32 %v3715_v2  ;;  %v3881_v12 = vrot.slane %v7679_v46, %v9070_v17  ;;  %v3888_v43 = vrot.slane %v7679_v46, %v9074_v31  ;;  %v3895_v1 = vrot.slane %v7679_v46, %v9078_v48 }
0x169b   :  { %8513 = vpow2.f32 %v3717_v54  ;;  %v3902_v52 = vrot.slane %v7679_v46, %v9082_v51  ;;  %v3909_v58 = vrot.slane %v7679_v46, %v9061_v8 }
0x169c   :  { %8515 = vpow2.f32 %v3721_v5 }
0x169d   :  { %8517 = vpow2.f32 %v3719_v18 }
0x169e   :  { %8519 = vpow2.f32 %v3725_v3 }
0x169f   :  { %8521 = vpow2.f32 %v3723_v13 }
0x16a0   :  { %8523 = vpow2.f32 %v3727_v63 }
0x16a3   :  { %v9756_v55 = vpop.eup %8509 }
0x16a4   :  { %v9758_v41 = vpop.eup %8511  ;;  %3738 = vperm.xlu1 %8366, %v9756_v55  }
0x16a5   :  { %3741 = vperm.xlu0 %8365, %v9758_v41   ;;  %v9762_v39 = vpop.eup %8513 }
0x16a6   :  { %v9764_v30 = vpop.eup %8515 }
0x16a7   :  { %v9768_v6 = vpop.eup %8517 }
0x16a8   :  { %3744 = vperm.xlu1 %8366, %v9762_v39   ;;  %v9770_v40 = vpop.eup %8519 }
0x16a9   :  { %3750 = vperm.xlu0 %8365, %v9764_v30   ;;  %v9774_v38 = vpop.eup %8521 }
0x16aa   :  { %v9777_v37 = vpop.eup %8523 }
0x16ac   :  { %3747 = vperm.xlu1 %8366, %v9768_v6  }
0x16ad   :  { %3756 = vperm.xlu0 %8365, %v9770_v40  }
0x16b0   :  { %3753 = vperm.xlu1 %8366, %v9774_v38  }
0x16b4   :  { %3759 = vperm.xlu1 %8366, %v9777_v37  }
0x16b8   :  { %3862 = vbcast.lane.b32.xlu1 %v3860_v28, 256 }
0x16bc   :  { %3869 = vbcast.lane.b32.xlu1 %v3867_v49, 256 }
0x16c0   :  { %3876 = vbcast.lane.b32.xlu1 %v3874_v56, 256 }
0x16c4   :  { %3883 = vbcast.lane.b32.xlu1 %v3881_v12, 256 }
0x16c8   :  { %3890 = vbcast.lane.b32.xlu1 %v3888_v43, 256 }
0x16cc   :  { %3897 = vbcast.lane.b32.xlu1 %v3895_v1, 256 }
0x16d0   :  { %3904 = vbcast.lane.b32.xlu1 %v3902_v52, 256 }
0x16d4   :  { %3911 = vbcast.lane.b32.xlu1 %v3909_v58, 256 }
0x1723   :  { %v3739_v45 = vpop.permute.xlu1 %3738 }
0x1724   :  { %v3742_v62 = vpop.permute.xlu0 %3741  ;;  %v3764_v57 = vrot.slane %v3739_v45, %v9023_v34 }
0x1725   :  { %v3768_v10 = vrot.slane %v3742_v62, %v9023_v34 }
0x1727   :  { %v3745_v16 = vpop.permute.xlu1 %3744  ;;  %v3793_v19 = vsel %vm1045_vm4, %v3768_v10, %v3764_v57 }
0x1728   :  { %v3772_v42 = vrot.slane %v3745_v16, %v9023_v34  ;;  %v3751_v50 = vpop.permute.xlu0 %3750 }
0x1729   :  { %v3780_v11 = vrot.slane %v3751_v50, %v9023_v34 }
0x172a   :  { %v3794_v59 = vsel %vm1047_vm5, %v3772_v42, %v3793_v19 }
0x172b   :  { %v3748_v60 = vpop.permute.xlu1 %3747 }
0x172c   :  { %v3776_v32 = vrot.slane %v3748_v60, %v9023_v34  ;;  %v3757_v54 = vpop.permute.xlu0 %3756 }
0x172d   :  { %v3788_v23 = vrot.slane %v3757_v54, %v9023_v34 }
0x172e   :  { %v3795_v2 = vsel %vm1049_vm6, %v3776_v32, %v3794_v59 }
0x172f   :  { %v3754_v53 = vpop.permute.xlu1 %3753  ;;  %v3796_v5 = vsel %vm1051_vm7, %v3780_v11, %v3795_v2 }
0x1730   :  { %v3784_v25 = vrot.slane %v3754_v53, %v9023_v34 }
0x1732   :  { %v3797_v47 = vsel %vm1053_vm8, %v3784_v25, %v3796_v5 }
0x1733   :  { %v3760_v18 = vpop.permute.xlu1 %3759  ;;  %v3798_v44 = vsel %vm1055_vm9, %v3788_v23, %v3797_v47 }
0x1734   :  { %v3792_v3 = vrot.slane %v3760_v18, %v9023_v34 }
0x1736   :  { %v3799_v13 = vsel %vm1057_vm10, %v3792_v3, %v3798_v44 }
0x1737   :  { %v3801_v63 = vsel %vm1060_vm11, %v3799_v13, 0.0  ;;  %v3863_v46 = vpop.permute.xlu1 %3862 }
0x1738   :  { %3802 = vadd.xlane.f32.xlu0 %v3801_v63 }
0x173b   :  { %v3870_v28 = vpop.permute.xlu1 %3869 }
0x173f   :  { %v3877_v49 = vpop.permute.xlu1 %3876 }
0x1743   :  { %v3884_v12 = vpop.permute.xlu1 %3883 }
0x1747   :  { %v3891_v43 = vpop.permute.xlu1 %3890 }
0x174b   :  { %v3898_v16 = vpop.permute.xlu1 %3897 }
0x174f   :  { %v3905_v59 = vpop.permute.xlu1 %3904 }
0x1753   :  { %v3912_v18 = vpop.permute.xlu1 %3911 }
0x17c5   :  { %v3803_v56 = vpop.xlane.xlu0 %3802 }
0x17c6   :  { %8525 = vrcp.f32 %v3803_v56 }
0x17d0   :  { %v8526_v1 = vpop.eup %8525 }
0x17d1   :  { %v3833_v52 = vrot.slane %v8526_v1, %v9082_v51  ;;  %v3809_v58 = vrot.slane %v8526_v1, %v8961_v4  ;;  %v3813_v45 = vrot.slane %v8526_v1, %v9058_v7  ;;  %v3817_v62 = vrot.slane %v8526_v1, %v9064_v9 }
0x17d2   :  { %v3821_v42 = vrot.slane %v8526_v1, %v9070_v17  ;;  %v3825_v2 = vrot.slane %v8526_v1, %v9074_v31  ;;  %v3837_v5 = vrot.slane %v8526_v1, %v9061_v8 }
0x17d3   :  { %v3846_v10 = vmul.f32 %v9756_v55, %v3809_v58  ;;  %v3847_v57 = vmul.f32 %v9758_v41, %v3813_v45  ;;  %v3852_v50 = vmul.f32 %v9770_v40, %v3833_v52  ;;  %v3848_v32 = vmul.f32 %v9762_v39, %v3817_v62 }
0x17d4   :  { %v3849_v54 = vmul.f32 %v9768_v6, %v3821_v42  ;;  %v3850_v55 = vmul.f32 %v9764_v30, %v3825_v2  ;;  %v3829_v41 = vrot.slane %v8526_v1, %v9078_v48  ;;  %v3853_v23 = vmul.f32 %v9777_v37, %v3837_v5 }
0x17d5   :  { %v3921_v60 = vmul.f32 %v3863_v46, %v3846_v10  ;;  %v3922_v19 = vmul.f32 %v3870_v28, %v3847_v57  ;;  %v3927_v11 = vmul.f32 %v3905_v59, %v3852_v50  ;;  %v3923_v53 = vmul.f32 %v3877_v49, %v3848_v32 }
0x17d6   :  { %v3924_v40 = vmul.f32 %v3884_v12, %v3849_v54  ;;  %v3925_v25 = vmul.f32 %v3891_v43, %v3850_v55  ;;  %v3851_v39 = vmul.f32 %v9774_v38, %v3829_v41  ;;  %v3928_v6 = vmul.f32 %v3912_v18, %v3853_v23 }
0x17d7   :  { %4008 = vperm.xlu0 %8365, %v3921_v60   ;;  %4011 = vperm.xlu1 %8366, %v3922_v19  }
0x17d8   :  { %v3926_v47 = vmul.f32 %v3898_v16, %v3851_v39 }
0x17db   :  { %4014 = vperm.xlu1 %8366, %v3923_v53   ;;  %4026 = vperm.xlu0 %8365, %v3927_v11  }
0x17df   :  { %4017 = vperm.xlu1 %8366, %v3924_v40  }
0x17e3   :  { %4020 = vperm.xlu1 %8366, %v3925_v25  }
0x17e7   :  { %4023 = vperm.xlu1 %8366, %v3926_v47  }
0x17eb   :  { %4029 = vperm.xlu1 %8366, %v3928_v6  }
0x17ef   :  { %4150 = vrot.lane.b32.xlu1 %v9650_v24, %s8744_s13 }
0x1856   :  { %v4012_v30 = vpop.permute.xlu1 %4011  ;;  %v4009_v44 = vpop.permute.xlu0 %4008 }
0x1857   :  { %v4034_v63 = vrot.slane %v4009_v44, %v9023_v34  ;;  %v4038_v38 = vrot.slane %v4012_v30, %v9023_v34 }
0x1859   :  { %v4063_v56 = vsel %vm1045_vm4, %v4038_v38, %v4034_v63 }
0x185a   :  { %v4015_v3 = vpop.permute.xlu1 %4014  ;;  %v4027_v43 = vpop.permute.xlu0 %4026 }
0x185b   :  { %v4042_v46 = vrot.slane %v4015_v3, %v9023_v34  ;;  %v4058_v62 = vrot.slane %v4027_v43, %v9023_v34 }
0x185d   :  { %v4064_v12 = vsel %vm1047_vm5, %v4042_v46, %v4063_v56 }
0x185e   :  { %v4018_v13 = vpop.permute.xlu1 %4017 }
0x185f   :  { %v4046_v37 = vrot.slane %v4018_v13, %v9023_v34 }
0x1861   :  { %v4065_v1 = vsel %vm1049_vm6, %v4046_v37, %v4064_v12 }
0x1862   :  { %v4021_v28 = vpop.permute.xlu1 %4020 }
0x1863   :  { %v4050_v49 = vrot.slane %v4021_v28, %v9023_v34  ;;  %v9888_v28 = vld [vmem:[%s10713_s4] ss:$0 sm:$0xff] }
0x1865   :  { %v4066_v58 = vsel %vm1051_vm7, %v4050_v49, %v4065_v1 }
0x1866   :  { %v4024_v24 = vpop.permute.xlu1 %4023 }
0x1867   :  { %v4054_v52 = vrot.slane %v4024_v24, %v9023_v34 }
0x1869   :  { %v4067_v45 = vsel %vm1053_vm8, %v4054_v52, %v4066_v58 }
0x186a   :  { %v4030_v16 = vpop.permute.xlu1 %4029  ;;  %v4068_v57 = vsel %vm1055_vm9, %v4058_v62, %v4067_v45 }
0x186b   :  { %v4062_v10 = vrot.slane %v4030_v16, %v9023_v34 }
0x186d   :  { %v4069_v42 = vsel %vm1057_vm10, %v4062_v10, %v4068_v57 }
0x186e   :  { %8059 = vmatmul.mubr.msk.f32.vlgmr.msra.gmra.mrb[22].mxu0 %vm1060_vm11, %v4069_v42  ;;  %v4151_v40 = vpop.permute.xlu1 %4150 }
0x186f   :  { %8287 = vmatpush3.bf16.msra.mxu0 %v8881_v14  ;;  %8069 = vmatprep.mubr.msk.f32.mxu0 %vm8740_vm2, %v8739_v0 }
0x1870   :  { %8288 = vmatprep.subr.bf16.mxu0 %v8741_v20 }
0x1873   :  { %8290 = vmatpush3.bf16.msra.mxu0 %v8907_v21 }
0x1874   :  { %8297 = vmatprep.subr.bf16.mxu0 %v8741_v20 }
0x1941   :  { %v4138_v50 = vpop.f32.mrb[22].mxu0 }
0x1942   :  { %v4139_v60 = vadd.f32 %v4138_v50, %v9683_v33  ;;  %v8060_v19 = vpop.f32.mrb[23].mxu0 }
0x1943   :  { %v9901_v19 = vld [vmem:[#allocation4] sm:$0xf] }
0x1944   :  { %v4142_v32 = vadd.f32 %v9641_v36, %v4139_v60 }
0x1946   :  { %8527 = vtanh.f32 %v4142_v32  ;;  %v7683_v2 = vmul.f32 -1.442695, %v4142_v32 }
0x1948   :  { %8529 = vpow2.f32 %v7683_v2 }
0x1950   :  { %v8528_v59 = vpop.eup %8527 }
0x1951   :  { %4155 = vrot.lane.b32.xlu0 %v8528_v59, %s8745_s14 }
0x1952   :  { %v8530_v11 = vpop.eup %8529 }
0x1953   :  { %v4146_v53 = vadd.f32 1.0, %v8530_v11 }
0x1955   :  { %8531 = vrcp.f32 %v4146_v53 }
0x195f   :  { %v8532_v54 = vpop.eup %8531 }
0x1960   :  { %v4153_v25 = vmul.f32 %v8532_v54, %v4151_v40 }
0x19c3   :  { %v4156_v55 = vpop.permute.xlu0 %4155 }
0x19c4   :  { %v4158_v41 = vmul.f32 %v8532_v54, %v4156_v55 }
0x19c6   :  { %4160 = vrot.lane.b32.xlu0 %v4158_v41, %s8744_s13  ;;  %v9910_v41 = vld [vmem:[#allocation4 + $0x8] sm:$0xf] }
0x1a38   :  { %v4161_v33 = vpop.permute.xlu0 %4160 }
0x1a39   :  { %v4163_v39 = vadd.f32 %v4161_v33, %v4153_v25  ;;  %v9913_v25 = vld [vmem:[#allocation4 + $0x10] sm:$0xf] }
0x1a3b   :  { %8533 = vtanh.f32 %v4163_v39 }
0x1a45   :  { %v8534_v36 = vpop.eup %8533 }
0x1a46   :  { %4166 = vrot.lane.b32.xlu1 %v8534_v36, %s8745_s14 }
0x1a4a   :  { %4176 = vrot.lane.b32.xlu1 %v4163_v39, %s8746_s15  ;;  %v9916_v39 = vld [vmem:[#allocation4 + $0xc] sm:$0xf] }
0x1ab8   :  { %v4167_v5 = vpop.permute.xlu1 %4166 }
0x1ab9   :  { %v4169_v47 = vmul.f32 %v8532_v54, %v4167_v5  ;;  %v9907_v54 = vld [vmem:[#allocation4 + $0x4] sm:$0xf]  ;;  %v9919_v5 = vld [vmem:[#allocation4 + $0x18] sm:$0xf] }
0x1abb   :  { %4171 = vrot.lane.b32.xlu0 %v4169_v47, %s8744_s13 }
0x1abc   :  { %v4177_v23 = vpop.permute.xlu1 %4176 }
0x1abd   :  { %4179 = vst.msk [vmem:[#allocation3] sm:$0xff] %vm47_vm1, %v4177_v23 }
0x1ac4   :  { %v9855_v18 = vld [vmem:[#allocation3] sm:$0xff] }
0x1ac5   :  { %8070 = vmatmul.mubr.msk.f32.vlgmr.msra.gmra.mrb[24].mxu0 %vm47_vm1, %v9855_v18 }
0x1ac6   :  { %8299 = vmatpush3.bf16.msra.mxu0 %v9157_v26  ;;  %8091 = vmatprep.mubr.msk.f32.mxu0 %vm8740_vm2, %v8739_v0 }
0x1ac7   :  { %8300 = vmatprep.subr.bf16.mxu0 %v8741_v20 }
0x1aca   :  { %8302 = vmatpush3.bf16.msra.mxu0 %v9166_v27 }
0x1acb   :  { %8309 = vmatprep.subr.bf16.mxu0 %v8741_v20 }
0x1b2d   :  { %v4172_v6 = vpop.permute.xlu0 %4171 }
0x1b2e   :  { %4174 = vst.msk [vmem:[#allocation2] sm:$0xff] %vm47_vm1, %v4172_v6  ;;  %7684 = vst.msk [vmem:[%s10719_s12 + $0x18] sm:$0xff] %vm47_vm1, %v4172_v6  ;;  %v9923_v6 = vld [vmem:[#allocation4 + $0x14] sm:$0xf] }
0x1b35   :  { %v4182_v30 = vld [vmem:[#allocation2] sm:$0xff] }
0x1b36   :  { %8081 = vmatmul.mubr.msk.f32.vlgmr.msra.gmra.mrb[24].mxu1 %vm47_vm1, %v4182_v30  ;;  %8092 = vmatmul.mubr.msk.f32.vlgmr.msra.gmra.mrb[26].mxu0 %vm47_vm1, %v4182_v30 }
0x1b37   :  { %8095 = vmatpush3.msk.msra.mxu1 %vm1471_vm12, %v9670_v29  ;;  %8096 = vmatprep.mubr.msk.f32.mxu1 %vm8740_vm2, %v8739_v0 }
0x1b38   :  { %8303 = vmatprep.subr.bf16.mxu1 %v8741_v20  ;;  %8311 = vmatpush3.bf16.msra.mxu0 %v8883_v15 }
0x1b39   :  { %8312 = vmatprep.subr.bf16.mxu0 %v8741_v20  ;;  %8118 = vmatprep.mubr.msk.f32.mxu0 %vm8740_vm2, %v8739_v0 }
0x1b3c   :  { %8314 = vmatpush3.bf16.msra.mxu0 %v8909_v22 }
0x1b3d   :  { %8132 = vmatprep.subr.mxu0 %v8739_v0 }
0x1b98   :  { %v4253_v3 = vpop.f32.mrb[24].mxu0 }
0x1b99   :  { %v8071_v44 = vpop.f32.mrb[25].mxu0 }
0x1c09   :  { %v4326_v13 = vpop.f32.mrb[24].mxu1  ;;  %v9883_v29 = vpop.f32.mrb[26].mxu0 }
0x1c0a   :  { %v4327_v63 = vadd.f32 %v4326_v13, %v4253_v3  ;;  %v8082_v38 = vpop.f32.mrb[25].mxu1  ;;  %v8093_v46 = vpop.f32.mrb[27].mxu0  ;;  %v9926_v3 = vld [vmem:[#allocation4 + $0x1c] sm:$0xf] }
0x1c0c   :  { %v4330_v37 = vadd.f32 %v9888_v28, %v4327_v63  ;;  %v9932_v63 = vld [vmem:[%s10714_s7] ss:$0 sm:$0xff] }
0x1c0e   :  { %v4332_v49 = vcombine.high %v4330_v37, %v4330_v37  ;;  %v4339_v56 = vrot.slane %v4330_v37, %v8956_v61 }
0x1c10   :  { %v4346_v12 = vrot.slane %v4332_v49, %v8956_v61  ;;  %v4347_v24 = vcombine.high %v4339_v56, %v4339_v56  ;;  %v4355_v43 = vrot.slane %v4339_v56, %v8956_v61 }
0x1c12   :  { %v4348_v1 = vcombine.high %v4346_v12, %v4346_v12  ;;  %v4362_v52 = vrot.slane %v4346_v12, %v8956_v61  ;;  %v4369_v58 = vrot.slane %v4347_v24, %v8956_v61  ;;  %v4377_v45 = vcombine.high %v4355_v43, %v4355_v43 }
0x1c13   :  { %v4384_v62 = vrot.slane %v4355_v43, %v8961_v4 }
0x1c14   :  { %v4376_v16 = vrot.slane %v4348_v1, %v8956_v61  ;;  %v4378_v10 = vcombine.high %v4362_v52, %v4362_v52  ;;  %v4379_v57 = vcombine.high %v4369_v58, %v4369_v58  ;;  %v4388_v42 = vrot.slane %v4369_v58, %v8961_v4 }
0x1c15   :  { %v4392_v50 = vrot.slane %v4377_v45, %v8961_v4  ;;  %v4400_v60 = vrot.slane %v4362_v52, %v8961_v4  ;;  %v4421_v32 = vadd.f32 %v9901_v19, %v4384_v62 }
0x1c16   :  { %v4380_v59 = vcombine.high %v4376_v16, %v4376_v16  ;;  %v4396_v2 = vrot.slane %v4379_v57, %v8961_v4  ;;  %v4404_v11 = vrot.slane %v4376_v16, %v8961_v4  ;;  %v4408_v53 = vrot.slane %v4378_v10, %v8961_v4 }
0x1c17   :  { %v4422_v55 = vadd.f32 %v9907_v54, %v4388_v42  ;;  %v4423_v40 = vadd.f32 %v9910_v41, %v4392_v50  ;;  %v4425_v33 = vadd.f32 %v9913_v25, %v4400_v60  ;;  %8535 = vtanh.f32 %v4421_v32 }
0x1c18   :  { %v4424_v36 = vadd.f32 %v9916_v39, %v4396_v2  ;;  %v4427_v47 = vadd.f32 %v9919_v5, %v4408_v53  ;;  %v4412_v23 = vrot.slane %v4380_v59, %v8961_v4  ;;  %v4426_v30 = vadd.f32 %v9923_v6, %v4404_v11 }
0x1c19   :  { %8537 = vtanh.f32 %v4422_v55 }
0x1c1a   :  { %8539 = vtanh.f32 %v4423_v40  ;;  %v4428_v44 = vadd.f32 %v9926_v3, %v4412_v23 }
0x1c1b   :  { %8541 = vtanh.f32 %v4425_v33 }
0x1c1c   :  { %8543 = vtanh.f32 %v4424_v36 }
0x1c1d   :  { %8545 = vtanh.f32 %v4427_v47 }
0x1c1e   :  { %8547 = vtanh.f32 %v4426_v30 }
0x1c1f   :  { %8549 = vtanh.f32 %v4428_v44 }
0x1c21   :  { %v8536_v13 = vpop.eup %8535 }
0x1c22   :  { %v4437_v38 = vmul.f32 %v9932_v63, %v8536_v13 }
0x1c23   :  { %v8538_v46 = vpop.eup %8537 }
0x1c24   :  { %v8540_v37 = vpop.eup %8539  ;;  %v4445_v49 = vsel %vm651_vm3, %v4437_v38, 0.0  ;;  %v4438_v56 = vmul.f32 %v9932_v63, %v8538_v46 }
0x1c25   :  { %v8542_v12 = vpop.eup %8541  ;;  %4446 = vadd.xlane.f32.xlu0 %v4445_v49  ;;  %v4439_v24 = vmul.f32 %v9932_v63, %v8540_v37 }
0x1c26   :  { %v8544_v43 = vpop.eup %8543  ;;  %v4448_v1 = vsel %vm651_vm3, %v4438_v56, 0.0  ;;  %v4441_v52 = vmul.f32 %v9932_v63, %v8542_v12 }
0x1c27   :  { %v8546_v58 = vpop.eup %8545  ;;  %4449 = vadd.xlane.f32.xlu1 %v4448_v1  ;;  %v4451_v45 = vsel %vm651_vm3, %v4439_v24, 0.0  ;;  %v4440_v62 = vmul.f32 %v9932_v63, %v8544_v43 }
0x1c28   :  { %v8548_v16 = vpop.eup %8547  ;;  %v4457_v10 = vsel %vm651_vm3, %v4441_v52, 0.0  ;;  %v4443_v57 = vmul.f32 %v9932_v63, %v8546_v58 }
0x1c29   :  { %4452 = vadd.xlane.f32.xlu0 %v4451_v45  ;;  %v4454_v42 = vsel %vm651_vm3, %v4440_v62, 0.0  ;;  %v4442_v50 = vmul.f32 %v9932_v63, %v8548_v16  ;;  %v8550_v60 = vpop.eup %8549 }
0x1c2a   :  { %v4463_v32 = vsel %vm651_vm3, %v4443_v57, 0.0  ;;  %v4444_v2 = vmul.f32 %v9932_v63, %v8550_v60 }
0x1c2b   :  { %4458 = vadd.xlane.f32.xlu1 %v4457_v10  ;;  %v4460_v59 = vsel %vm651_vm3, %v4442_v50, 0.0 }
0x1c2c   :  { %v4466_v11 = vsel %vm651_vm3, %v4444_v2, 0.0 }
0x1c2d   :  { %4455 = vadd.xlane.f32.xlu0 %v4454_v42 }
0x1c2f   :  { %4464 = vadd.xlane.f32.xlu1 %v4463_v32 }
0x1c31   :  { %4461 = vadd.xlane.f32.xlu0 %v4460_v59 }
0x1c35   :  { %4467 = vadd.xlane.f32.xlu0 %v4466_v11 }
0x1cb2   :  { %v4447_v53 = vpop.xlane.xlu0 %4446 }
0x1cb3   :  { %v4469_v40 = vadd.f32 %v4447_v53, %v9025_v35 }
0x1cb4   :  { %v4450_v55 = vpop.xlane.xlu1 %4449 }
0x1cb5   :  { %v4470_v33 = vadd.f32 %v4450_v55, %v9025_v35  ;;  %v4488_v44 = vrot.slane %v4469_v40, %v9023_v34 }
0x1cb6   :  { %v4453_v36 = vpop.xlane.xlu0 %4452 }
0x1cb7   :  { %v4492_v47 = vrot.slane %v4470_v33, %v9023_v34  ;;  %v4471_v23 = vadd.f32 %v4453_v36, %v9025_v35 }
0x1cb8   :  { %v4459_v30 = vpop.xlane.xlu1 %4458 }
0x1cb9   :  { %v4496_v13 = vrot.slane %v4471_v23, %v9023_v34  ;;  %v4517_v46 = vsel %vm1045_vm4, %v4492_v47, %v4488_v44  ;;  %v4473_v49 = vadd.f32 %v4459_v30, %v9025_v35 }
0x1cba   :  { %v4456_v38 = vpop.xlane.xlu0 %4455 }
0x1cbb   :  { %v4472_v37 = vadd.f32 %v4456_v38, %v9025_v35  ;;  %v4518_v24 = vsel %vm1047_vm5, %v4496_v13, %v4517_v46  ;;  %v4504_v58 = vrot.slane %v4473_v49, %v9023_v34 }
0x1cbc   :  { %v4465_v12 = vpop.xlane.xlu1 %4464 }
0x1cbd   :  { %v4500_v56 = vrot.slane %v4472_v37, %v9023_v34  ;;  %v4475_v45 = vadd.f32 %v4465_v12, %v9025_v35 }
0x1cbe   :  { %v4462_v43 = vpop.xlane.xlu0 %4461 }
0x1cbf   :  { %v4519_v1 = vsel %vm1049_vm6, %v4500_v56, %v4518_v24  ;;  %v4474_v52 = vadd.f32 %v4462_v43, %v9025_v35  ;;  %v4512_v50 = vrot.slane %v4475_v45, %v9023_v34 }
0x1cc0   :  { %v4520_v10 = vsel %vm1051_vm7, %v4504_v58, %v4519_v1 }
0x1cc1   :  { %v4508_v62 = vrot.slane %v4474_v52, %v9023_v34 }
0x1cc2   :  { %v4468_v16 = vpop.xlane.xlu0 %4467 }
0x1cc3   :  { %v4476_v57 = vadd.f32 %v4468_v16, %v9025_v35  ;;  %v4521_v42 = vsel %vm1053_vm8, %v4508_v62, %v4520_v10 }
0x1cc4   :  { %v4522_v32 = vsel %vm1055_vm9, %v4512_v50, %v4521_v42 }
0x1cc5   :  { %v4516_v60 = vrot.slane %v4476_v57, %v9023_v34 }
0x1cc7   :  { %v4523_v59 = vsel %vm1057_vm10, %v4516_v60, %v4522_v32 }
0x1cc8   :  { %v4525_v2 = vsel %vm1060_vm11, %v4523_v59, -inf }
0x1cc9   :  { %4526 = vmax.xlane.f32.xlu1 %v4525_v2 }
0x1d56   :  { %v4527_v11 = vpop.xlane.xlu1 %4526 }
0x1d57   :  { %v4532_v53 = vrot.slane %v4527_v11, %v8961_v4  ;;  %v4536_v55 = vrot.slane %v4527_v11, %v9058_v7  ;;  %v4540_v36 = vrot.slane %v4527_v11, %v9064_v9  ;;  %v4544_v47 = vrot.slane %v4527_v11, %v9070_v17 }
0x1d58   :  { %v4552_v30 = vrot.slane %v4527_v11, %v9078_v48  ;;  %v4548_v46 = vrot.slane %v4527_v11, %v9074_v31  ;;  %v4560_v43 = vrot.slane %v4527_v11, %v9061_v8  ;;  %v4556_v62 = vrot.slane %v4527_v11, %v9082_v51  ;;  %v7687_v11 = vld [vmem:[%s10715_s0 + $0x20] sm:$0xff] }
0x1d59   :  { %v4569_v44 = vsub.f32 %v4469_v40, %v4532_v53  ;;  %v4570_v13 = vsub.f32 %v4470_v33, %v4536_v55  ;;  %v4572_v38 = vsub.f32 %v4472_v37, %v4544_v47  ;;  %v4571_v56 = vsub.f32 %v4471_v23, %v4540_v36 }
0x1d5a   :  { %v4574_v1 = vsub.f32 %v4474_v52, %v4552_v30  ;;  %v4573_v16 = vsub.f32 %v4473_v49, %v4548_v46  ;;  %v4576_v42 = vsub.f32 %v4476_v57, %v4560_v43  ;;  %v4575_v33 = vsub.f32 %v4475_v45, %v4556_v62 }
0x1d5b   :  { %v4577_v12 = vmul.f32 1.442695, %v4569_v44  ;;  %v4579_v24 = vmul.f32 1.442695, %v4570_v13  ;;  %v4583_v58 = vmul.f32 1.442695, %v4572_v38  ;;  %v4724_v53 = vrot.slane %v7687_v11, %v8961_v4 }
0x1d5c   :  { %v4581_v10 = vmul.f32 1.442695, %v4571_v56  ;;  %v4587_v40 = vmul.f32 1.442695, %v4574_v1  ;;  %v4585_v37 = vmul.f32 1.442695, %v4573_v16  ;;  %v4731_v55 = vrot.slane %v7687_v11, %v9058_v7 }
0x1d5d   :  { %8551 = vpow2.f32 %v4577_v12  ;;  %v4591_v23 = vmul.f32 1.442695, %v4576_v42  ;;  %v4589_v50 = vmul.f32 1.442695, %v4575_v33  ;;  %v4738_v36 = vrot.slane %v7687_v11, %v9064_v9 }
0x1d5e   :  { %8553 = vpow2.f32 %v4579_v24  ;;  %v4745_v47 = vrot.slane %v7687_v11, %v9070_v17  ;;  %v4752_v30 = vrot.slane %v7687_v11, %v9074_v31  ;;  %v4759_v44 = vrot.slane %v7687_v11, %v9078_v48 }
0x1d5f   :  { %8555 = vpow2.f32 %v4583_v58  ;;  %v4766_v13 = vrot.slane %v7687_v11, %v9082_v51  ;;  %v4773_v38 = vrot.slane %v7687_v11, %v9061_v8 }
0x1d60   :  { %8557 = vpow2.f32 %v4581_v10 }
0x1d61   :  { %8559 = vpow2.f32 %v4587_v40 }
0x1d62   :  { %8561 = vpow2.f32 %v4585_v37 }
0x1d63   :  { %8563 = vpow2.f32 %v4591_v23 }
0x1d64   :  { %8565 = vpow2.f32 %v4589_v50 }
0x1d67   :  { %v9982_v60 = vpop.eup %8551 }
0x1d68   :  { %v9984_v52 = vpop.eup %8553  ;;  %4602 = vperm.xlu0 %8365, %v9982_v60  }
0x1d69   :  { %4605 = vperm.xlu1 %8366, %v9984_v52   ;;  %v9988_v49 = vpop.eup %8555 }
0x1d6a   :  { %v9990_v57 = vpop.eup %8557 }
0x1d6b   :  { %v9994_v45 = vpop.eup %8559 }
0x1d6c   :  { %4611 = vperm.xlu0 %8365, %v9988_v49   ;;  %v9996_v32 = vpop.eup %8561 }
0x1d6d   :  { %4608 = vperm.xlu1 %8366, %v9990_v57   ;;  %v10000_v59 = vpop.eup %8563 }
0x1d6e   :  { %v8566_v2 = vpop.eup %8565 }
0x1d70   :  { %4617 = vperm.xlu0 %8365, %v9994_v45  }
0x1d71   :  { %4614 = vperm.xlu1 %8366, %v9996_v32  }
0x1d74   :  { %4623 = vperm.xlu0 %8365, %v10000_v59  }
0x1d75   :  { %4620 = vperm.xlu1 %8366, %v8566_v2  }
0x1d78   :  { %4726 = vbcast.lane.b32.xlu0 %v4724_v53, 256 }
0x1d7c   :  { %4733 = vbcast.lane.b32.xlu0 %v4731_v55, 256 }
0x1d80   :  { %4740 = vbcast.lane.b32.xlu0 %v4738_v36, 256 }
0x1d84   :  { %4747 = vbcast.lane.b32.xlu0 %v4745_v47, 256 }
0x1d88   :  { %4754 = vbcast.lane.b32.xlu0 %v4752_v30, 256 }
0x1d8c   :  { %4761 = vbcast.lane.b32.xlu0 %v4759_v44, 256 }
0x1d90   :  { %4768 = vbcast.lane.b32.xlu0 %v4766_v13, 256 }
0x1d94   :  { %4775 = vbcast.lane.b32.xlu0 %v4773_v38, 256 }
0x1de7   :  { %v4603_v46 = vpop.permute.xlu0 %4602 }
0x1de8   :  { %v4606_v56 = vpop.permute.xlu1 %4605  ;;  %v4628_v24 = vrot.slane %v4603_v46, %v9023_v34 }
0x1de9   :  { %v4632_v12 = vrot.slane %v4606_v56, %v9023_v34 }
0x1deb   :  { %v4612_v43 = vpop.permute.xlu0 %4611  ;;  %v4657_v62 = vsel %vm1045_vm4, %v4632_v12, %v4628_v24 }
0x1dec   :  { %v4609_v1 = vpop.permute.xlu1 %4608  ;;  %v4640_v16 = vrot.slane %v4612_v43, %v9023_v34 }
0x1ded   :  { %v4636_v58 = vrot.slane %v4609_v1, %v9023_v34 }
0x1def   :  { %v4658_v10 = vsel %vm1047_vm5, %v4636_v58, %v4657_v62  ;;  %v4618_v42 = vpop.permute.xlu0 %4617 }
0x1df0   :  { %v4615_v40 = vpop.permute.xlu1 %4614  ;;  %v4659_v37 = vsel %vm1049_vm6, %v4640_v16, %v4658_v10  ;;  %v4648_v23 = vrot.slane %v4618_v42, %v9023_v34 }
0x1df1   :  { %v4644_v33 = vrot.slane %v4615_v40, %v9023_v34 }
0x1df3   :  { %v4660_v50 = vsel %vm1051_vm7, %v4644_v33, %v4659_v37  ;;  %v4624_v11 = vpop.permute.xlu0 %4623 }
0x1df4   :  { %v4621_v53 = vpop.permute.xlu1 %4620  ;;  %v4656_v55 = vrot.slane %v4624_v11, %v9023_v34  ;;  %v4661_v47 = vsel %vm1053_vm8, %v4648_v23, %v4660_v50 }
0x1df5   :  { %v4652_v36 = vrot.slane %v4621_v53, %v9023_v34 }
0x1df7   :  { %v4662_v30 = vsel %vm1055_vm9, %v4652_v36, %v4661_v47  ;;  %v4727_v38 = vpop.permute.xlu0 %4726 }
0x1df8   :  { %v4663_v44 = vsel %vm1057_vm10, %v4656_v55, %v4662_v30 }
0x1df9   :  { %v4665_v13 = vsel %vm1060_vm11, %v4663_v44, 0.0 }
0x1dfa   :  { %4666 = vadd.xlane.f32.xlu1 %v4665_v13 }
0x1dfb   :  { %v4734_v46 = vpop.permute.xlu0 %4733 }
0x1dff   :  { %v4741_v56 = vpop.permute.xlu0 %4740 }
0x1e03   :  { %v4748_v24 = vpop.permute.xlu0 %4747 }
0x1e07   :  { %v4755_v43 = vpop.permute.xlu0 %4754 }
0x1e0b   :  { %v4762_v42 = vpop.permute.xlu0 %4761 }
0x1e0f   :  { %v4769_v55 = vpop.permute.xlu0 %4768 }
0x1e87   :  { %v4667_v12 = vpop.xlane.xlu1 %4666 }
0x1e88   :  { %8567 = vrcp.f32 %v4667_v12 }
0x1e92   :  { %v8568_v1 = vpop.eup %8567 }
0x1e93   :  { %v4697_v58 = vrot.slane %v8568_v1, %v9082_v51  ;;  %v4673_v62 = vrot.slane %v8568_v1, %v8961_v4  ;;  %v4677_v16 = vrot.slane %v8568_v1, %v9058_v7  ;;  %v4681_v10 = vrot.slane %v8568_v1, %v9064_v9 }
0x1e94   :  { %v4685_v37 = vrot.slane %v8568_v1, %v9070_v17  ;;  %v4689_v36 = vrot.slane %v8568_v1, %v9074_v31 }
0x1e95   :  { %v4710_v40 = vmul.f32 %v9982_v60, %v4673_v62  ;;  %v4711_v33 = vmul.f32 %v9984_v52, %v4677_v16  ;;  %v4716_v23 = vmul.f32 %v8566_v2, %v4697_v58  ;;  %v4712_v53 = vmul.f32 %v9990_v57, %v4681_v10 }
0x1e96   :  { %v4713_v44 = vmul.f32 %v9988_v49, %v4685_v37  ;;  %v4714_v60 = vmul.f32 %v9996_v32, %v4689_v36  ;;  %v4693_v52 = vrot.slane %v8568_v1, %v9078_v48 }
0x1e97   :  { %v4785_v50 = vmul.f32 %v4727_v38, %v4710_v40  ;;  %v4786_v11 = vmul.f32 %v4734_v46, %v4711_v33  ;;  %v4791_v47 = vmul.f32 %v4769_v55, %v4716_v23  ;;  %v4787_v30 = vmul.f32 %v4741_v56, %v4712_v53  ;;  %v4776_v56 = vpop.permute.xlu0 %4775 }
0x1e98   :  { %v4788_v2 = vmul.f32 %v4748_v24, %v4713_v44  ;;  %v4789_v13 = vmul.f32 %v4755_v43, %v4714_v60  ;;  %v4715_v57 = vmul.f32 %v9994_v45, %v4693_v52  ;;  %v4701_v38 = vrot.slane %v8568_v1, %v9061_v8 }
0x1e99   :  { %4872 = vperm.xlu0 %8365, %v4785_v50   ;;  %4875 = vperm.xlu1 %8366, %v4786_v11  }
0x1e9a   :  { %v4790_v46 = vmul.f32 %v4762_v42, %v4715_v57  ;;  %v4717_v12 = vmul.f32 %v10000_v59, %v4701_v38 }
0x1e9c   :  { %v4792_v49 = vmul.f32 %v4776_v56, %v4717_v12 }
0x1e9d   :  { %4878 = vperm.xlu0 %8365, %v4787_v30   ;;  %4890 = vperm.xlu1 %8366, %v4791_v47  }
0x1ea1   :  { %4881 = vperm.xlu0 %8365, %v4788_v2   ;;  %v10073_v2 = vld [vmem:[%s10718_s11] ss:$0 sm:$0xff] }
0x1ea5   :  { %4884 = vperm.xlu0 %8365, %v4789_v13  }
0x1ea9   :  { %4887 = vperm.xlu0 %8365, %v4790_v46  }
0x1ead   :  { %4893 = vperm.xlu0 %8365, %v4792_v49  }
0x1eb1   :  { %5014 = vrot.lane.b32.xlu0 %v9855_v18, %s8744_s13 }
0x1f18   :  { %v4873_v32 = vpop.permute.xlu0 %4872  ;;  %v4876_v24 = vpop.permute.xlu1 %4875 }
0x1f19   :  { %v4902_v43 = vrot.slane %v4876_v24, %v9023_v34  ;;  %v4898_v45 = vrot.slane %v4873_v32, %v9023_v34 }
0x1f1b   :  { %v4927_v42 = vsel %vm1045_vm4, %v4902_v43, %v4898_v45 }
0x1f1c   :  { %v4879_v58 = vpop.permute.xlu0 %4878  ;;  %v4891_v33 = vpop.permute.xlu1 %4890 }
0x1f1d   :  { %v4906_v1 = vrot.slane %v4879_v58, %v9023_v34  ;;  %v4922_v53 = vrot.slane %v4891_v33, %v9023_v34 }
0x1f1f   :  { %v4928_v40 = vsel %vm1047_vm5, %v4906_v1, %v4927_v42 }
0x1f20   :  { %v4882_v62 = vpop.permute.xlu0 %4881 }
0x1f21   :  { %v4910_v59 = vrot.slane %v4882_v62, %v9023_v34 }
0x1f23   :  { %v4929_v37 = vsel %vm1049_vm6, %v4910_v59, %v4928_v40  ;;  %v10102_v40 = vld [vmem:[%s10717_s9] sm:$0xf] }
0x1f24   :  { %v4885_v16 = vpop.permute.xlu0 %4884 }
0x1f25   :  { %v4914_v10 = vrot.slane %v4885_v16, %v9023_v34 }
0x1f27   :  { %v4930_v50 = vsel %vm1051_vm7, %v4914_v10, %v4929_v37 }
0x1f28   :  { %v4888_v18 = vpop.permute.xlu0 %4887 }
0x1f29   :  { %v4918_v23 = vrot.slane %v4888_v18, %v9023_v34 }
0x1f2b   :  { %v4931_v11 = vsel %vm1053_vm8, %v4918_v23, %v4930_v50 }
0x1f2c   :  { %v4894_v55 = vpop.permute.xlu0 %4893  ;;  %v4932_v47 = vsel %vm1055_vm9, %v4922_v53, %v4931_v11 }
0x1f2d   :  { %v4926_v36 = vrot.slane %v4894_v55, %v9023_v34 }
0x1f2f   :  { %v4933_v30 = vsel %vm1057_vm10, %v4926_v36, %v4932_v47 }
0x1f30   :  { %8097 = vmatmul.mubr.msk.f32.vlgmr.msra.gmra.mrb[26].mxu1 %vm1060_vm11, %v4933_v30  ;;  %v5015_v32 = vpop.permute.xlu0 %5014 }
0x1f31   :  { %8305 = vmatpush3.bf16.msra.mxu1 %v8881_v14  ;;  %8107 = vmatprep.mubr.msk.f32.mxu1 %vm8740_vm2, %v8739_v0 }
0x1f32   :  { %8306 = vmatprep.subr.bf16.mxu1 %v8741_v20 }
0x1f35   :  { %8308 = vmatpush3.bf16.msra.mxu1 %v8907_v21 }
0x1f36   :  { %8315 = vmatprep.subr.bf16.mxu1 %v8741_v20 }
0x2003   :  { %v5002_v44 = vpop.f32.mrb[26].mxu1 }
0x2004   :  { %v5003_v60 = vadd.f32 %v5002_v44, %v9883_v29  ;;  %v8098_v52 = vpop.f32.mrb[27].mxu1 }
0x2006   :  { %v5006_v13 = vadd.f32 %v10073_v2, %v5003_v60 }
0x2008   :  { %8569 = vtanh.f32 %v5006_v13  ;;  %v7691_v38 = vmul.f32 -1.442695, %v5006_v13 }
0x200a   :  { %8571 = vpow2.f32 %v7691_v38 }
0x2012   :  { %v8570_v57 = vpop.eup %8569 }
0x2013   :  { %5019 = vrot.lane.b32.xlu1 %v8570_v57, %s8745_s14 }
0x2014   :  { %v8572_v46 = vpop.eup %8571 }
0x2015   :  { %v5010_v12 = vadd.f32 1.0, %v8572_v46 }
0x2017   :  { %8573 = vrcp.f32 %v5010_v12 }
0x2021   :  { %v8574_v56 = vpop.eup %8573 }
0x2022   :  { %v5017_v58 = vmul.f32 %v8574_v56, %v5015_v32 }
0x2085   :  { %v5020_v49 = vpop.permute.xlu1 %5019 }
0x2086   :  { %v5022_v29 = vmul.f32 %v8574_v56, %v5020_v49 }
0x2088   :  { %5024 = vrot.lane.b32.xlu1 %v5022_v29, %s8744_s13 }
0x20fa   :  { %v5025_v24 = vpop.permute.xlu1 %5024 }
0x20fb   :  { %v5027_v62 = vadd.f32 %v5025_v24, %v5017_v58 }
0x20fd   :  { %8575 = vtanh.f32 %v5027_v62 }
0x2107   :  { %v8576_v43 = vpop.eup %8575 }
0x2108   :  { %5030 = vrot.lane.b32.xlu0 %v8576_v43, %s8745_s14 }
0x210c   :  { %5040 = vrot.lane.b32.xlu0 %v5027_v62, %s8746_s15 }
0x217a   :  { %v5031_v45 = vpop.permute.xlu0 %5030 }
0x217b   :  { %v5033_v1 = vmul.f32 %v8574_v56, %v5031_v45 }
0x217d   :  { %5035 = vrot.lane.b32.xlu1 %v5033_v1, %s8744_s13 }
0x217e   :  { %v5041_v16 = vpop.permute.xlu0 %5040 }
0x217f   :  { %5043 = vst.msk [vmem:[#allocation3] sm:$0xff] %vm47_vm1, %v5041_v16 }
0x2186   :  { %v10082_v59 = vld [vmem:[#allocation3] sm:$0xff] }
0x2187   :  { %8108 = vmatmul.mubr.msk.f32.vlgmr.msra.gmra.mrb[28].mxu1 %vm47_vm1, %v10082_v59 }
0x2188   :  { %8317 = vmatpush3.bf16.msra.mxu1 %v9157_v26  ;;  %8129 = vmatprep.mubr.msk.f32.mxu1 %vm8740_vm2, %v8739_v0 }
0x2189   :  { %8318 = vmatprep.subr.bf16.mxu1 %v8741_v20 }
0x218c   :  { %8320 = vmatpush3.bf16.msra.mxu1 %v9166_v27 }
0x218d   :  { %8327 = vmatprep.subr.bf16.mxu1 %v8741_v20 }
0x21ef   :  { %v5036_v10 = vpop.permute.xlu1 %5035 }
0x21f0   :  { %5038 = vst.msk [vmem:[#allocation2] sm:$0xff] %vm47_vm1, %v5036_v10  ;;  %7692 = vst.msk [vmem:[%s10719_s12 + $0x20] sm:$0xff] %vm47_vm1, %v5036_v10 }
0x21f7   :  { %v5046_v42 = vld [vmem:[#allocation2] sm:$0xff] }
0x21f8   :  { %8119 = vmatmul.mubr.msk.f32.vlgmr.msra.gmra.mrb[28].mxu0 %vm47_vm1, %v5046_v42  ;;  %8130 = vmatmul.mubr.msk.f32.vlgmr.msra.gmra.mrb[30].mxu1 %vm47_vm1, %v5046_v42 }
0x21f9   :  { %8133 = vmatpush3.msk.msra.mxu0 %vm1471_vm12, %v10102_v40  ;;  %8134 = vmatprep.mubr.msk.f32.mxu0 %vm8740_vm2, %v8739_v0 }
0x21fa   :  { %8321 = vmatprep.subr.bf16.mxu0 %v8741_v20  ;;  %8329 = vmatpush3.bf16.msra.mxu1 %v8883_v15 }
0x21fb   :  { %8330 = vmatprep.subr.bf16.mxu1 %v8741_v20  ;;  %8156 = vmatprep.mubr.msk.f32.mxu1 %vm8740_vm2, %v8739_v0 }
0x21fe   :  { %8332 = vmatpush3.bf16.msra.mxu1 %v8909_v22 }
0x21ff   :  { %8170 = vmatprep.subr.mxu1 %v8739_v0 }
0x225a   :  { %v5117_v18 = vpop.f32.mrb[28].mxu1 }
0x225b   :  { %v8109_v33 = vpop.f32.mrb[29].mxu1 }
0x22cb   :  { %v5190_v37 = vpop.f32.mrb[28].mxu0  ;;  %v10115_v23 = vpop.f32.mrb[30].mxu1 }
0x22cc   :  { %v5191_v50 = vadd.f32 %v5190_v37, %v5117_v18  ;;  %v8120_v11 = vpop.f32.mrb[29].mxu0  ;;  %v8131_v53 = vpop.f32.mrb[31].mxu1 }
0x22ce   :  { %v5194_v55 = vadd.f32 %v9888_v28, %v5191_v50 }
0x22d0   :  { %v5196_v36 = vcombine.high %v5194_v55, %v5194_v55  ;;  %v5203_v47 = vrot.slane %v5194_v55, %v8956_v61 }
0x22d2   :  { %v5210_v30 = vrot.slane %v5196_v36, %v8956_v61  ;;  %v5211_v44 = vcombine.high %v5203_v47, %v5203_v47  ;;  %v5219_v60 = vrot.slane %v5203_v47, %v8956_v61 }
0x22d4   :  { %v5212_v52 = vcombine.high %v5210_v30, %v5210_v30  ;;  %v5226_v13 = vrot.slane %v5210_v30, %v8956_v61  ;;  %v5233_v57 = vrot.slane %v5211_v44, %v8956_v61  ;;  %v5241_v38 = vcombine.high %v5219_v60, %v5219_v60 }
0x22d5   :  { %v5248_v46 = vrot.slane %v5219_v60, %v8961_v4 }
0x22d6   :  { %v5240_v12 = vrot.slane %v5212_v52, %v8956_v61  ;;  %v5243_v56 = vcombine.high %v5233_v57, %v5233_v57  ;;  %v5252_v28 = vrot.slane %v5233_v57, %v8961_v4  ;;  %v5242_v49 = vcombine.high %v5226_v13, %v5226_v13 }
0x22d7   :  { %v5256_v29 = vrot.slane %v5241_v38, %v8961_v4  ;;  %v5264_v32 = vrot.slane %v5226_v13, %v8961_v4  ;;  %v5285_v58 = vadd.f32 %v9901_v19, %v5248_v46 }
0x22d8   :  { %v5244_v24 = vcombine.high %v5240_v12, %v5240_v12  ;;  %v5260_v62 = vrot.slane %v5243_v56, %v8961_v4  ;;  %v5268_v43 = vrot.slane %v5240_v12, %v8961_v4  ;;  %v5286_v45 = vadd.f32 %v9907_v54, %v5252_v28 }
0x22d9   :  { %v5287_v1 = vadd.f32 %v9910_v41, %v5256_v29  ;;  %v5289_v16 = vadd.f32 %v9913_v25, %v5264_v32  ;;  %8577 = vtanh.f32 %v5285_v58  ;;  %v5272_v18 = vrot.slane %v5242_v49, %v8961_v4 }
0x22da   :  { %v5276_v10 = vrot.slane %v5244_v24, %v8961_v4  ;;  %v5288_v42 = vadd.f32 %v9916_v39, %v5260_v62  ;;  %v5290_v19 = vadd.f32 %v9923_v6, %v5268_v43  ;;  %8579 = vtanh.f32 %v5286_v45 }
0x22db   :  { %8581 = vtanh.f32 %v5287_v1  ;;  %v5291_v54 = vadd.f32 %v9919_v5, %v5272_v18 }
0x22dc   :  { %8583 = vtanh.f32 %v5289_v16  ;;  %v5292_v33 = vadd.f32 %v9926_v3, %v5276_v10 }
0x22dd   :  { %8585 = vtanh.f32 %v5288_v42 }
0x22de   :  { %8587 = vtanh.f32 %v5290_v19 }
0x22df   :  { %8589 = vtanh.f32 %v5292_v33 }
0x22e0   :  { %8591 = vtanh.f32 %v5291_v54 }
0x22e3   :  { %v8578_v41 = vpop.eup %8577 }
0x22e4   :  { %v5301_v25 = vmul.f32 %v9932_v63, %v8578_v41  ;;  %v8580_v37 = vpop.eup %8579 }
0x22e5   :  { %v8582_v39 = vpop.eup %8581  ;;  %v5302_v6 = vmul.f32 %v9932_v63, %v8580_v37 }
0x22e6   :  { %v5309_v50 = vsel %vm651_vm3, %v5301_v25, 0.0  ;;  %v8584_v11 = vpop.eup %8583  ;;  %v5303_v3 = vmul.f32 %v9932_v63, %v8582_v39 }
0x22e7   :  { %5310 = vadd.xlane.f32.xlu1 %v5309_v50  ;;  %v8586_v53 = vpop.eup %8585  ;;  %v5312_v55 = vsel %vm651_vm3, %v5302_v6, 0.0  ;;  %v5305_v52 = vmul.f32 %v9932_v63, %v8584_v11 }
0x22e8   :  { %v8588_v5 = vpop.eup %8587  ;;  %5313 = vadd.xlane.f32.xlu0 %v5312_v55  ;;  %v5304_v36 = vmul.f32 %v9932_v63, %v8586_v53  ;;  %v5315_v60 = vsel %vm651_vm3, %v5303_v3, 0.0 }
0x22e9   :  { %v5306_v30 = vmul.f32 %v9932_v63, %v8588_v5  ;;  %v8590_v44 = vpop.eup %8589  ;;  %v5321_v46 = vsel %vm651_vm3, %v5305_v52, 0.0 }
0x22ea   :  { %v5318_v47 = vsel %vm651_vm3, %v5304_v36, 0.0  ;;  %v8592_v13 = vpop.eup %8591  ;;  %v5308_v38 = vmul.f32 %v9932_v63, %v8590_v44 }
0x22eb   :  { %5319 = vadd.xlane.f32.xlu1 %v5318_v47  ;;  %v5324_v57 = vsel %vm651_vm3, %v5306_v30, 0.0  ;;  %v5307_v12 = vmul.f32 %v9932_v63, %v8592_v13 }
0x22ec   :  { %5316 = vadd.xlane.f32.xlu0 %v5315_v60  ;;  %v5330_v56 = vsel %vm651_vm3, %v5308_v38, 0.0 }
0x22ed   :  { %v5327_v28 = vsel %vm651_vm3, %v5307_v12, 0.0 }
0x22ef   :  { %5325 = vadd.xlane.f32.xlu1 %v5324_v57 }
0x22f0   :  { %5322 = vadd.xlane.f32.xlu0 %v5321_v46 }
0x22f3   :  { %5331 = vadd.xlane.f32.xlu1 %v5330_v56 }
0x22f4   :  { %5328 = vadd.xlane.f32.xlu0 %v5327_v28 }
0x2374   :  { %v5311_v49 = vpop.xlane.xlu1 %5310 }
0x2375   :  { %v5314_v29 = vpop.xlane.xlu0 %5313  ;;  %v5333_v58 = vadd.f32 %v5311_v49, %v9025_v35 }
0x2376   :  { %v5334_v32 = vadd.f32 %v5314_v29, %v9025_v35 }
0x2377   :  { %v5352_v63 = vrot.slane %v5333_v58, %v9023_v34 }
0x2378   :  { %v5320_v24 = vpop.xlane.xlu1 %5319  ;;  %v5356_v62 = vrot.slane %v5334_v32, %v9023_v34 }
0x2379   :  { %v5317_v43 = vpop.xlane.xlu0 %5316  ;;  %v5336_v1 = vadd.f32 %v5320_v24, %v9025_v35 }
0x237a   :  { %v5335_v45 = vadd.f32 %v5317_v43, %v9025_v35  ;;  %v5381_v42 = vsel %vm1045_vm4, %v5356_v62, %v5352_v63 }
0x237b   :  { %v5364_v54 = vrot.slane %v5336_v1, %v9023_v34 }
0x237c   :  { %v5360_v16 = vrot.slane %v5335_v45, %v9023_v34  ;;  %v5326_v10 = vpop.xlane.xlu1 %5325 }
0x237d   :  { %v5323_v18 = vpop.xlane.xlu0 %5322  ;;  %v5338_v41 = vadd.f32 %v5326_v10, %v9025_v35 }
0x237e   :  { %v5382_v19 = vsel %vm1047_vm5, %v5360_v16, %v5381_v42  ;;  %v5337_v33 = vadd.f32 %v5323_v18, %v9025_v35 }
0x237f   :  { %v5383_v39 = vsel %vm1049_vm6, %v5364_v54, %v5382_v19  ;;  %v5372_v55 = vrot.slane %v5338_v41, %v9023_v34 }
0x2380   :  { %v5368_v25 = vrot.slane %v5337_v33, %v9023_v34  ;;  %v5332_v37 = vpop.xlane.xlu1 %5331 }
0x2381   :  { %v5340_v50 = vadd.f32 %v5332_v37, %v9025_v35  ;;  %v5329_v6 = vpop.xlane.xlu0 %5328 }
0x2382   :  { %v5384_v11 = vsel %vm1051_vm7, %v5368_v25, %v5383_v39  ;;  %v5339_v53 = vadd.f32 %v5329_v6, %v9025_v35 }
0x2383   :  { %v5380_v5 = vrot.slane %v5340_v50, %v9023_v34  ;;  %v5385_v36 = vsel %vm1053_vm8, %v5372_v55, %v5384_v11 }
0x2384   :  { %v5376_v3 = vrot.slane %v5339_v53, %v9023_v34 }
0x2386   :  { %v5386_v47 = vsel %vm1055_vm9, %v5376_v3, %v5385_v36 }
0x2387   :  { %v5387_v30 = vsel %vm1057_vm10, %v5380_v5, %v5386_v47 }
0x2388   :  { %v5389_v44 = vsel %vm1060_vm11, %v5387_v30, -inf }
0x2389   :  { %5390 = vmax.xlane.f32.xlu0 %v5389_v44 }
0x2416   :  { %v5391_v60 = vpop.xlane.xlu0 %5390 }
0x2417   :  { %v5396_v52 = vrot.slane %v5391_v60, %v8961_v4  ;;  %v5400_v13 = vrot.slane %v5391_v60, %v9058_v7  ;;  %v5404_v57 = vrot.slane %v5391_v60, %v9064_v9  ;;  %v5412_v38 = vrot.slane %v5391_v60, %v9074_v31 }
0x2418   :  { %v5408_v46 = vrot.slane %v5391_v60, %v9070_v17  ;;  %v5420_v49 = vrot.slane %v5391_v60, %v9082_v51  ;;  %v5416_v43 = vrot.slane %v5391_v60, %v9078_v48  ;;  %v5424_v18 = vrot.slane %v5391_v60, %v9061_v8 }
0x2419   :  { %v5433_v12 = vsub.f32 %v5333_v58, %v5396_v52  ;;  %v5434_v56 = vsub.f32 %v5334_v32, %v5400_v13  ;;  %v5435_v28 = vsub.f32 %v5335_v45, %v5404_v57  ;;  %v5437_v29 = vsub.f32 %v5337_v33, %v5412_v38 }
0x241a   :  { %v5436_v63 = vsub.f32 %v5336_v1, %v5408_v46  ;;  %v5439_v10 = vsub.f32 %v5339_v53, %v5420_v49  ;;  %v5438_v19 = vsub.f32 %v5338_v41, %v5416_v43  ;;  %v5440_v45 = vsub.f32 %v5340_v50, %v5424_v18  ;;  %v7695_v53 = vld [vmem:[%s10715_s0 + $0x28] sm:$0xff] }
0x241b   :  { %v5441_v24 = vmul.f32 1.442695, %v5433_v12  ;;  %v5443_v62 = vmul.f32 1.442695, %v5434_v56  ;;  %v5445_v16 = vmul.f32 1.442695, %v5435_v28  ;;  %v5588_v55 = vrot.slane %v7695_v53, %v8961_v4 }
0x241c   :  { %v5449_v42 = vmul.f32 1.442695, %v5437_v29  ;;  %v5447_v58 = vmul.f32 1.442695, %v5436_v63  ;;  %v5453_v32 = vmul.f32 1.442695, %v5439_v10  ;;  %v5595_v3 = vrot.slane %v7695_v53, %v9058_v7 }
0x241d   :  { %8593 = vpow2.f32 %v5441_v24  ;;  %v5451_v33 = vmul.f32 1.442695, %v5438_v19  ;;  %v5455_v1 = vmul.f32 1.442695, %v5440_v45  ;;  %v5602_v5 = vrot.slane %v7695_v53, %v9064_v9 }
0x241e   :  { %8595 = vpow2.f32 %v5443_v62  ;;  %v5609_v36 = vrot.slane %v7695_v53, %v9070_v17  ;;  %v5616_v47 = vrot.slane %v7695_v53, %v9074_v31  ;;  %v5623_v30 = vrot.slane %v7695_v53, %v9078_v48 }
0x241f   :  { %8597 = vpow2.f32 %v5445_v16  ;;  %v5630_v44 = vrot.slane %v7695_v53, %v9082_v51  ;;  %v5637_v60 = vrot.slane %v7695_v53, %v9061_v8 }
0x2420   :  { %8599 = vpow2.f32 %v5449_v42 }
0x2421   :  { %8601 = vpow2.f32 %v5447_v58 }
0x2422   :  { %8603 = vpow2.f32 %v5453_v32 }
0x2423   :  { %8605 = vpow2.f32 %v5451_v33 }
0x2424   :  { %8607 = vpow2.f32 %v5455_v1 }
0x2427   :  { %v10188_v54 = vpop.eup %8593 }
0x2428   :  { %v10190_v25 = vpop.eup %8595  ;;  %5466 = vperm.xlu1 %8366, %v10188_v54  }
0x2429   :  { %5469 = vperm.xlu0 %8365, %v10190_v25   ;;  %v10194_v37 = vpop.eup %8597 }
0x242a   :  { %v10196_v41 = vpop.eup %8599 }
0x242b   :  { %v10200_v39 = vpop.eup %8601 }
0x242c   :  { %5472 = vperm.xlu1 %8366, %v10194_v37   ;;  %v10202_v50 = vpop.eup %8603 }
0x242d   :  { %5478 = vperm.xlu0 %8365, %v10196_v41   ;;  %v10206_v6 = vpop.eup %8605 }
0x242e   :  { %v10209_v11 = vpop.eup %8607 }
0x2430   :  { %5475 = vperm.xlu1 %8366, %v10200_v39  }
0x2431   :  { %5484 = vperm.xlu0 %8365, %v10202_v50  }
0x2434   :  { %5481 = vperm.xlu1 %8366, %v10206_v6  }
0x2438   :  { %5487 = vperm.xlu1 %8366, %v10209_v11  }
0x243c   :  { %5590 = vbcast.lane.b32.xlu1 %v5588_v55, 256 }
0x2440   :  { %5597 = vbcast.lane.b32.xlu1 %v5595_v3, 256 }
0x2444   :  { %5604 = vbcast.lane.b32.xlu1 %v5602_v5, 256 }
0x2448   :  { %5611 = vbcast.lane.b32.xlu1 %v5609_v36, 256 }
0x244c   :  { %5618 = vbcast.lane.b32.xlu1 %v5616_v47, 256 }
0x2450   :  { %5625 = vbcast.lane.b32.xlu1 %v5623_v30, 256 }
0x2454   :  { %5632 = vbcast.lane.b32.xlu1 %v5630_v44, 256 }
0x2458   :  { %5639 = vbcast.lane.b32.xlu1 %v5637_v60, 256 }
0x24a7   :  { %v5467_v52 = vpop.permute.xlu1 %5466 }
0x24a8   :  { %v5470_v13 = vpop.permute.xlu0 %5469  ;;  %v5492_v46 = vrot.slane %v5467_v52, %v9023_v34 }
0x24a9   :  { %v5496_v38 = vrot.slane %v5470_v13, %v9023_v34 }
0x24ab   :  { %v5473_v57 = vpop.permute.xlu1 %5472  ;;  %v5521_v49 = vsel %vm1045_vm4, %v5496_v38, %v5492_v46 }
0x24ac   :  { %v5500_v12 = vrot.slane %v5473_v57, %v9023_v34  ;;  %v5479_v56 = vpop.permute.xlu0 %5478 }
0x24ad   :  { %v5508_v43 = vrot.slane %v5479_v56, %v9023_v34 }
0x24ae   :  { %v5522_v24 = vsel %vm1047_vm5, %v5500_v12, %v5521_v49 }
0x24af   :  { %v5476_v28 = vpop.permute.xlu1 %5475 }
0x24b0   :  { %v5504_v29 = vrot.slane %v5476_v28, %v9023_v34  ;;  %v5485_v16 = vpop.permute.xlu0 %5484 }
0x24b1   :  { %v5516_v19 = vrot.slane %v5485_v16, %v9023_v34 }
0x24b2   :  { %v5523_v62 = vsel %vm1049_vm6, %v5504_v29, %v5522_v24 }
0x24b3   :  { %v5482_v63 = vpop.permute.xlu1 %5481  ;;  %v5524_v42 = vsel %vm1051_vm7, %v5508_v43, %v5523_v62 }
0x24b4   :  { %v5512_v10 = vrot.slane %v5482_v63, %v9023_v34 }
0x24b6   :  { %v5525_v18 = vsel %vm1053_vm8, %v5512_v10, %v5524_v42 }
0x24b7   :  { %v5488_v58 = vpop.permute.xlu1 %5487  ;;  %v5526_v45 = vsel %vm1055_vm9, %v5516_v19, %v5525_v18 }
0x24b8   :  { %v5520_v32 = vrot.slane %v5488_v58, %v9023_v34 }
0x24ba   :  { %v5527_v33 = vsel %vm1057_vm10, %v5520_v32, %v5526_v45 }
0x24bb   :  { %v5529_v1 = vsel %vm1060_vm11, %v5527_v33, 0.0  ;;  %v5591_v53 = vpop.permute.xlu1 %5590 }
0x24bc   :  { %5530 = vadd.xlane.f32.xlu0 %v5529_v1 }
0x24bf   :  { %v5598_v55 = vpop.permute.xlu1 %5597 }
0x24c3   :  { %v5605_v3 = vpop.permute.xlu1 %5604 }
0x24c7   :  { %v5612_v36 = vpop.permute.xlu1 %5611 }
0x24cb   :  { %v5619_v47 = vpop.permute.xlu1 %5618 }
0x24cf   :  { %v5626_v57 = vpop.permute.xlu1 %5625 }
0x24d3   :  { %v5633_v24 = vpop.permute.xlu1 %5632 }
0x24d7   :  { %v5640_v58 = vpop.permute.xlu1 %5639 }
0x2549   :  { %v5531_v5 = vpop.xlane.xlu0 %5530 }
0x254a   :  { %8609 = vrcp.f32 %v5531_v5 }
0x2554   :  { %v8610_v30 = vpop.eup %8609 }
0x2555   :  { %v5561_v44 = vrot.slane %v8610_v30, %v9082_v51  ;;  %v5537_v60 = vrot.slane %v8610_v30, %v8961_v4  ;;  %v5541_v52 = vrot.slane %v8610_v30, %v9058_v7  ;;  %v5545_v13 = vrot.slane %v8610_v30, %v9064_v9 }
0x2556   :  { %v5549_v12 = vrot.slane %v8610_v30, %v9070_v17  ;;  %v5553_v62 = vrot.slane %v8610_v30, %v9074_v31  ;;  %v5565_v42 = vrot.slane %v8610_v30, %v9061_v8 }
0x2557   :  { %v5574_v38 = vmul.f32 %v10188_v54, %v5537_v60  ;;  %v5575_v46 = vmul.f32 %v10190_v25, %v5541_v52  ;;  %v5580_v56 = vmul.f32 %v10202_v50, %v5561_v44  ;;  %v5576_v29 = vmul.f32 %v10194_v37, %v5545_v13 }
0x2558   :  { %v5577_v16 = vmul.f32 %v10200_v39, %v5549_v12  ;;  %v5578_v54 = vmul.f32 %v10196_v41, %v5553_v62  ;;  %v5557_v25 = vrot.slane %v8610_v30, %v9078_v48  ;;  %v5581_v19 = vmul.f32 %v10209_v11, %v5565_v42 }
0x2559   :  { %v5649_v28 = vmul.f32 %v5591_v53, %v5574_v38  ;;  %v5650_v49 = vmul.f32 %v5598_v55, %v5575_v46  ;;  %v5655_v43 = vmul.f32 %v5633_v24, %v5580_v56  ;;  %v5651_v63 = vmul.f32 %v5605_v3, %v5576_v29 }
0x255a   :  { %v5652_v50 = vmul.f32 %v5612_v36, %v5577_v16  ;;  %v5653_v10 = vmul.f32 %v5619_v47, %v5578_v54  ;;  %v5579_v37 = vmul.f32 %v10206_v6, %v5557_v25  ;;  %v5656_v39 = vmul.f32 %v5640_v58, %v5581_v19 }
0x255b   :  { %5736 = vperm.xlu0 %8365, %v5649_v28   ;;  %5739 = vperm.xlu1 %8366, %v5650_v49  }
0x255c   :  { %v5654_v18 = vmul.f32 %v5626_v57, %v5579_v37 }
0x255f   :  { %5742 = vperm.xlu1 %8366, %v5651_v63   ;;  %5754 = vperm.xlu0 %8365, %v5655_v43  }
0x2563   :  { %5745 = vperm.xlu1 %8366, %v5652_v50  }
0x2567   :  { %5748 = vperm.xlu1 %8366, %v5653_v10  }
0x256b   :  { %5751 = vperm.xlu1 %8366, %v5654_v18  }
0x256f   :  { %5757 = vperm.xlu1 %8366, %v5656_v39  }
0x2573   :  { %5878 = vrot.lane.b32.xlu1 %v10082_v59, %s8744_s13 }
0x25da   :  { %v5740_v41 = vpop.permute.xlu1 %5739  ;;  %v5737_v45 = vpop.permute.xlu0 %5736 }
0x25db   :  { %v5762_v1 = vrot.slane %v5737_v45, %v9023_v34  ;;  %v5766_v6 = vrot.slane %v5740_v41, %v9023_v34 }
0x25dd   :  { %v5791_v5 = vsel %vm1045_vm4, %v5766_v6, %v5762_v1 }
0x25de   :  { %v5743_v32 = vpop.permute.xlu1 %5742  ;;  %v5755_v47 = vpop.permute.xlu0 %5754 }
0x25df   :  { %v5770_v53 = vrot.slane %v5743_v32, %v9023_v34  ;;  %v5786_v13 = vrot.slane %v5755_v47, %v9023_v34 }
0x25e1   :  { %v5792_v36 = vsel %vm1047_vm5, %v5770_v53, %v5791_v5 }
0x25e2   :  { %v5746_v33 = vpop.permute.xlu1 %5745 }
0x25e3   :  { %v5774_v11 = vrot.slane %v5746_v33, %v9023_v34 }
0x25e5   :  { %v5793_v30 = vsel %vm1049_vm6, %v5774_v11, %v5792_v36 }
0x25e6   :  { %v5749_v55 = vpop.permute.xlu1 %5748 }
0x25e7   :  { %v5778_v3 = vrot.slane %v5749_v55, %v9023_v34 }
0x25e9   :  { %v5794_v60 = vsel %vm1051_vm7, %v5778_v3, %v5793_v30 }
0x25ea   :  { %v5752_v59 = vpop.permute.xlu1 %5751 }
0x25eb   :  { %v5782_v44 = vrot.slane %v5752_v59, %v9023_v34 }
0x25ed   :  { %v5795_v52 = vsel %vm1053_vm8, %v5782_v44, %v5794_v60 }
0x25ee   :  { %v5758_v57 = vpop.permute.xlu1 %5757  ;;  %v5796_v46 = vsel %vm1055_vm9, %v5786_v13, %v5795_v52 }
0x25ef   :  { %v5790_v38 = vrot.slane %v5758_v57, %v9023_v34 }
0x25f1   :  { %v5797_v12 = vsel %vm1057_vm10, %v5790_v38, %v5796_v46 }
0x25f2   :  { %8135 = vmatmul.mubr.msk.f32.vlgmr.msra.gmra.mrb[30].mxu0 %vm1060_vm11, %v5797_v12  ;;  %v5879_v50 = vpop.permute.xlu1 %5878 }
0x25f3   :  { %8323 = vmatpush3.bf16.msra.mxu0 %v8881_v14  ;;  %8145 = vmatprep.mubr.msk.f32.mxu0 %vm8740_vm2, %v8739_v0 }
0x25f4   :  { %8324 = vmatprep.subr.bf16.mxu0 %v8741_v20 }
0x25f7   :  { %8326 = vmatpush3.bf16.msra.mxu0 %v8907_v21 }
0x25f8   :  { %8333 = vmatprep.subr.bf16.mxu0 %v8741_v20 }
0x26c5   :  { %v5866_v56 = vpop.f32.mrb[30].mxu0 }
0x26c6   :  { %v5867_v28 = vadd.f32 %v5866_v56, %v10115_v23  ;;  %v8136_v49 = vpop.f32.mrb[31].mxu0  ;;  %v10333_v56 = vld [vmem:[#allocation4] sm:$0xf] }
0x26c8   :  { %v5870_v29 = vadd.f32 %v10073_v2, %v5867_v28 }
0x26ca   :  { %8611 = vtanh.f32 %v5870_v29  ;;  %v7699_v62 = vmul.f32 -1.442695, %v5870_v29 }
0x26cc   :  { %8613 = vpow2.f32 %v7699_v62 }
0x26d4   :  { %v8612_v24 = vpop.eup %8611 }
0x26d5   :  { %5883 = vrot.lane.b32.xlu0 %v8612_v24, %s8745_s14 }
0x26d6   :  { %v8614_v43 = vpop.eup %8613 }
0x26d7   :  { %v5874_v63 = vadd.f32 1.0, %v8614_v43  ;;  %v10339_v43 = vld [vmem:[#allocation4 + $0x4] sm:$0xf] }
0x26d9   :  { %8615 = vrcp.f32 %v5874_v63 }
0x26e3   :  { %v8616_v16 = vpop.eup %8615 }
0x26e4   :  { %v5881_v10 = vmul.f32 %v8616_v16, %v5879_v50 }
0x2747   :  { %v5884_v54 = vpop.permute.xlu0 %5883 }
0x2748   :  { %v5886_v25 = vmul.f32 %v8616_v16, %v5884_v54 }
0x274a   :  { %5888 = vrot.lane.b32.xlu0 %v5886_v25, %s8744_s13  ;;  %v10345_v25 = vld [vmem:[#allocation4 + $0x10] sm:$0xf] }
0x27bc   :  { %v5889_v23 = vpop.permute.xlu0 %5888 }
0x27bd   :  { %v5891_v37 = vadd.f32 %v5889_v23, %v5881_v10  ;;  %v10348_v10 = vld [vmem:[#allocation4 + $0xc] sm:$0xf] }
0x27bf   :  { %8617 = vtanh.f32 %v5891_v37 }
0x27c9   :  { %v8618_v2 = vpop.eup %8617 }
0x27ca   :  { %5894 = vrot.lane.b32.xlu1 %v8618_v2, %s8745_s14 }
0x27ce   :  { %5904 = vrot.lane.b32.xlu1 %v5891_v37, %s8746_s15  ;;  %v10351_v37 = vld [vmem:[#allocation4 + $0x18] sm:$0xf] }
0x283c   :  { %v5895_v42 = vpop.permute.xlu1 %5894 }
0x283d   :  { %v5897_v18 = vmul.f32 %v8616_v16, %v5895_v42  ;;  %v10342_v16 = vld [vmem:[#allocation4 + $0x8] sm:$0xf] }
0x283f   :  { %5899 = vrot.lane.b32.xlu0 %v5897_v18, %s8744_s13  ;;  %v10355_v18 = vld [vmem:[#allocation4 + $0x14] sm:$0xf] }
0x2840   :  { %v5905_v19 = vpop.permute.xlu1 %5904 }
0x2841   :  { %5907 = vst.msk [vmem:[#allocation3] sm:$0xff] %vm47_vm1, %v5905_v19 }
0x2848   :  { %v10287_v58 = vld [vmem:[#allocation3] sm:$0xff] }
0x2849   :  { %8146 = vmatmul.mubr.msk.f32.vlgmr.msra.gmra.mrb[32].mxu0 %vm47_vm1, %v10287_v58 }
0x284a   :  { %8335 = vmatpush3.bf16.msra.mxu0 %v9157_v26  ;;  %8167 = vmatprep.mubr.msk.f32.mxu0 %vm8740_vm2, %v8739_v0 }
0x284b   :  { %8336 = vmatprep.subr.bf16.mxu0 %v8741_v20 }
0x284e   :  { %8338 = vmatpush3.bf16.msra.mxu0 %v9166_v27 }
0x284f   :  { %8345 = vmatprep.subr.bf16.mxu0 %v8741_v20 }
0x28b1   :  { %v5900_v39 = vpop.permute.xlu0 %5899 }
0x28b2   :  { %5902 = vst.msk [vmem:[#allocation2] sm:$0xff] %vm47_vm1, %v5900_v39  ;;  %7700 = vst.msk [vmem:[%s10719_s12 + $0x28] sm:$0xff] %vm47_vm1, %v5900_v39  ;;  %v10358_v39 = vld [vmem:[#allocation4 + $0x1c] sm:$0xf] }
0x28b9   :  { %v5910_v41 = vld [vmem:[#allocation2] sm:$0xff] }
0x28ba   :  { %8157 = vmatmul.mubr.msk.f32.vlgmr.msra.gmra.mrb[32].mxu1 %vm47_vm1, %v5910_v41  ;;  %8168 = vmatmul.mubr.msk.f32.vlgmr.msra.gmra.mrb[34].mxu0 %vm47_vm1, %v5910_v41 }
0x28bb   :  { %8171 = vmatpush3.msk.msra.mxu1 %vm1471_vm12, %v10102_v40  ;;  %8172 = vmatprep.mubr.msk.f32.mxu1 %vm8740_vm2, %v8739_v0 }
0x28bc   :  { %8339 = vmatprep.subr.bf16.mxu1 %v8741_v20  ;;  %8347 = vmatpush3.bf16.msra.mxu0 %v8883_v15  ;;  %v10320_v15 = vld [vmem:[%s10713_s4] ss:$0 sm:$0xff] }
0x28bd   :  { %8348 = vmatprep.subr.bf16.mxu0 %v8741_v20  ;;  %8194 = vmatprep.mubr.msk.f32.mxu0 %vm8740_vm2, %v8739_v0 }
0x28c0   :  { %8350 = vmatpush3.bf16.msra.mxu0 %v8909_v22 }
0x28c1   :  { %8208 = vmatprep.subr.mxu0 %v8739_v0 }
0x291c   :  { %v5981_v32 = vpop.f32.mrb[32].mxu0 }
0x291d   :  { %v8147_v45 = vpop.f32.mrb[33].mxu0 }
0x291e   :  { %v10364_v45 = vld [vmem:[%s10714_s7] ss:$0 sm:$0xff] }
0x298d   :  { %v6054_v33 = vpop.f32.mrb[32].mxu1  ;;  %v10315_v40 = vpop.f32.mrb[34].mxu0 }
0x298e   :  { %v6055_v1 = vadd.f32 %v6054_v33, %v5981_v32  ;;  %v8158_v6 = vpop.f32.mrb[33].mxu1  ;;  %v8169_v53 = vpop.f32.mrb[35].mxu0 }
0x2990   :  { %v6058_v55 = vadd.f32 %v10320_v15, %v6055_v1 }
0x2992   :  { %v6060_v11 = vcombine.high %v6058_v55, %v6058_v55  ;;  %v6067_v22 = vrot.slane %v6058_v55, %v8956_v61 }
0x2994   :  { %v6074_v3 = vrot.slane %v6060_v11, %v8956_v61  ;;  %v6075_v5 = vcombine.high %v6067_v22, %v6067_v22  ;;  %v6083_v36 = vrot.slane %v6067_v22, %v8956_v61 }
0x2996   :  { %v6076_v59 = vcombine.high %v6074_v3, %v6074_v3  ;;  %v6090_v47 = vrot.slane %v6074_v3, %v8956_v61  ;;  %v6097_v30 = vrot.slane %v6075_v5, %v8956_v61  ;;  %v6105_v44 = vcombine.high %v6083_v36, %v6083_v36 }
0x2997   :  { %v6112_v60 = vrot.slane %v6083_v36, %v8961_v4 }
0x2998   :  { %v6104_v52 = vrot.slane %v6076_v59, %v8956_v61  ;;  %v6106_v13 = vcombine.high %v6090_v47, %v6090_v47  ;;  %v6107_v57 = vcombine.high %v6097_v30, %v6097_v30  ;;  %v6116_v38 = vrot.slane %v6097_v30, %v8961_v4 }
0x2999   :  { %v6120_v46 = vrot.slane %v6105_v44, %v8961_v4  ;;  %v6128_v12 = vrot.slane %v6090_v47, %v8961_v4  ;;  %v6149_v28 = vadd.f32 %v10333_v56, %v6112_v60 }
0x299a   :  { %v6108_v49 = vcombine.high %v6104_v52, %v6104_v52  ;;  %v6124_v29 = vrot.slane %v6107_v57, %v8961_v4  ;;  %v6132_v24 = vrot.slane %v6104_v52, %v8961_v4  ;;  %v6136_v62 = vrot.slane %v6106_v13, %v8961_v4 }
0x299b   :  { %v6150_v63 = vadd.f32 %v10339_v43, %v6116_v38  ;;  %v6151_v54 = vadd.f32 %v10342_v16, %v6120_v46  ;;  %v6153_v50 = vadd.f32 %v10345_v25, %v6128_v12  ;;  %8619 = vtanh.f32 %v6149_v28 }
0x299c   :  { %v6152_v23 = vadd.f32 %v10348_v10, %v6124_v29  ;;  %v6155_v2 = vadd.f32 %v10351_v37, %v6136_v62  ;;  %v6140_v42 = vrot.slane %v6108_v49, %v8961_v4  ;;  %v6154_v19 = vadd.f32 %v10355_v18, %v6132_v24 }
0x299d   :  { %8621 = vtanh.f32 %v6150_v63 }
0x299e   :  { %8623 = vtanh.f32 %v6151_v54  ;;  %v6156_v41 = vadd.f32 %v10358_v39, %v6140_v42 }
0x299f   :  { %8625 = vtanh.f32 %v6153_v50 }
0x29a0   :  { %8627 = vtanh.f32 %v6152_v23 }
0x29a1   :  { %8629 = vtanh.f32 %v6155_v2 }
0x29a2   :  { %8631 = vtanh.f32 %v6154_v19 }
0x29a3   :  { %8633 = vtanh.f32 %v6156_v41 }
0x29a5   :  { %v8620_v32 = vpop.eup %8619 }
0x29a6   :  { %v6165_v33 = vmul.f32 %v10364_v45, %v8620_v32 }
0x29a7   :  { %v8622_v1 = vpop.eup %8621 }
0x29a8   :  { %v8624_v6 = vpop.eup %8623  ;;  %v6173_v53 = vsel %vm651_vm3, %v6165_v33, 0.0  ;;  %v6166_v55 = vmul.f32 %v10364_v45, %v8622_v1 }
0x29a9   :  { %v8626_v11 = vpop.eup %8625  ;;  %6174 = vadd.xlane.f32.xlu0 %v6173_v53  ;;  %v6167_v22 = vmul.f32 %v10364_v45, %v8624_v6 }
0x29aa   :  { %v8628_v3 = vpop.eup %8627  ;;  %v6176_v5 = vsel %vm651_vm3, %v6166_v55, 0.0  ;;  %v6169_v36 = vmul.f32 %v10364_v45, %v8626_v11 }
0x29ab   :  { %v8630_v59 = vpop.eup %8629  ;;  %6177 = vadd.xlane.f32.xlu1 %v6176_v5  ;;  %v6179_v47 = vsel %vm651_vm3, %v6167_v22, 0.0  ;;  %v6168_v30 = vmul.f32 %v10364_v45, %v8628_v3 }
0x29ac   :  { %v8632_v44 = vpop.eup %8631  ;;  %v6185_v60 = vsel %vm651_vm3, %v6169_v36, 0.0  ;;  %v6171_v52 = vmul.f32 %v10364_v45, %v8630_v59 }
0x29ad   :  { %6180 = vadd.xlane.f32.xlu0 %v6179_v47  ;;  %v6182_v13 = vsel %vm651_vm3, %v6168_v30, 0.0  ;;  %v6170_v57 = vmul.f32 %v10364_v45, %v8632_v44  ;;  %v8634_v38 = vpop.eup %8633 }
0x29ae   :  { %v6191_v46 = vsel %vm651_vm3, %v6171_v52, 0.0  ;;  %v6172_v28 = vmul.f32 %v10364_v45, %v8634_v38 }
0x29af   :  { %6186 = vadd.xlane.f32.xlu1 %v6185_v60  ;;  %v6188_v12 = vsel %vm651_vm3, %v6170_v57, 0.0 }
0x29b0   :  { %v6194_v49 = vsel %vm651_vm3, %v6172_v28, 0.0 }
0x29b1   :  { %6183 = vadd.xlane.f32.xlu0 %v6182_v13 }
0x29b3   :  { %6192 = vadd.xlane.f32.xlu1 %v6191_v46 }
0x29b5   :  { %6189 = vadd.xlane.f32.xlu0 %v6188_v12 }
0x29b9   :  { %6195 = vadd.xlane.f32.xlu0 %v6194_v49 }
0x2a36   :  { %v6175_v29 = vpop.xlane.xlu0 %6174 }
0x2a37   :  { %v6197_v62 = vadd.f32 %v6175_v29, %v9025_v35 }
0x2a38   :  { %v6178_v24 = vpop.xlane.xlu1 %6177 }
0x2a39   :  { %v6198_v63 = vadd.f32 %v6178_v24, %v9025_v35  ;;  %v6216_v42 = vrot.slane %v6197_v62, %v9023_v34 }
0x2a3a   :  { %v6181_v54 = vpop.xlane.xlu0 %6180 }
0x2a3b   :  { %v6220_v50 = vrot.slane %v6198_v63, %v9023_v34  ;;  %v6199_v23 = vadd.f32 %v6181_v54, %v9025_v35 }
0x2a3c   :  { %v6187_v2 = vpop.xlane.xlu1 %6186 }
0x2a3d   :  { %v6224_v19 = vrot.slane %v6199_v23, %v9023_v34  ;;  %v6245_v32 = vsel %vm1045_vm4, %v6220_v50, %v6216_v42  ;;  %v6201_v1 = vadd.f32 %v6187_v2, %v9025_v35 }
0x2a3e   :  { %v6184_v41 = vpop.xlane.xlu0 %6183 }
0x2a3f   :  { %v6200_v33 = vadd.f32 %v6184_v41, %v9025_v35  ;;  %v6246_v55 = vsel %vm1047_vm5, %v6224_v19, %v6245_v32  ;;  %v6232_v5 = vrot.slane %v6201_v1, %v9023_v34 }
0x2a40   :  { %v6193_v53 = vpop.xlane.xlu1 %6192 }
0x2a41   :  { %v6228_v6 = vrot.slane %v6200_v33, %v9023_v34  ;;  %v6203_v36 = vadd.f32 %v6193_v53, %v9025_v35 }
0x2a42   :  { %v6190_v11 = vpop.xlane.xlu0 %6189 }
0x2a43   :  { %v6247_v22 = vsel %vm1049_vm6, %v6228_v6, %v6246_v55  ;;  %v6202_v3 = vadd.f32 %v6190_v11, %v9025_v35  ;;  %v6240_v52 = vrot.slane %v6203_v36, %v9023_v34 }
0x2a44   :  { %v6248_v47 = vsel %vm1051_vm7, %v6232_v5, %v6247_v22 }
0x2a45   :  { %v6236_v59 = vrot.slane %v6202_v3, %v9023_v34 }
0x2a46   :  { %v6196_v30 = vpop.xlane.xlu0 %6195 }
0x2a47   :  { %v6249_v44 = vsel %vm1053_vm8, %v6236_v59, %v6248_v47  ;;  %v6204_v60 = vadd.f32 %v6196_v30, %v9025_v35 }
0x2a48   :  { %v6250_v57 = vsel %vm1055_vm9, %v6240_v52, %v6249_v44 }
0x2a49   :  { %v6244_v13 = vrot.slane %v6204_v60, %v9023_v34 }
0x2a4b   :  { %v6251_v38 = vsel %vm1057_vm10, %v6244_v13, %v6250_v57 }
0x2a4c   :  { %v6253_v46 = vsel %vm1060_vm11, %v6251_v38, -inf  ;;  %v7703_v38 = vld [vmem:[%s10715_s0 + $0x30] sm:$0xff] }
0x2a4d   :  { %6254 = vmax.xlane.f32.xlu1 %v6253_v46  ;;  %v6452_v46 = vrot.slane %v7703_v38, %v8961_v4 }
0x2ada   :  { %v6255_v12 = vpop.xlane.xlu1 %6254 }
0x2adb   :  { %v6260_v28 = vrot.slane %v6255_v12, %v8961_v4  ;;  %v6264_v49 = vrot.slane %v6255_v12, %v9058_v7  ;;  %v6268_v29 = vrot.slane %v6255_v12, %v9064_v9  ;;  %v6272_v24 = vrot.slane %v6255_v12, %v9070_v17 }
0x2adc   :  { %v6280_v54 = vrot.slane %v6255_v12, %v9078_v48  ;;  %v6276_v19 = vrot.slane %v6255_v12, %v9074_v31  ;;  %v6288_v53 = vrot.slane %v6255_v12, %v9061_v8  ;;  %v6284_v22 = vrot.slane %v6255_v12, %v9082_v51 }
0x2add   :  { %v6297_v50 = vsub.f32 %v6197_v62, %v6260_v28  ;;  %v6298_v2 = vsub.f32 %v6198_v63, %v6264_v49  ;;  %v6300_v42 = vsub.f32 %v6200_v33, %v6272_v24  ;;  %v6299_v41 = vsub.f32 %v6199_v23, %v6268_v29 }
0x2ade   :  { %v6302_v55 = vsub.f32 %v6202_v3, %v6280_v54  ;;  %v6301_v5 = vsub.f32 %v6201_v1, %v6276_v19  ;;  %v6304_v47 = vsub.f32 %v6204_v60, %v6288_v53  ;;  %v6303_v63 = vsub.f32 %v6203_v36, %v6284_v22 }
0x2adf   :  { %v6305_v32 = vmul.f32 1.442695, %v6297_v50  ;;  %v6307_v6 = vmul.f32 1.442695, %v6298_v2  ;;  %v6311_v11 = vmul.f32 1.442695, %v6300_v42  ;;  %v6459_v12 = vrot.slane %v7703_v38, %v9058_v7 }
0x2ae0   :  { %v6309_v59 = vmul.f32 1.442695, %v6299_v41  ;;  %v6315_v62 = vmul.f32 1.442695, %v6302_v55  ;;  %v6313_v33 = vmul.f32 1.442695, %v6301_v5  ;;  %v6466_v28 = vrot.slane %v7703_v38, %v9064_v9 }
0x2ae1   :  { %8635 = vpow2.f32 %v6305_v32  ;;  %v6319_v23 = vmul.f32 1.442695, %v6304_v47  ;;  %v6317_v30 = vmul.f32 1.442695, %v6303_v63  ;;  %v6473_v49 = vrot.slane %v7703_v38, %v9070_v17 }
0x2ae2   :  { %8637 = vpow2.f32 %v6307_v6  ;;  %v6480_v29 = vrot.slane %v7703_v38, %v9074_v31  ;;  %v6487_v24 = vrot.slane %v7703_v38, %v9078_v48  ;;  %v6494_v54 = vrot.slane %v7703_v38, %v9082_v51 }
0x2ae3   :  { %8639 = vpow2.f32 %v6311_v11  ;;  %v6501_v50 = vrot.slane %v7703_v38, %v9061_v8 }
0x2ae4   :  { %8641 = vpow2.f32 %v6309_v59 }
0x2ae5   :  { %8643 = vpow2.f32 %v6315_v62 }
0x2ae6   :  { %8645 = vpow2.f32 %v6313_v33 }
0x2ae7   :  { %8647 = vpow2.f32 %v6319_v23 }
0x2ae8   :  { %8649 = vpow2.f32 %v6317_v30 }
0x2aeb   :  { %v10414_v44 = vpop.eup %8635 }
0x2aec   :  { %v10416_v3 = vpop.eup %8637  ;;  %6330 = vperm.xlu0 %8365, %v10414_v44  }
0x2aed   :  { %6333 = vperm.xlu1 %8366, %v10416_v3   ;;  %v10420_v1 = vpop.eup %8639 }
0x2aee   :  { %v10422_v60 = vpop.eup %8641 }
0x2aef   :  { %v10426_v36 = vpop.eup %8643 }
0x2af0   :  { %6339 = vperm.xlu0 %8365, %v10420_v1   ;;  %v10428_v52 = vpop.eup %8645 }
0x2af1   :  { %6336 = vperm.xlu1 %8366, %v10422_v60   ;;  %v10432_v13 = vpop.eup %8647 }
0x2af2   :  { %v8650_v57 = vpop.eup %8649 }
0x2af4   :  { %6345 = vperm.xlu0 %8365, %v10426_v36  }
0x2af5   :  { %6342 = vperm.xlu1 %8366, %v10428_v52  }
0x2af8   :  { %6351 = vperm.xlu0 %8365, %v10432_v13  }
0x2af9   :  { %6348 = vperm.xlu1 %8366, %v8650_v57  }
0x2afc   :  { %6454 = vbcast.lane.b32.xlu0 %v6452_v46, 256 }
0x2b00   :  { %6461 = vbcast.lane.b32.xlu0 %v6459_v12, 256 }
0x2b04   :  { %6468 = vbcast.lane.b32.xlu0 %v6466_v28, 256 }
0x2b08   :  { %6475 = vbcast.lane.b32.xlu0 %v6473_v49, 256 }
0x2b0c   :  { %6482 = vbcast.lane.b32.xlu0 %v6480_v29, 256 }
0x2b10   :  { %6489 = vbcast.lane.b32.xlu0 %v6487_v24, 256 }
0x2b14   :  { %6496 = vbcast.lane.b32.xlu0 %v6494_v54, 256 }
0x2b18   :  { %6503 = vbcast.lane.b32.xlu0 %v6501_v50, 256 }
0x2b6b   :  { %v6331_v2 = vpop.permute.xlu0 %6330 }
0x2b6c   :  { %v6334_v42 = vpop.permute.xlu1 %6333  ;;  %v6356_v41 = vrot.slane %v6331_v2, %v9023_v34 }
0x2b6d   :  { %v6360_v19 = vrot.slane %v6334_v42, %v9023_v34 }
0x2b6f   :  { %v6340_v32 = vpop.permute.xlu0 %6339  ;;  %v6385_v55 = vsel %vm1045_vm4, %v6360_v19, %v6356_v41 }
0x2b70   :  { %v6337_v6 = vpop.permute.xlu1 %6336  ;;  %v6368_v11 = vrot.slane %v6340_v32, %v9023_v34 }
0x2b71   :  { %v6364_v53 = vrot.slane %v6337_v6, %v9023_v34 }
0x2b73   :  { %v6386_v22 = vsel %vm1047_vm5, %v6364_v53, %v6385_v55  ;;  %v6346_v5 = vpop.permute.xlu0 %6345 }
0x2b74   :  { %v6343_v59 = vpop.permute.xlu1 %6342  ;;  %v6387_v62 = vsel %vm1049_vm6, %v6368_v11, %v6386_v22  ;;  %v6376_v63 = vrot.slane %v6346_v5, %v9023_v34 }
0x2b75   :  { %v6372_v47 = vrot.slane %v6343_v59, %v9023_v34 }
0x2b77   :  { %v6388_v33 = vsel %vm1051_vm7, %v6372_v47, %v6387_v62  ;;  %v6352_v23 = vpop.permute.xlu0 %6351 }
0x2b78   :  { %v6349_v30 = vpop.permute.xlu1 %6348  ;;  %v6384_v38 = vrot.slane %v6352_v23, %v9023_v34  ;;  %v6389_v12 = vsel %vm1053_vm8, %v6376_v63, %v6388_v33 }
0x2b79   :  { %v6380_v46 = vrot.slane %v6349_v30, %v9023_v34 }
0x2b7b   :  { %v6390_v28 = vsel %vm1055_vm9, %v6380_v46, %v6389_v12  ;;  %v6455_v24 = vpop.permute.xlu0 %6454 }
0x2b7c   :  { %v6391_v49 = vsel %vm1057_vm10, %v6384_v38, %v6390_v28 }
0x2b7d   :  { %v6393_v29 = vsel %vm1060_vm11, %v6391_v49, 0.0 }
0x2b7e   :  { %6394 = vadd.xlane.f32.xlu1 %v6393_v29 }
0x2b7f   :  { %v6462_v54 = vpop.permute.xlu0 %6461 }
0x2b83   :  { %v6469_v50 = vpop.permute.xlu0 %6468 }
0x2b87   :  { %v6476_v42 = vpop.permute.xlu0 %6475 }
0x2b8b   :  { %v6483_v19 = vpop.permute.xlu0 %6482 }
0x2b8f   :  { %v6490_v11 = vpop.permute.xlu0 %6489 }
0x2b93   :  { %v6497_v23 = vpop.permute.xlu0 %6496 }
0x2c0b   :  { %v6395_v2 = vpop.xlane.xlu1 %6394 }
0x2c0c   :  { %8651 = vrcp.f32 %v6395_v2 }
0x2c16   :  { %v8652_v41 = vpop.eup %8651 }
0x2c17   :  { %v6425_v32 = vrot.slane %v8652_v41, %v9082_v51  ;;  %v6401_v6 = vrot.slane %v8652_v41, %v8961_v4  ;;  %v6405_v53 = vrot.slane %v8652_v41, %v9058_v7  ;;  %v6409_v55 = vrot.slane %v8652_v41, %v9064_v9 }
0x2c18   :  { %v6413_v59 = vrot.slane %v8652_v41, %v9070_v17  ;;  %v6417_v30 = vrot.slane %v8652_v41, %v9074_v31  ;;  %v6429_v49 = vrot.slane %v8652_v41, %v9061_v8 }
0x2c19   :  { %v6438_v22 = vmul.f32 %v10414_v44, %v6401_v6  ;;  %v6439_v5 = vmul.f32 %v10416_v3, %v6405_v53  ;;  %v6444_v47 = vmul.f32 %v8650_v57, %v6425_v32  ;;  %v6440_v33 = vmul.f32 %v10422_v60, %v6409_v55 }
0x2c1a   :  { %v6441_v12 = vmul.f32 %v10420_v1, %v6413_v59  ;;  %v6442_v44 = vmul.f32 %v10428_v52, %v6417_v30  ;;  %v6421_v3 = vrot.slane %v8652_v41, %v9078_v48 }
0x2c1b   :  { %v6513_v62 = vmul.f32 %v6455_v24, %v6438_v22  ;;  %v6514_v63 = vmul.f32 %v6462_v54, %v6439_v5  ;;  %v6519_v38 = vmul.f32 %v6497_v23, %v6444_v47  ;;  %v6515_v46 = vmul.f32 %v6469_v50, %v6440_v33  ;;  %v6504_v54 = vpop.permute.xlu0 %6503 }
0x2c1c   :  { %v6516_v57 = vmul.f32 %v6476_v42, %v6441_v12  ;;  %v6517_v28 = vmul.f32 %v6483_v19, %v6442_v44  ;;  %v6443_v60 = vmul.f32 %v10426_v36, %v6421_v3  ;;  %v6445_v24 = vmul.f32 %v10432_v13, %v6429_v49  ;;  %v10505_v44 = vld [vmem:[%s10718_s11] ss:$0 sm:$0xff] }
0x2c1d   :  { %6600 = vperm.xlu0 %8365, %v6513_v62   ;;  %6603 = vperm.xlu1 %8366, %v6514_v63  }
0x2c1e   :  { %v6518_v29 = vmul.f32 %v6490_v11, %v6443_v60  ;;  %v6520_v1 = vmul.f32 %v6504_v54, %v6445_v24 }
0x2c21   :  { %6606 = vperm.xlu0 %8365, %v6515_v46   ;;  %6618 = vperm.xlu1 %8366, %v6519_v38  }
0x2c25   :  { %6609 = vperm.xlu0 %8365, %v6516_v57  }
0x2c29   :  { %6612 = vperm.xlu0 %8365, %v6517_v28  }
0x2c2d   :  { %6615 = vperm.xlu0 %8365, %v6518_v29  }
0x2c31   :  { %6621 = vperm.xlu0 %8365, %v6520_v1  }
0x2c35   :  { %6742 = vrot.lane.b32.xlu0 %v10287_v58, %s8744_s13 }
0x2c9c   :  { %v6601_v52 = vpop.permute.xlu0 %6600  ;;  %v6604_v2 = vpop.permute.xlu1 %6603 }
0x2c9d   :  { %v6630_v19 = vrot.slane %v6604_v2, %v9023_v34  ;;  %v6626_v36 = vrot.slane %v6601_v52, %v9023_v34 }
0x2c9f   :  { %v6655_v53 = vsel %vm1045_vm4, %v6630_v19, %v6626_v36 }
0x2ca0   :  { %v6607_v50 = vpop.permute.xlu0 %6606  ;;  %v6619_v11 = vpop.permute.xlu1 %6618 }
0x2ca1   :  { %v6634_v41 = vrot.slane %v6607_v50, %v9023_v34  ;;  %v6650_v62 = vrot.slane %v6619_v11, %v9023_v34 }
0x2ca3   :  { %v6656_v55 = vsel %vm1047_vm5, %v6634_v41, %v6655_v53 }
0x2ca4   :  { %v6610_v42 = vpop.permute.xlu0 %6609 }
0x2ca5   :  { %v6638_v13 = vrot.slane %v6610_v42, %v9023_v34 }
0x2ca7   :  { %v6657_v22 = vsel %vm1049_vm6, %v6638_v13, %v6656_v55 }
0x2ca8   :  { %v6613_v32 = vpop.permute.xlu0 %6612 }
0x2ca9   :  { %v6642_v6 = vrot.slane %v6613_v32, %v9023_v34 }
0x2cab   :  { %v6658_v59 = vsel %vm1051_vm7, %v6642_v6, %v6657_v22 }
0x2cac   :  { %v6616_v58 = vpop.permute.xlu0 %6615 }
0x2cad   :  { %v6646_v5 = vrot.slane %v6616_v58, %v9023_v34 }
0x2caf   :  { %v6659_v47 = vsel %vm1053_vm8, %v6646_v5, %v6658_v59 }
0x2cb0   :  { %v6622_v63 = vpop.permute.xlu0 %6621  ;;  %v6660_v23 = vsel %vm1055_vm9, %v6650_v62, %v6659_v47 }
0x2cb1   :  { %v6654_v33 = vrot.slane %v6622_v63, %v9023_v34 }
0x2cb3   :  { %v6661_v30 = vsel %vm1057_vm10, %v6654_v33, %v6660_v23 }
0x2cb4   :  { %8173 = vmatmul.mubr.msk.f32.vlgmr.msra.gmra.mrb[34].mxu1 %vm1060_vm11, %v6661_v30  ;;  %v6743_v29 = vpop.permute.xlu0 %6742 }
0x2cb5   :  { %8341 = vmatpush3.bf16.msra.mxu1 %v8881_v14  ;;  %8183 = vmatprep.mubr.msk.f32.mxu1 %vm8740_vm2, %v8739_v0 }
0x2cb6   :  { %8342 = vmatprep.subr.bf16.mxu1 %v8741_v20 }
0x2cb9   :  { %8344 = vmatpush3.bf16.msra.mxu1 %v8907_v21 }
0x2cba   :  { %8351 = vmatprep.subr.bf16.mxu1 %v8741_v20 }
0x2d87   :  { %v6730_v38 = vpop.f32.mrb[34].mxu1 }
0x2d88   :  { %v6731_v46 = vadd.f32 %v6730_v38, %v10315_v40  ;;  %v8174_v12 = vpop.f32.mrb[35].mxu1 }
0x2d8a   :  { %v6734_v14 = vadd.f32 %v10505_v44, %v6731_v46 }
0x2d8c   :  { %8653 = vtanh.f32 %v6734_v14  ;;  %v7707_v57 = vmul.f32 -1.442695, %v6734_v14 }
0x2d8e   :  { %8655 = vpow2.f32 %v7707_v57 }
0x2d96   :  { %v8654_v3 = vpop.eup %8653 }
0x2d97   :  { %6747 = vrot.lane.b32.xlu1 %v8654_v3, %s8745_s14 }
0x2d98   :  { %v8656_v21 = vpop.eup %8655 }
0x2d99   :  { %v6738_v28 = vadd.f32 1.0, %v8656_v21 }
0x2d9b   :  { %8657 = vrcp.f32 %v6738_v28 }
0x2da5   :  { %v8658_v60 = vpop.eup %8657 }
0x2da6   :  { %v6745_v24 = vmul.f32 %v8658_v60, %v6743_v29 }
0x2e09   :  { %v6748_v49 = vpop.permute.xlu1 %6747 }
0x2e0a   :  { %v6750_v40 = vmul.f32 %v8658_v60, %v6748_v49 }
0x2e0c   :  { %6752 = vrot.lane.b32.xlu1 %v6750_v40, %s8744_s13 }
0x2e7e   :  { %v6753_v54 = vpop.permute.xlu1 %6752 }
0x2e7f   :  { %v6755_v1 = vadd.f32 %v6753_v54, %v6745_v24 }
0x2e81   :  { %8659 = vtanh.f32 %v6755_v1 }
0x2e8b   :  { %v8660_v52 = vpop.eup %8659 }
0x2e8c   :  { %6758 = vrot.lane.b32.xlu0 %v8660_v52, %s8745_s14 }
0x2e90   :  { %6768 = vrot.lane.b32.xlu0 %v6755_v1, %s8746_s15 }
0x2efe   :  { %v6759_v50 = vpop.permute.xlu0 %6758 }
0x2eff   :  { %v6761_v2 = vmul.f32 %v8658_v60, %v6759_v50 }
0x2f01   :  { %6763 = vrot.lane.b32.xlu1 %v6761_v2, %s8744_s13 }
0x2f02   :  { %v6769_v42 = vpop.permute.xlu0 %6768 }
0x2f03   :  { %6771 = vst.msk [vmem:[#allocation3] sm:$0xff] %vm47_vm1, %v6769_v42 }
0x2f0a   :  { %v10514_v19 = vld [vmem:[#allocation3] sm:$0xff] }
0x2f0b   :  { %8184 = vmatmul.mubr.msk.f32.vlgmr.msra.gmra.mrb[36].mxu1 %vm47_vm1, %v10514_v19 }
0x2f0c   :  { %8353 = vmatpush3.bf16.msra.mxu1 %v9157_v26  ;;  %8205 = vmatprep.mubr.msk.f32.mxu1 %vm8740_vm2, %v8739_v0  ;;  %v8738_v26 = vld [vmem:[%s10717_s9] sm:$0xf] }
0x2f0d   :  { %8354 = vmatprep.subr.bf16.mxu1 %v8741_v20 }
0x2f10   :  { %8356 = vmatpush3.bf16.msra.mxu1 %v9166_v27 }
0x2f73   :  { %v6764_v36 = vpop.permute.xlu1 %6763 }
0x2f74   :  { %6766 = vst.msk [vmem:[#allocation2] sm:$0xff] %vm47_vm1, %v6764_v36  ;;  %7708 = vst.msk [vmem:[%s10719_s12 + $0x30] sm:$0xff] %vm47_vm1, %v6764_v36 }
0x2f7b   :  { %v6774_v41 = vld [vmem:[#allocation2] sm:$0xff] }
0x2f7c   :  { %8195 = vmatmul.mubr.msk.f32.vlgmr.msra.gmra.mrb[36].mxu0 %vm47_vm1, %v6774_v41  ;;  %8206 = vmatmul.mubr.msk.f32.vlgmr.msra.gmra.mrb[38].mxu1 %vm47_vm1, %v6774_v41 }
0x2f7d   :  { %8209 = vmatpush3.msk.msra.mxu0 %vm1471_vm12, %v8738_v26  ;;  %8210 = vmatprep.mubr.msk.f32.mxu0 %vm8740_vm2, %v8739_v0 }
0x2fde   :  { %v6845_v20 = vpop.f32.mrb[36].mxu1 }
0x2fdf   :  { %v8185_v27 = vpop.f32.mrb[37].mxu1 }
0x304f   :  { %v6918_v32 = vpop.f32.mrb[36].mxu0  ;;  %v10536_v13 = vpop.f32.mrb[38].mxu1 }
0x3050   :  { %v6919_v6 = vadd.f32 %v6918_v32, %v6845_v20  ;;  %v8196_v53 = vpop.f32.mrb[37].mxu0  ;;  %v8207_v55 = vpop.f32.mrb[39].mxu1 }
0x3052   :  { %v6922_v58 = vadd.f32 %v10320_v15, %v6919_v6 }
0x3054   :  { %v6924_v11 = vcombine.high %v6922_v58, %v6922_v58  ;;  %v6931_v22 = vrot.slane %v6922_v58, %v8956_v61 }
0x3056   :  { %v6938_v5 = vrot.slane %v6924_v11, %v8956_v61  ;;  %v6939_v59 = vcombine.high %v6931_v22, %v6931_v22  ;;  %v6947_v47 = vrot.slane %v6931_v22, %v8956_v61 }
0x3058   :  { %v6940_v62 = vcombine.high %v6938_v5, %v6938_v5  ;;  %v6954_v0 = vrot.slane %v6938_v5, %v8956_v61  ;;  %v6961_v63 = vrot.slane %v6939_v59, %v8956_v61  ;;  %v6969_v33 = vcombine.high %v6947_v47, %v6947_v47 }
0x3059   :  { %v6976_v23 = vrot.slane %v6947_v47, %v8961_v4 }
0x305a   :  { %v6968_v30 = vrot.slane %v6940_v62, %v8956_v61  ;;  %v6971_v38 = vcombine.high %v6961_v63, %v6961_v63  ;;  %v6980_v15 = vrot.slane %v6961_v63, %v8961_v4  ;;  %v6970_v46 = vcombine.high %v6954_v0, %v6954_v0 }
0x305b   :  { %v6984_v12 = vrot.slane %v6969_v33, %v8961_v4  ;;  %v6992_v14 = vrot.slane %v6954_v0, %v8961_v4  ;;  %v7013_v3 = vadd.f32 %v10333_v56, %v6976_v23 }
0x305c   :  { %v6972_v57 = vcombine.high %v6968_v30, %v6968_v30  ;;  %v6988_v21 = vrot.slane %v6971_v38, %v8961_v4  ;;  %v6996_v28 = vrot.slane %v6968_v30, %v8961_v4  ;;  %v7014_v60 = vadd.f32 %v10339_v43, %v6980_v15 }
0x305d   :  { %v7015_v49 = vadd.f32 %v10342_v16, %v6984_v12  ;;  %v7017_v61 = vadd.f32 %v10345_v25, %v6992_v14  ;;  %8661 = vtanh.f32 %v7013_v3  ;;  %v7000_v24 = vrot.slane %v6970_v46, %v8961_v4 }
0x305e   :  { %v7004_v40 = vrot.slane %v6972_v57, %v8961_v4  ;;  %v7016_v29 = vadd.f32 %v10348_v10, %v6988_v21  ;;  %v7018_v56 = vadd.f32 %v10355_v18, %v6996_v28  ;;  %8663 = vtanh.f32 %v7014_v60 }
0x305f   :  { %8665 = vtanh.f32 %v7015_v49  ;;  %v7019_v43 = vadd.f32 %v10351_v37, %v7000_v24 }
0x3060   :  { %8667 = vtanh.f32 %v7017_v61  ;;  %v7020_v54 = vadd.f32 %v10358_v39, %v7004_v40 }
0x3061   :  { %8669 = vtanh.f32 %v7016_v29 }
0x3062   :  { %8671 = vtanh.f32 %v7018_v56 }
0x3063   :  { %8673 = vtanh.f32 %v7020_v54 }
0x3064   :  { %8675 = vtanh.f32 %v7019_v43 }
0x3067   :  { %v8662_v16 = vpop.eup %8661 }
0x3068   :  { %v7029_v25 = vmul.f32 %v10364_v45, %v8662_v16  ;;  %v8664_v1 = vpop.eup %8663 }
0x3069   :  { %v8666_v10 = vpop.eup %8665  ;;  %v7030_v18 = vmul.f32 %v10364_v45, %v8664_v1 }
0x306a   :  { %v7037_v52 = vsel %vm651_vm3, %v7029_v25, 0.0  ;;  %v8668_v50 = vpop.eup %8667  ;;  %v7031_v39 = vmul.f32 %v10364_v45, %v8666_v10 }
0x306b   :  { %7038 = vadd.xlane.f32.xlu1 %v7037_v52  ;;  %v8670_v2 = vpop.eup %8669  ;;  %v7040_v42 = vsel %vm651_vm3, %v7030_v18, 0.0  ;;  %v7033_v32 = vmul.f32 %v10364_v45, %v8668_v50 }
0x306c   :  { %v8672_v37 = vpop.eup %8671  ;;  %7041 = vadd.xlane.f32.xlu0 %v7040_v42  ;;  %v7032_v36 = vmul.f32 %v10364_v45, %v8670_v2  ;;  %v7043_v27 = vsel %vm651_vm3, %v7031_v39, 0.0 }
0x306d   :  { %v7034_v26 = vmul.f32 %v10364_v45, %v8672_v37  ;;  %v8674_v20 = vpop.eup %8673  ;;  %v7049_v58 = vsel %vm651_vm3, %v7033_v32, 0.0 }
0x306e   :  { %v7046_v41 = vsel %vm651_vm3, %v7032_v36, 0.0  ;;  %v8676_v6 = vpop.eup %8675  ;;  %v7036_v55 = vmul.f32 %v10364_v45, %v8674_v20 }
0x306f   :  { %7047 = vadd.xlane.f32.xlu1 %v7046_v41  ;;  %v7052_v53 = vsel %vm651_vm3, %v7034_v26, 0.0  ;;  %v7035_v11 = vmul.f32 %v10364_v45, %v8676_v6 }
0x3070   :  { %7044 = vadd.xlane.f32.xlu0 %v7043_v27  ;;  %v7058_v22 = vsel %vm651_vm3, %v7036_v55, 0.0 }
0x3071   :  { %v7055_v5 = vsel %vm651_vm3, %v7035_v11, 0.0 }
0x3073   :  { %7053 = vadd.xlane.f32.xlu1 %v7052_v53 }
0x3074   :  { %7050 = vadd.xlane.f32.xlu0 %v7049_v58 }
0x3077   :  { %7059 = vadd.xlane.f32.xlu1 %v7058_v22 }
0x3078   :  { %7056 = vadd.xlane.f32.xlu0 %v7055_v5 }
0x30f8   :  { %v7039_v59 = vpop.xlane.xlu1 %7038 }
0x30f9   :  { %v7042_v47 = vpop.xlane.xlu0 %7041  ;;  %v7061_v0 = vadd.f32 %v7039_v59, %v9025_v35 }
0x30fa   :  { %v7062_v62 = vadd.f32 %v7042_v47, %v9025_v35 }
0x30fb   :  { %v7080_v45 = vrot.slane %v7061_v0, %v9023_v34 }
0x30fc   :  { %v7048_v63 = vpop.xlane.xlu1 %7047  ;;  %v7084_v33 = vrot.slane %v7062_v62, %v9023_v34 }
0x30fd   :  { %v7045_v23 = vpop.xlane.xlu0 %7044  ;;  %v7064_v38 = vadd.f32 %v7048_v63, %v9025_v35 }
0x30fe   :  { %v7063_v30 = vadd.f32 %v7045_v23, %v9025_v35  ;;  %v7109_v12 = vsel %vm1045_vm4, %v7084_v33, %v7080_v45 }
0x30ff   :  { %v7092_v21 = vrot.slane %v7064_v38, %v9023_v34 }
0x3100   :  { %v7088_v15 = vrot.slane %v7063_v30, %v9023_v34  ;;  %v7054_v46 = vpop.xlane.xlu1 %7053 }
0x3101   :  { %v7051_v14 = vpop.xlane.xlu0 %7050  ;;  %v7066_v28 = vadd.f32 %v7054_v46, %v9025_v35 }
0x3102   :  { %v7110_v3 = vsel %vm1047_vm5, %v7088_v15, %v7109_v12  ;;  %v7065_v57 = vadd.f32 %v7051_v14, %v9025_v35  ;;  %v7711_v14 = vld [vmem:[%s10715_s0 + $0x38] sm:$0xff] }
0x3103   :  { %v7111_v61 = vsel %vm1049_vm6, %v7092_v21, %v7110_v3  ;;  %v7100_v54 = vrot.slane %v7066_v28, %v9023_v34  ;;  %v7316_v3 = vrot.slane %v7711_v14, %v8961_v4  ;;  %v7330_v21 = vrot.slane %v7711_v14, %v9064_v9 }
0x3104   :  { %v7096_v60 = vrot.slane %v7065_v57, %v9023_v34  ;;  %v7060_v49 = vpop.xlane.xlu1 %7059 }
0x3105   :  { %v7068_v40 = vadd.f32 %v7060_v49, %v9025_v35  ;;  %v7057_v29 = vpop.xlane.xlu0 %7056  ;;  %v7351_v49 = vrot.slane %v7711_v14, %v9078_v48 }
0x3106   :  { %v7112_v24 = vsel %vm1051_vm7, %v7096_v60, %v7111_v61  ;;  %v7067_v56 = vadd.f32 %v7057_v29, %v9025_v35  ;;  %v7344_v60 = vrot.slane %v7711_v14, %v9074_v31  ;;  %v7358_v61 = vrot.slane %v7711_v14, %v9082_v51 }
0x3107   :  { %v7108_v16 = vrot.slane %v7068_v40, %v9023_v34  ;;  %v7113_v25 = vsel %vm1053_vm8, %v7100_v54, %v7112_v24 }
0x3108   :  { %v7104_v43 = vrot.slane %v7067_v56, %v9023_v34 }
0x310a   :  { %v7114_v1 = vsel %vm1055_vm9, %v7104_v43, %v7113_v25 }
0x310b   :  { %v7115_v10 = vsel %vm1057_vm10, %v7108_v16, %v7114_v1 }
0x310c   :  { %v7117_v52 = vsel %vm1060_vm11, %v7115_v10, -inf }
0x310d   :  { %7118 = vmax.xlane.f32.xlu0 %v7117_v52 }
0x319a   :  { %v7119_v18 = vpop.xlane.xlu0 %7118 }
0x319b   :  { %v7124_v50 = vrot.slane %v7119_v18, %v8961_v4  ;;  %v7128_v35 = vrot.slane %v7119_v18, %v9058_v7  ;;  %v7132_v2 = vrot.slane %v7119_v18, %v9064_v9  ;;  %v7140_v42 = vrot.slane %v7119_v18, %v9074_v31 }
0x319c   :  { %v7136_v39 = vrot.slane %v7119_v18, %v9070_v17  ;;  %v7148_v26 = vrot.slane %v7119_v18, %v9082_v51  ;;  %v7144_v6 = vrot.slane %v7119_v18, %v9078_v48  ;;  %v7152_v22 = vrot.slane %v7119_v18, %v9061_v8 }
0x319d   :  { %v7161_v37 = vsub.f32 %v7061_v0, %v7124_v50  ;;  %v7162_v36 = vsub.f32 %v7062_v62, %v7128_v35  ;;  %v7163_v41 = vsub.f32 %v7063_v30, %v7132_v2  ;;  %v7165_v20 = vsub.f32 %v7065_v57, %v7140_v42 }
0x319e   :  { %v7164_v53 = vsub.f32 %v7064_v38, %v7136_v39  ;;  %v7167_v58 = vsub.f32 %v7067_v56, %v7148_v26  ;;  %v7166_v5 = vsub.f32 %v7066_v28, %v7144_v6  ;;  %v7168_v62 = vsub.f32 %v7068_v40, %v7152_v22 }
0x319f   :  { %v7169_v27 = vmul.f32 1.442695, %v7161_v37  ;;  %v7171_v32 = vmul.f32 1.442695, %v7162_v36  ;;  %v7173_v55 = vmul.f32 1.442695, %v7163_v41  ;;  %v7323_v57 = vrot.slane %v7711_v14, %v9058_v7 }
0x31a0   :  { %v7177_v11 = vmul.f32 1.442695, %v7165_v20  ;;  %v7175_v59 = vmul.f32 1.442695, %v7164_v53  ;;  %v7181_v47 = vmul.f32 1.442695, %v7167_v58  ;;  %v7337_v28 = vrot.slane %v7711_v14, %v9070_v17 }
0x31a1   :  { %8677 = vpow2.f32 %v7169_v27  ;;  %v7179_v0 = vmul.f32 1.442695, %v7166_v5  ;;  %v7183_v23 = vmul.f32 1.442695, %v7168_v62  ;;  %v7365_v40 = vrot.slane %v7711_v14, %v9061_v8 }
0x31a2   :  { %8679 = vpow2.f32 %v7171_v32 }
0x31a3   :  { %8681 = vpow2.f32 %v7173_v55 }
0x31a4   :  { %8683 = vpow2.f32 %v7177_v11 }
0x31a5   :  { %8685 = vpow2.f32 %v7175_v59 }
0x31a6   :  { %8687 = vpow2.f32 %v7181_v47 }
0x31a7   :  { %8689 = vpow2.f32 %v7179_v0 }
0x31a8   :  { %8691 = vpow2.f32 %v7183_v23 }
0x31ab   :  { %v10609_v63 = vpop.eup %8677 }
0x31ac   :  { %v10611_v33 = vpop.eup %8679  ;;  %7194 = vperm.xlu1 %8366, %v10609_v63  }
0x31ad   :  { %7197 = vperm.xlu0 %8365, %v10611_v33   ;;  %v10615_v30 = vpop.eup %8681 }
0x31ae   :  { %v10617_v45 = vpop.eup %8683 }
0x31af   :  { %v10621_v38 = vpop.eup %8685 }
0x31b0   :  { %7200 = vperm.xlu1 %8366, %v10615_v30   ;;  %v10623_v15 = vpop.eup %8687 }
0x31b1   :  { %7206 = vperm.xlu0 %8365, %v10617_v45   ;;  %v10627_v46 = vpop.eup %8689 }
0x31b2   :  { %v10630_v12 = vpop.eup %8691 }
0x31b4   :  { %7203 = vperm.xlu1 %8366, %v10621_v38  }
0x31b5   :  { %7212 = vperm.xlu0 %8365, %v10623_v15  }
0x31b8   :  { %7209 = vperm.xlu1 %8366, %v10627_v46  }
0x31bc   :  { %7215 = vperm.xlu1 %8366, %v10630_v12  }
0x31c0   :  { %7318 = vbcast.lane.b32.xlu1 %v7316_v3, 256 }
0x31c4   :  { %7325 = vbcast.lane.b32.xlu1 %v7323_v57, 256 }
0x31c8   :  { %7332 = vbcast.lane.b32.xlu1 %v7330_v21, 256 }
0x31cc   :  { %7339 = vbcast.lane.b32.xlu1 %v7337_v28, 256 }
0x31d0   :  { %7346 = vbcast.lane.b32.xlu1 %v7344_v60, 256 }
0x31d4   :  { %7353 = vbcast.lane.b32.xlu1 %v7351_v49, 256 }
0x31d8   :  { %7360 = vbcast.lane.b32.xlu1 %v7358_v61, 256 }
0x31dc   :  { %7367 = vbcast.lane.b32.xlu1 %v7365_v40, 256 }
0x322b   :  { %v7195_v29 = vpop.permute.xlu1 %7194 }
0x322c   :  { %v7198_v24 = vpop.permute.xlu0 %7197  ;;  %v7220_v43 = vrot.slane %v7195_v29, %v9023_v34 }
0x322d   :  { %v7224_v54 = vrot.slane %v7198_v24, %v9023_v34 }
0x322f   :  { %v7201_v56 = vpop.permute.xlu1 %7200  ;;  %v7249_v10 = vsel %vm1045_vm4, %v7224_v54, %v7220_v43 }
0x3230   :  { %v7228_v16 = vrot.slane %v7201_v56, %v9023_v34  ;;  %v7207_v25 = vpop.permute.xlu0 %7206 }
0x3231   :  { %v7236_v35 = vrot.slane %v7207_v25, %v9023_v34 }
0x3232   :  { %v7250_v18 = vsel %vm1047_vm5, %v7228_v16, %v7249_v10 }
0x3233   :  { %v7204_v1 = vpop.permute.xlu1 %7203 }
0x3234   :  { %v7232_v52 = vrot.slane %v7204_v1, %v9023_v34  ;;  %v7213_v42 = vpop.permute.xlu0 %7212 }
0x3235   :  { %v7244_v41 = vrot.slane %v7213_v42, %v9023_v34 }
0x3236   :  { %v7251_v50 = vsel %vm1049_vm6, %v7232_v52, %v7250_v18 }
0x3237   :  { %v7210_v2 = vpop.permute.xlu1 %7209  ;;  %v7252_v37 = vsel %vm1051_vm7, %v7236_v35, %v7251_v50 }
0x3238   :  { %v7240_v39 = vrot.slane %v7210_v2, %v9023_v34 }
0x323a   :  { %v7253_v36 = vsel %vm1053_vm8, %v7240_v39, %v7252_v37 }
0x323b   :  { %v7216_v26 = vpop.permute.xlu1 %7215  ;;  %v7254_v27 = vsel %vm1055_vm9, %v7244_v41, %v7253_v36 }
0x323c   :  { %v7248_v20 = vrot.slane %v7216_v26, %v9023_v34 }
0x323e   :  { %v7255_v32 = vsel %vm1057_vm10, %v7248_v20, %v7254_v27 }
0x323f   :  { %v7257_v6 = vsel %vm1060_vm11, %v7255_v32, 0.0  ;;  %v7319_v53 = vpop.permute.xlu1 %7318 }
0x3240   :  { %7258 = vadd.xlane.f32.xlu0 %v7257_v6 }
0x3243   :  { %v7326_v55 = vpop.permute.xlu1 %7325 }
0x3247   :  { %v7333_v58 = vpop.permute.xlu1 %7332 }
0x324b   :  { %v7340_v22 = vpop.permute.xlu1 %7339 }
0x324f   :  { %v7347_v5 = vpop.permute.xlu1 %7346 }
0x3253   :  { %v7354_v14 = vpop.permute.xlu1 %7353 }
0x32cd   :  { %v7259_v11 = vpop.xlane.xlu0 %7258 }
0x32ce   :  { %8693 = vrcp.f32 %v7259_v11 }
0x32d8   :  { %v8694_v59 = vpop.eup %8693 }
0x32d9   :  { %v7289_v47 = vrot.slane %v8694_v59, %v9082_v51  ;;  %v7265_v62 = vrot.slane %v8694_v59, %v8961_v4  ;;  %v7269_v0 = vrot.slane %v8694_v59, %v9058_v7  ;;  %v7273_v23 = vrot.slane %v8694_v59, %v9064_v9  ;;  %v7361_v4 = vpop.permute.xlu1 %7360 }
0x32da   :  { %v7277_v21 = vrot.slane %v8694_v59, %v9070_v17  ;;  %v7281_v7 = vrot.slane %v8694_v59, %v9074_v31  ;;  %v7285_v17 = vrot.slane %v8694_v59, %v9078_v48  ;;  %v7293_v29 = vrot.slane %v8694_v59, %v9061_v8 }
0x32db   :  { %v7302_v3 = vmul.f32 %v10609_v63, %v7265_v62  ;;  %v7303_v57 = vmul.f32 %v10611_v33, %v7269_v0  ;;  %v7308_v28 = vmul.f32 %v10623_v15, %v7289_v47  ;;  %v7304_v61 = vmul.f32 %v10615_v30, %v7273_v23 }
0x32dc   :  { %v7305_v40 = vmul.f32 %v10621_v38, %v7277_v21  ;;  %v7306_v63 = vmul.f32 %v10617_v45, %v7281_v7  ;;  %v7307_v30 = vmul.f32 %v10627_v46, %v7285_v17  ;;  %v7309_v31 = vmul.f32 %v10630_v12, %v7293_v29 }
0x32dd   :  { %v7377_v60 = vmul.f32 %v7319_v53, %v7302_v3  ;;  %v7378_v49 = vmul.f32 %v7326_v55, %v7303_v57  ;;  %v7383_v51 = vmul.f32 %v7361_v4, %v7308_v28  ;;  %v7379_v9 = vmul.f32 %v7333_v58, %v7304_v61  ;;  %v7368_v56 = vpop.permute.xlu1 %7367 }
0x32de   :  { %v7380_v33 = vmul.f32 %v7340_v22, %v7305_v40  ;;  %v7381_v15 = vmul.f32 %v7347_v5, %v7306_v63  ;;  %v7382_v24 = vmul.f32 %v7354_v14, %v7307_v30  ;;  %v7384_v38 = vmul.f32 %v7368_v56, %v7309_v31 }
0x32df   :  { %7464 = vperm.xlu0 %8365, %v7377_v60   ;;  %7467 = vperm.xlu1 %8366, %v7378_v49  }
0x32e3   :  { %7470 = vperm.xlu1 %8366, %v7379_v9   ;;  %7482 = vperm.xlu0 %8365, %v7383_v51  }
0x32e7   :  { %7473 = vperm.xlu1 %8366, %v7380_v33  }
0x32eb   :  { %7476 = vperm.xlu1 %8366, %v7381_v15  }
0x32ef   :  { %7479 = vperm.xlu1 %8366, %v7382_v24  }
0x32f3   :  { %7485 = vperm.xlu1 %8366, %v7384_v38  }
0x32f7   :  { %7606 = vrot.lane.b32.xlu1 %v10514_v19, %s8744_s13 }
0x335e   :  { %v7468_v45 = vpop.permute.xlu1 %7467  ;;  %v7465_v54 = vpop.permute.xlu0 %7464 }
0x335f   :  { %v7490_v16 = vrot.slane %v7465_v54, %v9023_v34  ;;  %v7494_v46 = vrot.slane %v7468_v45, %v9023_v34 }
0x3361   :  { %v7519_v10 = vsel %vm1045_vm4, %v7494_v46, %v7490_v16 }
0x3362   :  { %v7471_v48 = vpop.permute.xlu1 %7470  ;;  %v7483_v18 = vpop.permute.xlu0 %7482 }
0x3363   :  { %v7498_v8 = vrot.slane %v7471_v48, %v9023_v34  ;;  %v7514_v39 = vrot.slane %v7483_v18, %v9023_v34 }
0x3365   :  { %v7520_v52 = vsel %vm1047_vm5, %v7498_v8, %v7519_v10 }
0x3366   :  { %v7474_v43 = vpop.permute.xlu1 %7473 }
0x3367   :  { %v7502_v12 = vrot.slane %v7474_v43, %v9023_v34 }
0x3369   :  { %v7521_v50 = vsel %vm1049_vm6, %v7502_v12, %v7520_v52 }
0x336a   :  { %v7477_v25 = vpop.permute.xlu1 %7476 }
0x336b   :  { %v7506_v1 = vrot.slane %v7477_v25, %v9023_v34 }
0x336d   :  { %v7522_v2 = vsel %vm1051_vm7, %v7506_v1, %v7521_v50 }
0x336e   :  { %v7480_v19 = vpop.permute.xlu1 %7479 }
0x336f   :  { %v7510_v35 = vrot.slane %v7480_v19, %v9023_v34 }
0x3371   :  { %v7523_v42 = vsel %vm1053_vm8, %v7510_v35, %v7522_v2 }
0x3372   :  { %v7486_v37 = vpop.permute.xlu1 %7485  ;;  %v7524_v41 = vsel %vm1055_vm9, %v7514_v39, %v7523_v42 }
0x3373   :  { %v7518_v36 = vrot.slane %v7486_v37, %v9023_v34 }
0x3375   :  { %v7525_v26 = vsel %vm1057_vm10, %v7518_v36, %v7524_v41 }
0x3376   :  { %8211 = vmatmul.mubr.msk.f32.vlgmr.msra.gmra.mrb[38].mxu0 %vm1060_vm11, %v7525_v26  ;;  %v7607_v59 = vpop.permute.xlu1 %7606 }
0x3449   :  { %v7594_v20 = vpop.f32.mrb[38].mxu0 }
0x344a   :  { %v7595_v27 = vadd.f32 %v7594_v20, %v10536_v13  ;;  %v8212_v32 = vpop.f32.mrb[39].mxu0 }
0x344c   :  { %v7598_v6 = vadd.f32 %v10505_v44, %v7595_v27 }
0x344e   :  { %8695 = vtanh.f32 %v7598_v6  ;;  %v7715_v55 = vmul.f32 -1.442695, %v7598_v6 }
0x3450   :  { %8697 = vpow2.f32 %v7715_v55 }
0x3458   :  { %v8696_v53 = vpop.eup %8695 }
0x3459   :  { %7611 = vrot.lane.b32.xlu0 %v8696_v53, %s8745_s14 }
0x345a   :  { %v8698_v58 = vpop.eup %8697 }
0x345b   :  { %v7602_v34 = vadd.f32 1.0, %v8698_v58 }
0x345d   :  { %8699 = vrcp.f32 %v7602_v34 }
0x3467   :  { %v8700_v11 = vpop.eup %8699 }
0x3468   :  { %v7609_v47 = vmul.f32 %v8700_v11, %v7607_v59 }
0x34cb   :  { %v7612_v22 = vpop.permute.xlu0 %7611 }
0x34cc   :  { %v7614_v5 = vmul.f32 %v8700_v11, %v7612_v22 }
0x34ce   :  { %7616 = vrot.lane.b32.xlu0 %v7614_v5, %s8744_s13 }
0x3540   :  { %v7617_v13 = vpop.permute.xlu0 %7616 }
0x3541   :  { %v7619_v62 = vadd.f32 %v7617_v13, %v7609_v47 }
0x3543   :  { %8701 = vtanh.f32 %v7619_v62 }
0x354d   :  { %v8702_v44 = vpop.eup %8701 }
0x354e   :  { %7622 = vrot.lane.b32.xlu1 %v8702_v44, %s8745_s14 }
0x3552   :  { %7632 = vrot.lane.b32.xlu1 %v7619_v62, %s8746_s15 }
0x35c0   :  { %v7623_v0 = vpop.permute.xlu1 %7622 }
0x35c1   :  { %v7625_v23 = vmul.f32 %v8700_v11, %v7623_v0 }
0x35c3   :  { %7627 = vrot.lane.b32.xlu0 %v7625_v23, %s8744_s13 }
0x35c4   :  { %v7633_v14 = vpop.permute.xlu1 %7632 }
0x35c5   :  { %7635 = vst.msk [vmem:[#allocation3] sm:$0xff] %vm47_vm1, %v7633_v14 }
0x3635   :  { %v7628_v3 = vpop.permute.xlu0 %7627 }
0x3636   :  { %7630 = vst.msk [vmem:[#allocation2] sm:$0xff] %vm47_vm1, %v7628_v3  ;;  %7716 = vst.msk [vmem:[%s10719_s12 + $0x38] sm:$0xff] %vm47_vm1, %v7628_v3 }

</bundles_post_ra>
